<compile_context>
chip_gen: v7x
topology: tpu7x:2x2x1
jax: 0.10.0
libtpu: 0.0.40
codegen_flags: <defaults>
</compile_context>

<pallas_src>
import numpy as np
import jax
import jax.numpy as jnp
from jax.experimental import pallas as pl
from jax.experimental.pallas import tpu as pltpu

N_MFCC = 13
HIDDEN = 64           # LSTM hidden size per direction
GATES = 4 * HIDDEN    # 256
BI_DIM = 2 * HIDDEN   # 128

# Row permutation [i, f, g, o] -> [i, f, o, g] (applied to W_ih, W_hh, b in the wrapper).
_GATE_PERM = np.concatenate([
    np.arange(0, 2 * HIDDEN),            # i, f
    np.arange(3 * HIDDEN, 4 * HIDDEN),   # o
    np.arange(2 * HIDDEN, 3 * HIDDEN),   # g
])


def syllable_kernel(gxf_ref,   # (T, 256, NT) bf16  fwd input gates x@W_ih^T + b, rows [i,f,o,g]
                    gxb_ref,   # (256, NT)    bf16  bwd input gates at t = T-1
                    whh_ref,   # (256, 64)    bf16  fwd W_hh, rows [i,f,o,g]
                    w1f_ref,   # (64, 64)     bf16  W1[:, :64]  (acts on forward h)
                    w1b_ref,   # (64, 64)     bf16  W1[:, 64:]  (acts on backward h)
                    b1_ref,    # (64, 1)      f32
                    w2_ref,    # (32, 64)     bf16
                    b2_ref,    # (32, 1)      f32
                    w3_ref,    # (32, 1)      f32   (= PyTorch W3.T)
                    b3_ref,    # (1, 1)       f32
                    out_ref):  # (1, NT)      f32   lane-dense output row
    T = gxf_ref.shape[0]
    nt = gxf_ref.shape[2]

    whh = whh_ref[...]                                   # load once, reused every step

    h = jnp.zeros((HIDDEN, nt), jnp.float32)
    c = jnp.zeros((HIDDEN, nt), jnp.float32)

    # Forward LSTM, statically unrolled over the short fixed T axis (serial recurrence).
    for t in range(T):
        gates = jnp.dot(whh, h.astype(jnp.bfloat16),
                        preferred_element_type=jnp.float32) + gxf_ref[t]   # (256, NT) f32
        sig = jax.nn.sigmoid(gates[0:3 * HIDDEN, :])     # i, f, o in one EUP pass
        i_g = sig[0:HIDDEN]
        f_g = sig[HIDDEN:2 * HIDDEN]
        o_g = sig[2 * HIDDEN:3 * HIDDEN]
        g_g = jnp.tanh(gates[3 * HIDDEN:4 * HIDDEN, :])
        c = f_g * c + i_g * g_g
        h = o_g * jnp.tanh(c)

    # Backward-direction output at position T-1: one cell step from zero state on
    # x[:, T-1], so the recurrent term is zero (and the f gate is irrelevant since c0=0).
    gxb = gxb_ref[...].astype(jnp.float32)
    i_b = jax.nn.sigmoid(gxb[0:HIDDEN])
    o_b = jax.nn.sigmoid(gxb[2 * HIDDEN:3 * HIDDEN])
    g_b = jnp.tanh(gxb[3 * HIDDEN:4 * HIDDEN])
    h_b = o_b * jnp.tanh(i_b * g_b)

    # tdnn MLP in feature-major layout (dropout = identity in eval mode).  W1 is split so
    # the (128, NT) bidirectional feature never needs to be materialized / concatenated.
    h1 = jnp.maximum(
        jnp.dot(w1f_ref[...], h.astype(jnp.bfloat16), preferred_element_type=jnp.float32)
        + jnp.dot(w1b_ref[...], h_b.astype(jnp.bfloat16), preferred_element_type=jnp.float32)
        + b1_ref[...], 0.0)
    h2 = jnp.maximum(
        jnp.dot(w2_ref[...], h1.astype(jnp.bfloat16),
                preferred_element_type=jnp.float32) + b2_ref[...], 0.0)

    # Final Linear(32, 1) + Sigmoid as a VPU multiply + sublane reduce -> lane-dense row.
    logits = jnp.sum(h2 * w3_ref[...], axis=0, keepdims=True) + b3_ref[...]   # (1, NT)
    out_ref[...] = jax.nn.sigmoid(logits)


def init_params(key):
    """Deterministic synthetic parameters in PyTorch layout / gate order [i, f, g, o]."""
    ks = jax.random.split(key, 16)
    s_lstm = 1.0 / jnp.sqrt(jnp.float32(HIDDEN))

    def u(k, shape, scale):
        return jax.random.uniform(k, shape, jnp.float32, -scale, scale)

    return {
        # nn.LSTM parameters (bias already summed: b_ih + b_hh, as PyTorch adds both).
        "wih_f": u(ks[0], (GATES, N_MFCC), s_lstm),
        "whh_f": u(ks[1], (GATES, HIDDEN), s_lstm),
        "b_f":   u(ks[2], (GATES,), s_lstm) + u(ks[3], (GATES,), s_lstm),
        "wih_b": u(ks[4], (GATES, N_MFCC), s_lstm),
        "whh_b": u(ks[5], (GATES, HIDDEN), s_lstm),  # unused by kernel (bwd step starts from h0=c0=0)
        "b_b":   u(ks[6], (GATES,), s_lstm) + u(ks[7], (GATES,), s_lstm),
        # tdnn Linear layers, PyTorch layout (out_features, in_features).
        "w1": u(ks[8], (64, BI_DIM), 1.0 / jnp.sqrt(jnp.float32(BI_DIM))),
        "b1": u(ks[9], (64,), 1.0 / jnp.sqrt(jnp.float32(BI_DIM))),
        "w2": u(ks[10], (32, 64), 1.0 / jnp.sqrt(jnp.float32(64))),
        "b2": u(ks[11], (32,), 1.0 / jnp.sqrt(jnp.float32(64))),
        "w3": u(ks[12], (1, 32), 1.0 / jnp.sqrt(jnp.float32(32))),
        "b3": u(ks[13], (1,), 1.0 / jnp.sqrt(jnp.float32(32))),
    }


def _pick_n_tile(n):
    # Largest batch tile (multiple of 128) dividing N; 512 keeps bf16 blocks ~2 MiB so
    # double buffering fits comfortably in v5e's 16 MiB scoped VMEM and v7x's 64 MiB.
    for cand in (512, 256, 128):
        if n % cand == 0:
            return cand
    raise ValueError("B*W must be a multiple of 128 (required by the original view(-1, 128, 128))")


@jax.jit
def syllable_classifier_forward(x, params):
    """x: (B, W, T, n_mfcc) float32. Returns (B*W // 128, 128, 1), as in the PyTorch module."""
    B, W, T, F = x.shape
    assert F == N_MFCC
    N = B * W
    assert N % 128 == 0, "original module's x.view(-1, 128, 128) requires B*W % 128 == 0"
    n_tile = _pick_n_tile(N)
    x_flat = x.reshape(N, T, F)

    # Gate-row permutation [i,f,g,o] -> [i,f,o,g] (kernel slices sigmoid/tanh contiguously).
    perm = _GATE_PERM
    wih_f = params["wih_f"][perm]
    whh_f = params["whh_f"][perm].astype(jnp.bfloat16)
    b_f = params["b_f"][perm]
    wih_b = params["wih_b"][perm]
    b_b = params["b_b"][perm]

    # Hoisted input projections (plain XLA matmuls; fold the LSTM biases and produce the
    # feature-major, time-major layout directly — no separate HBM transpose of x).
    gxf = (jnp.einsum("gf,ntf->tgn", wih_f, x_flat)
           + b_f[None, :, None]).astype(jnp.bfloat16)              # (T, 256, N)
    gxb = (jnp.einsum("gf,nf->gn", wih_b, x_flat[:, T - 1, :])
           + b_b[:, None]).astype(jnp.bfloat16)                    # (256, N)

    w1 = params["w1"].astype(jnp.bfloat16)     # (64, 128)
    w1f = w1[:, :HIDDEN]                       # (64, 64) acts on forward h
    w1b = w1[:, HIDDEN:]                       # (64, 64) acts on backward h
    b1 = params["b1"][:, None]                 # (64, 1)
    w2 = params["w2"].astype(jnp.bfloat16)     # (32, 64)
    b2 = params["b2"][:, None]                 # (32, 1)
    w3 = params["w3"].T                        # (32, 1)
    b3 = params["b3"][:, None]                 # (1, 1)

    rep = lambda i: (0, 0)                     # weights: same block every grid step
    grid = (N // n_tile,)

    cost = pl.CostEstimate(
        flops=2 * T * N * HIDDEN * GATES + 2 * N * (BI_DIM * HIDDEN + HIDDEN * 32 + 32),
        transcendentals=N * (T * 5 * HIDDEN + 4 * HIDDEN + 1),
        bytes_accessed=(2 * gxf.size + 2 * gxb.size + 4 * N
                        + 2 * (whh_f.size + w1.size + w2.size)
                        + 4 * (b1.size + b2.size + w3.size + b3.size)),
    )

    out = pl.pallas_call(
        syllable_kernel,
        out_shape=jax.ShapeDtypeStruct((1, N), jnp.float32),
        grid_spec=pltpu.PrefetchScalarGridSpec(
            num_scalar_prefetch=0,
            grid=grid,
            in_specs=[
                pl.BlockSpec((T, GATES, n_tile), lambda i: (0, 0, i)),   # gxf
                pl.BlockSpec((GATES, n_tile), lambda i: (0, i)),         # gxb
                pl.BlockSpec((GATES, HIDDEN), rep),                      # whh_f
                pl.BlockSpec((HIDDEN, HIDDEN), rep),                     # w1f
                pl.BlockSpec((HIDDEN, HIDDEN), rep),                     # w1b
                pl.BlockSpec((HIDDEN, 1), rep),                          # b1
                pl.BlockSpec((32, HIDDEN), rep),                         # w2
                pl.BlockSpec((32, 1), rep),                              # b2
                pl.BlockSpec((32, 1), rep),                              # w3
                pl.BlockSpec((1, 1), rep),                               # b3
            ],
            out_specs=pl.BlockSpec((1, n_tile), lambda i: (0, i)),
        ),
        compiler_params=pltpu.CompilerParams(
            dimension_semantics=("parallel",),
            vmem_limit_bytes=32 * 1024 * 1024,
        ),
        cost_estimate=cost,
    )(gxf, gxb, whh_f, w1f, w1b, b1, w2, b2, w3, b3)

    # The MLP acts on the last dim only, so applying it on (N,) rows then reshaping is
    # identical to PyTorch's view(-1, 128, 128) -> tdnn -> squeeze(1).
    return out.reshape(N // 128, 128, 1)


def reference_forward(x, params):
    """Pure-JAX (f32) reference of the PyTorch module, for a numerical sanity check."""
    B, W, T, F = x.shape
    N = B * W
    xf = x.reshape(N, T, F)

    def cell(x_t, h, c, wih, whh, b):
        gates = x_t @ wih.T + h @ whh.T + b
        i = jax.nn.sigmoid(gates[:, 0:HIDDEN])
        f = jax.nn.sigmoid(gates[:, HIDDEN:2 * HIDDEN])
        g = jnp.tanh(gates[:, 2 * HIDDEN:3 * HIDDEN])
        o = jax.nn.sigmoid(gates[:, 3 * HIDDEN:4 * HIDDEN])
        c = f * c + i * g
        return o * jnp.tanh(c), c

    h = jnp.zeros((N, HIDDEN), jnp.float32)
    c = jnp.zeros((N, HIDDEN), jnp.float32)
    for t in range(T):
        h, c = cell(xf[:, t, :], h, c, params["wih_f"], params["whh_f"], params["b_f"])
    hb, _ = cell(xf[:, T - 1, :], jnp.zeros((N, HIDDEN), jnp.float32),
                 jnp.zeros((N, HIDDEN), jnp.float32),
                 params["wih_b"], params["whh_b"], params["b_b"])
    feat = jnp.concatenate([h, hb], axis=1)
    h1 = jax.nn.relu(feat @ params["w1"].T + params["b1"])
    h2 = jax.nn.relu(h1 @ params["w2"].T + params["b2"])
    logit = h2 @ params["w3"].T + params["b3"]
    return jax.nn.sigmoid(logit).reshape(N // 128, 128, 1)


if __name__ == "__main__":
    key = jax.random.PRNGKey(0)
    k_x, k_p = jax.random.split(key)

    # Small shapes consistent with the module: batch=2, windows=64, seq=8, n_mfcc=13.
    x = jax.random.normal(k_x, (2, 64, 8, N_MFCC), jnp.float32)
    params = init_params(k_p)

    out = jax.block_until_ready(syllable_classifier_forward(x, params))

    assert out.shape == (1, 128, 1), out.shape
    assert bool(jnp.all((out >= 0.0) & (out <= 1.0)))

    ref = reference_forward(x, params)
    max_err = float(jnp.max(jnp.abs(out - ref)))
    assert max_err < 5e-2, f"max abs error vs reference: {max_err}"

    print("KERNEL_OK")
</pallas_src>

<mosaic_0001>
module attributes {stable_mosaic.version = 11 : i64} {
  func.func @syllable_kernel(%arg0: i32, %arg1: memref<8x256x128xbf16, #tpu.memory_space<vmem>>, %arg2: memref<256x128xbf16, #tpu.memory_space<vmem>>, %arg3: memref<256x64xbf16, #tpu.memory_space<vmem>>, %arg4: memref<64x64xbf16, #tpu.memory_space<vmem>>, %arg5: memref<64x64xbf16, #tpu.memory_space<vmem>>, %arg6: memref<64x1xf32, #tpu.memory_space<vmem>>, %arg7: memref<32x64xbf16, #tpu.memory_space<vmem>>, %arg8: memref<32x1xf32, #tpu.memory_space<vmem>>, %arg9: memref<32x1xf32, #tpu.memory_space<vmem>>, %arg10: memref<1x1xf32, #tpu.memory_space<vmem>>, %arg11: memref<1x128xf32, #tpu.memory_space<vmem>>) attributes {dimension_semantics = [#tpu.dimension_semantics<parallel>], iteration_bounds = array<i64: 1>, scalar_prefetch = 0 : i64, scratch_operands = 0 : i64, tpu.core_type = #tpu.core_type<tc>, window_params = [{transform_indices = @transform_0, window_bounds = array<i64: 8, 256, 128>}, {transform_indices = @transform_1, window_bounds = array<i64: 256, 128>}, {pipeline_mode = #tpu.pipeline_mode<synchronous>, transform_indices = @transform_2, window_bounds = array<i64: 256, 64>}, {pipeline_mode = #tpu.pipeline_mode<synchronous>, transform_indices = @transform_3, window_bounds = array<i64: 64, 64>}, {pipeline_mode = #tpu.pipeline_mode<synchronous>, transform_indices = @transform_4, window_bounds = array<i64: 64, 64>}, {pipeline_mode = #tpu.pipeline_mode<synchronous>, transform_indices = @transform_5, window_bounds = array<i64: 64, 1>}, {pipeline_mode = #tpu.pipeline_mode<synchronous>, transform_indices = @transform_6, window_bounds = array<i64: 32, 64>}, {pipeline_mode = #tpu.pipeline_mode<synchronous>, transform_indices = @transform_7, window_bounds = array<i64: 32, 1>}, {pipeline_mode = #tpu.pipeline_mode<synchronous>, transform_indices = @transform_8, window_bounds = array<i64: 32, 1>}, {pipeline_mode = #tpu.pipeline_mode<synchronous>, transform_indices = @transform_9, window_bounds = array<i64: 1, 1>}, {transform_indices = @transform_10, window_bounds = array<i64: 1, 128>}]} {
    %c0 = arith.constant 0 : index
    %c0_0 = arith.constant 0 : index
    %0 = vector.load %arg3[%c0, %c0_0] : memref<256x64xbf16, #tpu.memory_space<vmem>>, vector<256x64xbf16>
    %cst = arith.constant 0.000000e+00 : f32
    %1 = vector.broadcast %cst : f32 to vector<64x128xf32>
    %cst_1 = arith.constant 0.000000e+00 : f32
    %2 = vector.broadcast %cst_1 : f32 to vector<64x128xf32>
    %3 = arith.truncf %1 : vector<64x128xf32> to vector<64x128xbf16>
    %cst_2 = arith.constant dense<0.000000e+00> : vector<256x128xf32>
    %4 = tpu.matmul %0, %3, %cst_2 {dimension_numbers = #tpu.dot_dimension_numbers<[1], [0], [0], [1], [0, 0, 1, 1], [], []>} : vector<256x64xbf16>, vector<64x128xbf16>, vector<256x128xf32> -> vector<256x128xf32>
    %c0_3 = arith.constant 0 : index
    %c0_4 = arith.constant 0 : index
    %c0_5 = arith.constant 0 : index
    %5 = vector.load %arg1[%c0_3, %c0_4, %c0_5] : memref<8x256x128xbf16, #tpu.memory_space<vmem>>, vector<1x256x128xbf16>
    %6 = vector.shape_cast %5 : vector<1x256x128xbf16> to vector<256x128xbf16>
    %7 = arith.extf %6 : vector<256x128xbf16> to vector<256x128xf32>
    %8 = arith.addf %4, %7 : vector<256x128xf32>
    %9 = vector.extract_strided_slice %8 {offsets = [0, 0], sizes = [192, 128], strides = [1, 1]} : vector<256x128xf32> to vector<192x128xf32>
    %10 = arith.negf %9 : vector<192x128xf32>
    %11 = math.exp %10 : vector<192x128xf32>
    %cst_6 = arith.constant 1.000000e+00 : f32
    %12 = vector.broadcast %cst_6 : f32 to vector<192x128xf32>
    %13 = arith.addf %12, %11 : vector<192x128xf32>
    %14 = arith.divf %12, %13 : vector<192x128xf32>
    %15 = vector.extract_strided_slice %14 {offsets = [0, 0], sizes = [64, 128], strides = [1, 1]} : vector<192x128xf32> to vector<64x128xf32>
    %16 = vector.extract_strided_slice %14 {offsets = [64, 0], sizes = [64, 128], strides = [1, 1]} : vector<192x128xf32> to vector<64x128xf32>
    %17 = vector.extract_strided_slice %14 {offsets = [128, 0], sizes = [64, 128], strides = [1, 1]} : vector<192x128xf32> to vector<64x128xf32>
    %18 = vector.extract_strided_slice %8 {offsets = [192, 0], sizes = [64, 128], strides = [1, 1]} : vector<256x128xf32> to vector<64x128xf32>
    %19 = math.tanh %18 : vector<64x128xf32>
    %20 = arith.mulf %16, %2 : vector<64x128xf32>
    %21 = arith.mulf %15, %19 : vector<64x128xf32>
    %22 = arith.addf %20, %21 : vector<64x128xf32>
    %23 = math.tanh %22 : vector<64x128xf32>
    %24 = arith.mulf %17, %23 : vector<64x128xf32>
    %25 = arith.truncf %24 : vector<64x128xf32> to vector<64x128xbf16>
    %cst_7 = arith.constant dense<0.000000e+00> : vector<256x128xf32>
    %26 = tpu.matmul %0, %25, %cst_7 {dimension_numbers = #tpu.dot_dimension_numbers<[1], [0], [0], [1], [0, 0, 1, 1], [], []>} : vector<256x64xbf16>, vector<64x128xbf16>, vector<256x128xf32> -> vector<256x128xf32>
    %c1 = arith.constant 1 : index
    %c0_8 = arith.constant 0 : index
    %c0_9 = arith.constant 0 : index
    %27 = vector.load %arg1[%c1, %c0_8, %c0_9] : memref<8x256x128xbf16, #tpu.memory_space<vmem>>, vector<1x256x128xbf16>
    %28 = vector.shape_cast %27 : vector<1x256x128xbf16> to vector<256x128xbf16>
    %29 = arith.extf %28 : vector<256x128xbf16> to vector<256x128xf32>
    %30 = arith.addf %26, %29 : vector<256x128xf32>
    %31 = vector.extract_strided_slice %30 {offsets = [0, 0], sizes = [192, 128], strides = [1, 1]} : vector<256x128xf32> to vector<192x128xf32>
    %32 = arith.negf %31 : vector<192x128xf32>
    %33 = math.exp %32 : vector<192x128xf32>
    %cst_10 = arith.constant 1.000000e+00 : f32
    %34 = vector.broadcast %cst_10 : f32 to vector<192x128xf32>
    %35 = arith.addf %34, %33 : vector<192x128xf32>
    %36 = arith.divf %34, %35 : vector<192x128xf32>
    %37 = vector.extract_strided_slice %36 {offsets = [0, 0], sizes = [64, 128], strides = [1, 1]} : vector<192x128xf32> to vector<64x128xf32>
    %38 = vector.extract_strided_slice %36 {offsets = [64, 0], sizes = [64, 128], strides = [1, 1]} : vector<192x128xf32> to vector<64x128xf32>
    %39 = vector.extract_strided_slice %36 {offsets = [128, 0], sizes = [64, 128], strides = [1, 1]} : vector<192x128xf32> to vector<64x128xf32>
    %40 = vector.extract_strided_slice %30 {offsets = [192, 0], sizes = [64, 128], strides = [1, 1]} : vector<256x128xf32> to vector<64x128xf32>
    %41 = math.tanh %40 : vector<64x128xf32>
    %42 = arith.mulf %38, %22 : vector<64x128xf32>
    %43 = arith.mulf %37, %41 : vector<64x128xf32>
    %44 = arith.addf %42, %43 : vector<64x128xf32>
    %45 = math.tanh %44 : vector<64x128xf32>
    %46 = arith.mulf %39, %45 : vector<64x128xf32>
    %47 = arith.truncf %46 : vector<64x128xf32> to vector<64x128xbf16>
    %cst_11 = arith.constant dense<0.000000e+00> : vector<256x128xf32>
    %48 = tpu.matmul %0, %47, %cst_11 {dimension_numbers = #tpu.dot_dimension_numbers<[1], [0], [0], [1], [0, 0, 1, 1], [], []>} : vector<256x64xbf16>, vector<64x128xbf16>, vector<256x128xf32> -> vector<256x128xf32>
    %c2 = arith.constant 2 : index
    %c0_12 = arith.constant 0 : index
    %c0_13 = arith.constant 0 : index
    %49 = vector.load %arg1[%c2, %c0_12, %c0_13] : memref<8x256x128xbf16, #tpu.memory_space<vmem>>, vector<1x256x128xbf16>
    %50 = vector.shape_cast %49 : vector<1x256x128xbf16> to vector<256x128xbf16>
    %51 = arith.extf %50 : vector<256x128xbf16> to vector<256x128xf32>
    %52 = arith.addf %48, %51 : vector<256x128xf32>
    %53 = vector.extract_strided_slice %52 {offsets = [0, 0], sizes = [192, 128], strides = [1, 1]} : vector<256x128xf32> to vector<192x128xf32>
    %54 = arith.negf %53 : vector<192x128xf32>
    %55 = math.exp %54 : vector<192x128xf32>
    %cst_14 = arith.constant 1.000000e+00 : f32
    %56 = vector.broadcast %cst_14 : f32 to vector<192x128xf32>
    %57 = arith.addf %56, %55 : vector<192x128xf32>
    %58 = arith.divf %56, %57 : vector<192x128xf32>
    %59 = vector.extract_strided_slice %58 {offsets = [0, 0], sizes = [64, 128], strides = [1, 1]} : vector<192x128xf32> to vector<64x128xf32>
    %60 = vector.extract_strided_slice %58 {offsets = [64, 0], sizes = [64, 128], strides = [1, 1]} : vector<192x128xf32> to vector<64x128xf32>
    %61 = vector.extract_strided_slice %58 {offsets = [128, 0], sizes = [64, 128], strides = [1, 1]} : vector<192x128xf32> to vector<64x128xf32>
    %62 = vector.extract_strided_slice %52 {offsets = [192, 0], sizes = [64, 128], strides = [1, 1]} : vector<256x128xf32> to vector<64x128xf32>
    %63 = math.tanh %62 : vector<64x128xf32>
    %64 = arith.mulf %60, %44 : vector<64x128xf32>
    %65 = arith.mulf %59, %63 : vector<64x128xf32>
    %66 = arith.addf %64, %65 : vector<64x128xf32>
    %67 = math.tanh %66 : vector<64x128xf32>
    %68 = arith.mulf %61, %67 : vector<64x128xf32>
    %69 = arith.truncf %68 : vector<64x128xf32> to vector<64x128xbf16>
    %cst_15 = arith.constant dense<0.000000e+00> : vector<256x128xf32>
    %70 = tpu.matmul %0, %69, %cst_15 {dimension_numbers = #tpu.dot_dimension_numbers<[1], [0], [0], [1], [0, 0, 1, 1], [], []>} : vector<256x64xbf16>, vector<64x128xbf16>, vector<256x128xf32> -> vector<256x128xf32>
    %c3 = arith.constant 3 : index
    %c0_16 = arith.constant 0 : index
    %c0_17 = arith.constant 0 : index
    %71 = vector.load %arg1[%c3, %c0_16, %c0_17] : memref<8x256x128xbf16, #tpu.memory_space<vmem>>, vector<1x256x128xbf16>
    %72 = vector.shape_cast %71 : vector<1x256x128xbf16> to vector<256x128xbf16>
    %73 = arith.extf %72 : vector<256x128xbf16> to vector<256x128xf32>
    %74 = arith.addf %70, %73 : vector<256x128xf32>
    %75 = vector.extract_strided_slice %74 {offsets = [0, 0], sizes = [192, 128], strides = [1, 1]} : vector<256x128xf32> to vector<192x128xf32>
    %76 = arith.negf %75 : vector<192x128xf32>
    %77 = math.exp %76 : vector<192x128xf32>
    %cst_18 = arith.constant 1.000000e+00 : f32
    %78 = vector.broadcast %cst_18 : f32 to vector<192x128xf32>
    %79 = arith.addf %78, %77 : vector<192x128xf32>
    %80 = arith.divf %78, %79 : vector<192x128xf32>
    %81 = vector.extract_strided_slice %80 {offsets = [0, 0], sizes = [64, 128], strides = [1, 1]} : vector<192x128xf32> to vector<64x128xf32>
    %82 = vector.extract_strided_slice %80 {offsets = [64, 0], sizes = [64, 128], strides = [1, 1]} : vector<192x128xf32> to vector<64x128xf32>
    %83 = vector.extract_strided_slice %80 {offsets = [128, 0], sizes = [64, 128], strides = [1, 1]} : vector<192x128xf32> to vector<64x128xf32>
    %84 = vector.extract_strided_slice %74 {offsets = [192, 0], sizes = [64, 128], strides = [1, 1]} : vector<256x128xf32> to vector<64x128xf32>
    %85 = math.tanh %84 : vector<64x128xf32>
    %86 = arith.mulf %82, %66 : vector<64x128xf32>
    %87 = arith.mulf %81, %85 : vector<64x128xf32>
    %88 = arith.addf %86, %87 : vector<64x128xf32>
    %89 = math.tanh %88 : vector<64x128xf32>
    %90 = arith.mulf %83, %89 : vector<64x128xf32>
    %91 = arith.truncf %90 : vector<64x128xf32> to vector<64x128xbf16>
    %cst_19 = arith.constant dense<0.000000e+00> : vector<256x128xf32>
    %92 = tpu.matmul %0, %91, %cst_19 {dimension_numbers = #tpu.dot_dimension_numbers<[1], [0], [0], [1], [0, 0, 1, 1], [], []>} : vector<256x64xbf16>, vector<64x128xbf16>, vector<256x128xf32> -> vector<256x128xf32>
    %c4 = arith.constant 4 : index
    %c0_20 = arith.constant 0 : index
    %c0_21 = arith.constant 0 : index
    %93 = vector.load %arg1[%c4, %c0_20, %c0_21] : memref<8x256x128xbf16, #tpu.memory_space<vmem>>, vector<1x256x128xbf16>
    %94 = vector.shape_cast %93 : vector<1x256x128xbf16> to vector<256x128xbf16>
    %95 = arith.extf %94 : vector<256x128xbf16> to vector<256x128xf32>
    %96 = arith.addf %92, %95 : vector<256x128xf32>
    %97 = vector.extract_strided_slice %96 {offsets = [0, 0], sizes = [192, 128], strides = [1, 1]} : vector<256x128xf32> to vector<192x128xf32>
    %98 = arith.negf %97 : vector<192x128xf32>
    %99 = math.exp %98 : vector<192x128xf32>
    %cst_22 = arith.constant 1.000000e+00 : f32
    %100 = vector.broadcast %cst_22 : f32 to vector<192x128xf32>
    %101 = arith.addf %100, %99 : vector<192x128xf32>
    %102 = arith.divf %100, %101 : vector<192x128xf32>
    %103 = vector.extract_strided_slice %102 {offsets = [0, 0], sizes = [64, 128], strides = [1, 1]} : vector<192x128xf32> to vector<64x128xf32>
    %104 = vector.extract_strided_slice %102 {offsets = [64, 0], sizes = [64, 128], strides = [1, 1]} : vector<192x128xf32> to vector<64x128xf32>
    %105 = vector.extract_strided_slice %102 {offsets = [128, 0], sizes = [64, 128], strides = [1, 1]} : vector<192x128xf32> to vector<64x128xf32>
    %106 = vector.extract_strided_slice %96 {offsets = [192, 0], sizes = [64, 128], strides = [1, 1]} : vector<256x128xf32> to vector<64x128xf32>
    %107 = math.tanh %106 : vector<64x128xf32>
    %108 = arith.mulf %104, %88 : vector<64x128xf32>
    %109 = arith.mulf %103, %107 : vector<64x128xf32>
    %110 = arith.addf %108, %109 : vector<64x128xf32>
    %111 = math.tanh %110 : vector<64x128xf32>
    %112 = arith.mulf %105, %111 : vector<64x128xf32>
    %113 = arith.truncf %112 : vector<64x128xf32> to vector<64x128xbf16>
    %cst_23 = arith.constant dense<0.000000e+00> : vector<256x128xf32>
    %114 = tpu.matmul %0, %113, %cst_23 {dimension_numbers = #tpu.dot_dimension_numbers<[1], [0], [0], [1], [0, 0, 1, 1], [], []>} : vector<256x64xbf16>, vector<64x128xbf16>, vector<256x128xf32> -> vector<256x128xf32>
    %c5 = arith.constant 5 : index
    %c0_24 = arith.constant 0 : index
    %c0_25 = arith.constant 0 : index
    %115 = vector.load %arg1[%c5, %c0_24, %c0_25] : memref<8x256x128xbf16, #tpu.memory_space<vmem>>, vector<1x256x128xbf16>
    %116 = vector.shape_cast %115 : vector<1x256x128xbf16> to vector<256x128xbf16>
    %117 = arith.extf %116 : vector<256x128xbf16> to vector<256x128xf32>
    %118 = arith.addf %114, %117 : vector<256x128xf32>
    %119 = vector.extract_strided_slice %118 {offsets = [0, 0], sizes = [192, 128], strides = [1, 1]} : vector<256x128xf32> to vector<192x128xf32>
    %120 = arith.negf %119 : vector<192x128xf32>
    %121 = math.exp %120 : vector<192x128xf32>
    %cst_26 = arith.constant 1.000000e+00 : f32
    %122 = vector.broadcast %cst_26 : f32 to vector<192x128xf32>
    %123 = arith.addf %122, %121 : vector<192x128xf32>
    %124 = arith.divf %122, %123 : vector<192x128xf32>
    %125 = vector.extract_strided_slice %124 {offsets = [0, 0], sizes = [64, 128], strides = [1, 1]} : vector<192x128xf32> to vector<64x128xf32>
    %126 = vector.extract_strided_slice %124 {offsets = [64, 0], sizes = [64, 128], strides = [1, 1]} : vector<192x128xf32> to vector<64x128xf32>
    %127 = vector.extract_strided_slice %124 {offsets = [128, 0], sizes = [64, 128], strides = [1, 1]} : vector<192x128xf32> to vector<64x128xf32>
    %128 = vector.extract_strided_slice %118 {offsets = [192, 0], sizes = [64, 128], strides = [1, 1]} : vector<256x128xf32> to vector<64x128xf32>
    %129 = math.tanh %128 : vector<64x128xf32>
    %130 = arith.mulf %126, %110 : vector<64x128xf32>
    %131 = arith.mulf %125, %129 : vector<64x128xf32>
    %132 = arith.addf %130, %131 : vector<64x128xf32>
    %133 = math.tanh %132 : vector<64x128xf32>
    %134 = arith.mulf %127, %133 : vector<64x128xf32>
    %135 = arith.truncf %134 : vector<64x128xf32> to vector<64x128xbf16>
    %cst_27 = arith.constant dense<0.000000e+00> : vector<256x128xf32>
    %136 = tpu.matmul %0, %135, %cst_27 {dimension_numbers = #tpu.dot_dimension_numbers<[1], [0], [0], [1], [0, 0, 1, 1], [], []>} : vector<256x64xbf16>, vector<64x128xbf16>, vector<256x128xf32> -> vector<256x128xf32>
    %c6 = arith.constant 6 : index
    %c0_28 = arith.constant 0 : index
    %c0_29 = arith.constant 0 : index
    %137 = vector.load %arg1[%c6, %c0_28, %c0_29] : memref<8x256x128xbf16, #tpu.memory_space<vmem>>, vector<1x256x128xbf16>
    %138 = vector.shape_cast %137 : vector<1x256x128xbf16> to vector<256x128xbf16>
    %139 = arith.extf %138 : vector<256x128xbf16> to vector<256x128xf32>
    %140 = arith.addf %136, %139 : vector<256x128xf32>
    %141 = vector.extract_strided_slice %140 {offsets = [0, 0], sizes = [192, 128], strides = [1, 1]} : vector<256x128xf32> to vector<192x128xf32>
    %142 = arith.negf %141 : vector<192x128xf32>
    %143 = math.exp %142 : vector<192x128xf32>
    %cst_30 = arith.constant 1.000000e+00 : f32
    %144 = vector.broadcast %cst_30 : f32 to vector<192x128xf32>
    %145 = arith.addf %144, %143 : vector<192x128xf32>
    %146 = arith.divf %144, %145 : vector<192x128xf32>
    %147 = vector.extract_strided_slice %146 {offsets = [0, 0], sizes = [64, 128], strides = [1, 1]} : vector<192x128xf32> to vector<64x128xf32>
    %148 = vector.extract_strided_slice %146 {offsets = [64, 0], sizes = [64, 128], strides = [1, 1]} : vector<192x128xf32> to vector<64x128xf32>
    %149 = vector.extract_strided_slice %146 {offsets = [128, 0], sizes = [64, 128], strides = [1, 1]} : vector<192x128xf32> to vector<64x128xf32>
    %150 = vector.extract_strided_slice %140 {offsets = [192, 0], sizes = [64, 128], strides = [1, 1]} : vector<256x128xf32> to vector<64x128xf32>
    %151 = math.tanh %150 : vector<64x128xf32>
    %152 = arith.mulf %148, %132 : vector<64x128xf32>
    %153 = arith.mulf %147, %151 : vector<64x128xf32>
    %154 = arith.addf %152, %153 : vector<64x128xf32>
    %155 = math.tanh %154 : vector<64x128xf32>
    %156 = arith.mulf %149, %155 : vector<64x128xf32>
    %157 = arith.truncf %156 : vector<64x128xf32> to vector<64x128xbf16>
    %cst_31 = arith.constant dense<0.000000e+00> : vector<256x128xf32>
    %158 = tpu.matmul %0, %157, %cst_31 {dimension_numbers = #tpu.dot_dimension_numbers<[1], [0], [0], [1], [0, 0, 1, 1], [], []>} : vector<256x64xbf16>, vector<64x128xbf16>, vector<256x128xf32> -> vector<256x128xf32>
    %c7 = arith.constant 7 : index
    %c0_32 = arith.constant 0 : index
    %c0_33 = arith.constant 0 : index
    %159 = vector.load %arg1[%c7, %c0_32, %c0_33] : memref<8x256x128xbf16, #tpu.memory_space<vmem>>, vector<1x256x128xbf16>
    %160 = vector.shape_cast %159 : vector<1x256x128xbf16> to vector<256x128xbf16>
    %161 = arith.extf %160 : vector<256x128xbf16> to vector<256x128xf32>
    %162 = arith.addf %158, %161 : vector<256x128xf32>
    %163 = vector.extract_strided_slice %162 {offsets = [0, 0], sizes = [192, 128], strides = [1, 1]} : vector<256x128xf32> to vector<192x128xf32>
    %164 = arith.negf %163 : vector<192x128xf32>
    %165 = math.exp %164 : vector<192x128xf32>
    %cst_34 = arith.constant 1.000000e+00 : f32
    %166 = vector.broadcast %cst_34 : f32 to vector<192x128xf32>
    %167 = arith.addf %166, %165 : vector<192x128xf32>
    %168 = arith.divf %166, %167 : vector<192x128xf32>
    %169 = vector.extract_strided_slice %168 {offsets = [0, 0], sizes = [64, 128], strides = [1, 1]} : vector<192x128xf32> to vector<64x128xf32>
    %170 = vector.extract_strided_slice %168 {offsets = [64, 0], sizes = [64, 128], strides = [1, 1]} : vector<192x128xf32> to vector<64x128xf32>
    %171 = vector.extract_strided_slice %168 {offsets = [128, 0], sizes = [64, 128], strides = [1, 1]} : vector<192x128xf32> to vector<64x128xf32>
    %172 = vector.extract_strided_slice %162 {offsets = [192, 0], sizes = [64, 128], strides = [1, 1]} : vector<256x128xf32> to vector<64x128xf32>
    %173 = math.tanh %172 : vector<64x128xf32>
    %174 = arith.mulf %170, %154 : vector<64x128xf32>
    %175 = arith.mulf %169, %173 : vector<64x128xf32>
    %176 = arith.addf %174, %175 : vector<64x128xf32>
    %177 = math.tanh %176 : vector<64x128xf32>
    %178 = arith.mulf %171, %177 : vector<64x128xf32>
    %c0_35 = arith.constant 0 : index
    %c0_36 = arith.constant 0 : index
    %179 = vector.load %arg2[%c0_35, %c0_36] : memref<256x128xbf16, #tpu.memory_space<vmem>>, vector<256x128xbf16>
    %180 = arith.extf %179 : vector<256x128xbf16> to vector<256x128xf32>
    %181 = vector.extract_strided_slice %180 {offsets = [0, 0], sizes = [64, 128], strides = [1, 1]} : vector<256x128xf32> to vector<64x128xf32>
    %182 = arith.negf %181 : vector<64x128xf32>
    %183 = math.exp %182 : vector<64x128xf32>
    %cst_37 = arith.constant 1.000000e+00 : f32
    %184 = vector.broadcast %cst_37 : f32 to vector<64x128xf32>
    %185 = arith.addf %184, %183 : vector<64x128xf32>
    %186 = arith.divf %184, %185 : vector<64x128xf32>
    %187 = vector.extract_strided_slice %180 {offsets = [128, 0], sizes = [64, 128], strides = [1, 1]} : vector<256x128xf32> to vector<64x128xf32>
    %188 = arith.negf %187 : vector<64x128xf32>
    %189 = math.exp %188 : vector<64x128xf32>
    %cst_38 = arith.constant 1.000000e+00 : f32
    %190 = vector.broadcast %cst_38 : f32 to vector<64x128xf32>
    %191 = arith.addf %190, %189 : vector<64x128xf32>
    %192 = arith.divf %190, %191 : vector<64x128xf32>
    %193 = vector.extract_strided_slice %180 {offsets = [192, 0], sizes = [64, 128], strides = [1, 1]} : vector<256x128xf32> to vector<64x128xf32>
    %194 = math.tanh %193 : vector<64x128xf32>
    %195 = arith.mulf %186, %194 : vector<64x128xf32>
    %196 = math.tanh %195 : vector<64x128xf32>
    %197 = arith.mulf %192, %196 : vector<64x128xf32>
    %c0_39 = arith.constant 0 : index
    %c0_40 = arith.constant 0 : index
    %198 = vector.load %arg4[%c0_39, %c0_40] : memref<64x64xbf16, #tpu.memory_space<vmem>>, vector<64x64xbf16>
    %199 = arith.truncf %178 : vector<64x128xf32> to vector<64x128xbf16>
    %cst_41 = arith.constant dense<0.000000e+00> : vector<64x128xf32>
    %200 = tpu.matmul %198, %199, %cst_41 {dimension_numbers = #tpu.dot_dimension_numbers<[1], [0], [0], [1], [0, 0, 1, 1], [], []>} : vector<64x64xbf16>, vector<64x128xbf16>, vector<64x128xf32> -> vector<64x128xf32>
    %c0_42 = arith.constant 0 : index
    %c0_43 = arith.constant 0 : index
    %201 = vector.load %arg5[%c0_42, %c0_43] : memref<64x64xbf16, #tpu.memory_space<vmem>>, vector<64x64xbf16>
    %202 = arith.truncf %197 : vector<64x128xf32> to vector<64x128xbf16>
    %cst_44 = arith.constant dense<0.000000e+00> : vector<64x128xf32>
    %203 = tpu.matmul %201, %202, %cst_44 {dimension_numbers = #tpu.dot_dimension_numbers<[1], [0], [0], [1], [0, 0, 1, 1], [], []>} : vector<64x64xbf16>, vector<64x128xbf16>, vector<64x128xf32> -> vector<64x128xf32>
    %204 = arith.addf %200, %203 : vector<64x128xf32>
    %c0_45 = arith.constant 0 : index
    %c0_46 = arith.constant 0 : index
    %205 = vector.load %arg6[%c0_45, %c0_46] : memref<64x1xf32, #tpu.memory_space<vmem>>, vector<64x1xf32>
    %206 = vector.broadcast %205 : vector<64x1xf32> to vector<64x128xf32>
    %207 = arith.addf %204, %206 : vector<64x128xf32>
    %cst_47 = arith.constant 0.000000e+00 : f32
    %208 = vector.broadcast %cst_47 : f32 to vector<64x128xf32>
    %209 = arith.maximumf %207, %208 : vector<64x128xf32>
    %c0_48 = arith.constant 0 : index
    %c0_49 = arith.constant 0 : index
    %210 = vector.load %arg7[%c0_48, %c0_49] : memref<32x64xbf16, #tpu.memory_space<vmem>>, vector<32x64xbf16>
    %211 = arith.truncf %209 : vector<64x128xf32> to vector<64x128xbf16>
    %cst_50 = arith.constant dense<0.000000e+00> : vector<32x128xf32>
    %212 = tpu.matmul %210, %211, %cst_50 {dimension_numbers = #tpu.dot_dimension_numbers<[1], [0], [0], [1], [0, 0, 1, 1], [], []>} : vector<32x64xbf16>, vector<64x128xbf16>, vector<32x128xf32> -> vector<32x128xf32>
    %c0_51 = arith.constant 0 : index
    %c0_52 = arith.constant 0 : index
    %213 = vector.load %arg8[%c0_51, %c0_52] : memref<32x1xf32, #tpu.memory_space<vmem>>, vector<32x1xf32>
    %214 = vector.broadcast %213 : vector<32x1xf32> to vector<32x128xf32>
    %215 = arith.addf %212, %214 : vector<32x128xf32>
    %cst_53 = arith.constant 0.000000e+00 : f32
    %216 = vector.broadcast %cst_53 : f32 to vector<32x128xf32>
    %217 = arith.maximumf %215, %216 : vector<32x128xf32>
    %c0_54 = arith.constant 0 : index
    %c0_55 = arith.constant 0 : index
    %218 = vector.load %arg9[%c0_54, %c0_55] : memref<32x1xf32, #tpu.memory_space<vmem>>, vector<32x1xf32>
    %219 = vector.broadcast %218 : vector<32x1xf32> to vector<32x128xf32>
    %220 = arith.mulf %217, %219 : vector<32x128xf32>
    %cst_56 = arith.constant dense<0.000000e+00> : vector<128xf32>
    %221 = vector.multi_reduction <add>, %220, %cst_56 [0] : vector<32x128xf32> to vector<128xf32>
    %222 = vector.shape_cast %221 : vector<128xf32> to vector<1x128xf32>
    %c0_57 = arith.constant 0 : index
    %c0_58 = arith.constant 0 : index
    %223 = vector.load %arg10[%c0_57, %c0_58] : memref<1x1xf32, #tpu.memory_space<vmem>>, vector<1x1xf32>
    %224 = vector.broadcast %223 : vector<1x1xf32> to vector<1x128xf32>
    %225 = arith.addf %222, %224 : vector<1x128xf32>
    %226 = arith.negf %225 : vector<1x128xf32>
    %227 = math.exp %226 : vector<1x128xf32>
    %cst_59 = arith.constant 1.000000e+00 : f32
    %228 = vector.broadcast %cst_59 : f32 to vector<1x128xf32>
    %229 = arith.addf %228, %227 : vector<1x128xf32>
    %230 = arith.divf %228, %229 : vector<1x128xf32>
    %c0_60 = arith.constant 0 : index
    %c0_61 = arith.constant 0 : index
    %231 = vector.load %arg11[%c0_60, %c0_61] : memref<1x128xf32, #tpu.memory_space<vmem>>, vector<1x128xf32>
    tpu.vector_store %arg11[%c0_60, %c0_61], %230 {strides = array<i32>} : memref<1x128xf32, #tpu.memory_space<vmem>>, vector<1x128xf32>,
    return
  }
  func.func @transform_0(%arg0: i32) -> (i32, i32, i32) {
    %c0_i32 = arith.constant 0 : i32
    %c0_i32_0 = arith.constant 0 : i32
    %c0_i32_1 = arith.constant 0 : i32
    return %c0_i32, %c0_i32_0, %arg0 : i32, i32, i32
  }
  func.func @transform_1(%arg0: i32) -> (i32, i32) {
    %c0_i32 = arith.constant 0 : i32
    %c0_i32_0 = arith.constant 0 : i32
    return %c0_i32, %arg0 : i32, i32
  }
  func.func @transform_2(%arg0: i32) -> (i32, i32) {
    %c0_i32 = arith.constant 0 : i32
    %c0_i32_0 = arith.constant 0 : i32
    %c0_i32_1 = arith.constant 0 : i32
    return %c0_i32, %c0_i32_0 : i32, i32
  }
  func.func @transform_3(%arg0: i32) -> (i32, i32) {
    %c0_i32 = arith.constant 0 : i32
    %c0_i32_0 = arith.constant 0 : i32
    %c0_i32_1 = arith.constant 0 : i32
    return %c0_i32, %c0_i32_0 : i32, i32
  }
  func.func @transform_4(%arg0: i32) -> (i32, i32) {
    %c0_i32 = arith.constant 0 : i32
    %c0_i32_0 = arith.constant 0 : i32
    %c0_i32_1 = arith.constant 0 : i32
    return %c0_i32, %c0_i32_0 : i32, i32
  }
  func.func @transform_5(%arg0: i32) -> (i32, i32) {
    %c0_i32 = arith.constant 0 : i32
    %c0_i32_0 = arith.constant 0 : i32
    %c0_i32_1 = arith.constant 0 : i32
    return %c0_i32, %c0_i32_0 : i32, i32
  }
  func.func @transform_6(%arg0: i32) -> (i32, i32) {
    %c0_i32 = arith.constant 0 : i32
    %c0_i32_0 = arith.constant 0 : i32
    %c0_i32_1 = arith.constant 0 : i32
    return %c0_i32, %c0_i32_0 : i32, i32
  }
  func.func @transform_7(%arg0: i32) -> (i32, i32) {
    %c0_i32 = arith.constant 0 : i32
    %c0_i32_0 = arith.constant 0 : i32
    %c0_i32_1 = arith.constant 0 : i32
    return %c0_i32, %c0_i32_0 : i32, i32
  }
  func.func @transform_8(%arg0: i32) -> (i32, i32) {
    %c0_i32 = arith.constant 0 : i32
    %c0_i32_0 = arith.constant 0 : i32
    %c0_i32_1 = arith.constant 0 : i32
    return %c0_i32, %c0_i32_0 : i32, i32
  }
  func.func @transform_9(%arg0: i32) -> (i32, i32) {
    %c0_i32 = arith.constant 0 : i32
    %c0_i32_0 = arith.constant 0 : i32
    %c0_i32_1 = arith.constant 0 : i32
    return %c0_i32, %c0_i32_0 : i32, i32
  }
  func.func @transform_10(%arg0: i32) -> (i32, i32) {
    %c0_i32 = arith.constant 0 : i32
    %c0_i32_0 = arith.constant 0 : i32
    return %c0_i32, %arg0 : i32, i32
  }
}

</mosaic_0001>

<bundles_post_ra>
// kernel: syllable_classifier_forward.1
= control target key start
LH: loop header
LB: loop body
LE: loop exit
PB: predicated region body
PF: predicated region fallthrough
CT: control target
= control target key end

     0   :  { %s8891_s0 = inlined_call_operand.vmem [shape: bf16[8,256,128], index: 0, kind: input, shape index: {}]   ;;  %s8892_s1 = inlined_call_operand.vmem [shape: bf16[256,128], index: 1, kind: input, shape index: {}]   ;;  %s8893_s2 = inlined_call_operand.vmem [shape: bf16[256,64], index: 2, kind: input, shape index: {}]   ;;  %s8894_s3 = inlined_call_operand.vmem [shape: bf16[64,64], index: 3, kind: input, shape index: {}]   ;;  %s8895_s4 = inlined_call_operand.vmem [shape: bf16[64,64], index: 4, kind: input, shape index: {}]   ;;  %s8896_s5 = inlined_call_operand.vmem [shape: f32[64,1], index: 5, kind: input, shape index: {}]   ;;  %s8897_s6 = inlined_call_operand.vmem [shape: bf16[32,64], index: 6, kind: input, shape index: {}]   ;;  %s8898_s7 = inlined_call_operand.vmem [shape: f32[32,1], index: 7, kind: input, shape index: {}]   ;;  %s8899_s8 = inlined_call_operand.vmem [shape: f32[32,1], index: 8, kind: input, shape index: {}]   ;;  %s8900_s9 = inlined_call_operand.<no memory space> [shape: f32[1,1], index: 9, kind: input, shape index: {}]   ;;  %s8901_s10 = inlined_call_operand.hbm [shape: f32[1,128], index: 10, kind: output, shape index: {}]  }
   0x1   :  { %v15_v0 = vstv %s8900_s9 }
   0x2   :  { %16 = vst [vmem:[#allocation2] sm:$0x1] %v15_v0 }
   0x3   :  { %v7327_v1 = vld [vmem:[%s8893_s2] sm:$0xff]   ;;  %v7264_v2 = vmov 0   ;;  %vm215_vm0 = vcmask 523264   ;;  %v7332_v3 = vld [vmem:[%s8893_s2 + $0x8] sm:$0xff]   ;;  %v7339_v4 = vld [vmem:[%s8893_s2 + $0x10] sm:$0xff]  }
   0x4   :  { %5673 = vmatprep.subr.bf16.mxu0 %v7264_v2  ;;  %6041 = vset.pattern.permute.xlu0 %v7264_v2  ;;  %v7350_v5 = vld [vmem:[%s8893_s2 + $0x18] sm:$0xff]   ;;  %v7355_v6 = vld [vmem:[%s8893_s2 + $0x20] sm:$0xff]   ;;  %v7364_v7 = vld [vmem:[%s8893_s2 + $0x28] sm:$0xff]  }
   0x5   :  { %5674 = vmatpush3.bf16.msra.mxu0 %v7264_v2  ;;  %5675 = vmatprep.mubr.msk.bf16.mxu0 %vm215_vm0, %v7327_v1  ;;  %v7369_v8 = vld [vmem:[%s8893_s2 + $0x30] sm:$0xff]  }
   0x6   :  { %5715 = vmatprep.mubr.msk.bf16.mxu1 %vm215_vm0, %v7327_v1  ;;  %6042 = vset.pattern.permute.xlu1 %v7264_v2 }
   0x8   :  { %5676 = vmatmul.mubr.msk.bf16.vlgmr.msra.gmra.mrb[0].mxu0 %vm215_vm0, %v7332_v3 }
   0x9   :  { %5679 = vmatprep.mubr.msk.bf16.mxu0 %vm215_vm0, %v7339_v4 }
  0x10   :  { %5680 = vmatmul.mubr.msk.bf16.gmra.mrb[4].mxu0 %vm215_vm0, %v7350_v5 }
  0x11   :  { %5683 = vmatprep.mubr.msk.bf16.mxu0 %vm215_vm0, %v7355_v6 }
  0x18   :  { %5684 = vmatmul.mubr.msk.bf16.gmra.mrb[8].mxu0 %vm215_vm0, %v7364_v7 }
  0x19   :  { %5687 = vmatprep.mubr.msk.bf16.mxu0 %vm215_vm0, %v7369_v8 }
  0x1a   :  { %17 = vsyncpa [#allocation4], 0  ;;  %v7378_v9 = vld [vmem:[%s8893_s2 + $0x38] sm:$0xff]   ;;  %v7383_v10 = vld [vmem:[%s8893_s2 + $0x40] sm:$0xff]  }
  0x1b   :  { %v7392_v11 = vld [vmem:[%s8893_s2 + $0x48] sm:$0xff]   ;;  %v7397_v12 = vld [vmem:[%s8893_s2 + $0x50] sm:$0xff]   ;;  %v7406_v13 = vld [vmem:[%s8893_s2 + $0x58] sm:$0xff]  }
  0x1c   :  { %v7411_v14 = vld [vmem:[%s8893_s2 + $0x60] sm:$0xff]   ;;  %v7420_v15 = vld [vmem:[%s8893_s2 + $0x68] sm:$0xff]   ;;  %v7425_v16 = vld [vmem:[%s8893_s2 + $0x70] sm:$0xff]  }
  0x1d   :  { %v7434_v17 = vld [vmem:[%s8893_s2 + $0x78] sm:$0xff]   ;;  %v5356_v18 = vld [vmem:[%s8891_s0 + $0x8] sm:$0xff]   ;;  %v4797_v19 = vld [vmem:[%s8891_s0] sm:$0xff]  }
  0x1e   :  { %v4802_v21 = vunpack.c.l.bf16 %v5356_v18  ;;  %v4798_v23 = vunpack.c.l.bf16 %v4797_v19  ;;  %v4803_v25 = vunpack.c.h.bf16 %v5356_v18  ;;  %v4799_v28 = vunpack.c.h.bf16 %v4797_v19  ;;  %v5358_v29 = vld [vmem:[%s8891_s0 + $0x18] sm:$0xff]   ;;  %v5357_v31 = vld [vmem:[%s8891_s0 + $0x10] sm:$0xff]   ;;  %v5360_v42 = vld [vmem:[%s8891_s0 + $0x28] sm:$0xff]  }
  0x1f   :  { %v4810_v33 = vunpack.c.l.bf16 %v5358_v29  ;;  %v4806_v37 = vunpack.c.l.bf16 %v5357_v31  ;;  %v4811_v40 = vunpack.c.h.bf16 %v5358_v29  ;;  %v4807_v44 = vunpack.c.h.bf16 %v5357_v31  ;;  %v5359_v46 = vld [vmem:[%s8891_s0 + $0x20] sm:$0xff]   ;;  %v5362_v0 = vld [vmem:[%s8891_s0 + $0x38] sm:$0xff]  }
  0x20   :  { %5688 = vmatmul.mubr.msk.bf16.gmra.mrb[12].mxu0 %vm215_vm0, %v7378_v9  ;;  %v4818_v50 = vunpack.c.l.bf16 %v5360_v42  ;;  %v4814_v52 = vunpack.c.l.bf16 %v5359_v46  ;;  %v4819_v54 = vunpack.c.h.bf16 %v5360_v42  ;;  %v4815_v57 = vunpack.c.h.bf16 %v5359_v46 }
  0x21   :  { %5691 = vmatprep.mubr.msk.bf16.mxu0 %vm215_vm0, %v7383_v10  ;;  %v4827_v31 = vunpack.c.h.bf16 %v5362_v0 }
  0x28   :  { %5692 = vmatmul.mubr.msk.bf16.gmra.mrb[16].mxu0 %vm215_vm0, %v7392_v11 }
  0x29   :  { %5695 = vmatprep.mubr.msk.bf16.mxu0 %vm215_vm0, %v7397_v12 }
  0x30   :  { %5696 = vmatmul.mubr.msk.bf16.gmra.mrb[20].mxu0 %vm215_vm0, %v7406_v13 }
  0x31   :  { %5699 = vmatprep.mubr.msk.bf16.mxu0 %vm215_vm0, %v7411_v14 }
  0x38   :  { %5700 = vmatmul.mubr.msk.bf16.gmra.mrb[24].mxu0 %vm215_vm0, %v7420_v15 }
  0x39   :  { %5703 = vmatprep.mubr.msk.bf16.mxu0 %vm215_vm0, %v7425_v16 }
  0x40   :  { %5704 = vmatmul.mubr.msk.bf16.gmra.mrb[28].mxu0 %vm215_vm0, %v7434_v17 }
  0x41   :  { %5755 = vmatprep.mubr.msk.bf16.mxu0 %vm215_vm0, %v7327_v1 }
  0xdb   :  { %v5677_v20 = vpop.f32.mrb[0].mxu0 }
  0xdc   :  { %v298_v22 = vpop.f32.mrb[1].mxu0  ;;  %v307_v27 = vadd.f32 %v5677_v20, %v4802_v21  ;;  %v5361_v21 = vld [vmem:[%s8891_s0 + $0x30] sm:$0xff]  }
  0xdd   :  { %v5678_v24 = vpop.f32.mrb[2].mxu0  ;;  %v299_v30 = vadd.f32 %v4798_v23, %v298_v22  ;;  %v4826_v23 = vunpack.c.l.bf16 %v5362_v0 }
  0xde   :  { %v301_v26 = vpop.f32.mrb[3].mxu0  ;;  %v310_v32 = vadd.f32 %v5678_v24, %v4803_v25  ;;  %v4233_v35 = vmul.f32 -1.442695, %v307_v27  ;;  %v4822_v27 = vunpack.c.l.bf16 %v5361_v21 }
  0xdf   :  { %v302_v36 = vadd.f32 %v4799_v28, %v301_v26  ;;  %v4231_v39 = vmul.f32 -1.442695, %v299_v30 }
  0xe0   :  { %v4234_v43 = vmul.f32 -1.442695, %v310_v32  ;;  %6069 = vpow2.f32 %v4233_v35 }
  0xe1   :  { %v4232_v48 = vmul.f32 -1.442695, %v302_v36  ;;  %6071 = vpow2.f32 %v4231_v39 }
  0xe2   :  { %6073 = vpow2.f32 %v4234_v43 }
  0xe3   :  { %v5681_v34 = vpop.f32.mrb[4].mxu0  ;;  %6075 = vpow2.f32 %v4232_v48 }
  0xe4   :  { %v314_v38 = vpop.f32.mrb[5].mxu0  ;;  %v323_v47 = vadd.f32 %v5681_v34, %v4810_v33 }
  0xe5   :  { %v5682_v41 = vpop.f32.mrb[6].mxu0  ;;  %v315_v49 = vadd.f32 %v4806_v37, %v314_v38 }
  0xe6   :  { %v317_v45 = vpop.f32.mrb[7].mxu0  ;;  %v326_v51 = vadd.f32 %v5682_v41, %v4811_v40  ;;  %v4237_v55 = vmul.f32 -1.442695, %v323_v47 }
  0xe7   :  { %v318_v53 = vadd.f32 %v4807_v44, %v317_v45  ;;  %v4235_v58 = vmul.f32 -1.442695, %v315_v49  ;;  %v4823_v44 = vunpack.c.h.bf16 %v5361_v21  ;;  %v5364_v49 = vld [vmem:[%s8891_s0 + $0x48] sm:$0xff]  }
  0xe8   :  { %v4238_v61 = vmul.f32 -1.442695, %v326_v51  ;;  %6077 = vpow2.f32 %v4237_v55 }
  0xe9   :  { %v4236_v2 = vmul.f32 -1.442695, %v318_v53  ;;  %6079 = vpow2.f32 %v4235_v58  ;;  %v5363_v53 = vld [vmem:[%s8891_s0 + $0x40] sm:$0xff]  }
  0xea   :  { %6081 = vpow2.f32 %v4238_v61  ;;  %v6070_v25 = vpop.eup %6069 }
  0xeb   :  { %v5685_v56 = vpop.f32.mrb[8].mxu0  ;;  %6083 = vpow2.f32 %v4236_v2  ;;  %v6072_v28 = vpop.eup %6071  ;;  %v499_v35 = vadd.f32 1.0, %v6070_v25 }
  0xec   :  { %v339_v59 = vadd.f32 %v5685_v56, %v4818_v50  ;;  %v330_v60 = vpop.f32.mrb[9].mxu0  ;;  %v6074_v32 = vpop.eup %6073  ;;  %v497_v38 = vadd.f32 1.0, %v6072_v28  ;;  %v7473_v28 = vld [vmem:[%s8891_s0 + $0x58] sm:$0xff]  }
  0xed   :  { %v331_v62 = vadd.f32 %v4814_v52, %v330_v60  ;;  %v5686_v63 = vpop.f32.mrb[10].mxu0  ;;  %v6076_v37 = vpop.eup %6075  ;;  %v500_v41 = vadd.f32 1.0, %v6074_v32 }
  0xee   :  { %v342_v18 = vadd.f32 %v5686_v63, %v4819_v54  ;;  %v333_v19 = vpop.f32.mrb[11].mxu0  ;;  %v4241_v22 = vmul.f32 -1.442695, %v339_v59  ;;  %v498_v46 = vadd.f32 1.0, %v6076_v37  ;;  %v4834_v59 = vunpack.c.l.bf16 %v5364_v49 }
  0xef   :  { %v334_v20 = vadd.f32 %v4815_v57, %v333_v19  ;;  %v4239_v24 = vmul.f32 -1.442695, %v331_v62  ;;  %v4830_v63 = vunpack.c.l.bf16 %v5363_v53  ;;  %v4835_v19 = vunpack.c.h.bf16 %v5364_v49 }
  0xf0   :  { %v4242_v26 = vmul.f32 -1.442695, %v342_v18  ;;  %6085 = vpow2.f32 %v4241_v22  ;;  %v4831_v22 = vunpack.c.h.bf16 %v5363_v53 }
  0xf1   :  { %v4240_v29 = vmul.f32 -1.442695, %v334_v20  ;;  %6087 = vpow2.f32 %v4239_v24 }
  0xf2   :  { %6089 = vpow2.f32 %v4242_v26  ;;  %v6078_v45 = vpop.eup %6077 }
  0xf3   :  { %v5689_v30 = vpop.f32.mrb[12].mxu0  ;;  %6091 = vpow2.f32 %v4240_v29  ;;  %v6080_v47 = vpop.eup %6079  ;;  %v503_v55 = vadd.f32 1.0, %v6078_v45 }
  0xf4   :  { %v355_v33 = vadd.f32 %v5689_v30, %v4826_v23  ;;  %v346_v34 = vpop.f32.mrb[13].mxu0  ;;  %6093 = vrcp.f32 %v499_v35  ;;  %v6082_v50 = vpop.eup %6081  ;;  %v501_v58 = vadd.f32 1.0, %v6080_v47 }
  0xf5   :  { %v5690_v36 = vpop.f32.mrb[14].mxu0  ;;  %v347_v39 = vadd.f32 %v4822_v27, %v346_v34  ;;  %6095 = vrcp.f32 %v497_v38  ;;  %v6084_v54 = vpop.eup %6083  ;;  %v504_v62 = vadd.f32 1.0, %v6082_v50 }
  0xf6   :  { %v349_v40 = vpop.f32.mrb[15].mxu0  ;;  %v358_v42 = vadd.f32 %v5690_v36, %v4827_v31  ;;  %v4245_v43 = vmul.f32 -1.442695, %v355_v33  ;;  %6097 = vrcp.f32 %v500_v41  ;;  %v502_v18 = vadd.f32 1.0, %v6084_v54  ;;  %v7480_v33 = vld [vmem:[%s8891_s0 + $0x50] sm:$0xff]  }
  0xf7   :  { %v4243_v48 = vmul.f32 -1.442695, %v347_v39  ;;  %v350_v56 = vadd.f32 %v4823_v44, %v349_v40  ;;  %v4842_v40 = vunpack.c.l.bf16 %v7473_v28  ;;  %v4838_v45 = vunpack.c.l.bf16 %v7480_v33 }
  0xf8   :  { %v4246_v51 = vmul.f32 -1.442695, %v358_v42  ;;  %6099 = vpow2.f32 %v4245_v43  ;;  %v5368_v42 = vld [vmem:[%s8891_s0 + $0x68] sm:$0xff]  }
  0xf9   :  { %6101 = vrcp.f32 %v498_v46  ;;  %v4244_v21 = vmul.f32 -1.442695, %v350_v56 }
  0xfa   :  { %v6086_v61 = vpop.eup %6085  ;;  %6103 = vpow2.f32 %v4243_v48 }
  0xfb   :  { %v5693_v52 = vpop.f32.mrb[16].mxu0  ;;  %v6088_v2 = vpop.eup %6087  ;;  %6105 = vpow2.f32 %v4246_v51  ;;  %v507_v24 = vadd.f32 1.0, %v6086_v61  ;;  %v4850_v51 = vunpack.c.l.bf16 %v5368_v42 }
  0xfc   :  { %v362_v57 = vpop.f32.mrb[17].mxu0  ;;  %v6090_v20 = vpop.eup %6089  ;;  %6107 = vrcp.f32 %v503_v55  ;;  %v371_v25 = vadd.f32 %v5693_v52, %v4834_v59  ;;  %v505_v26 = vadd.f32 1.0, %v6088_v2  ;;  %v5367_v52 = vld [vmem:[%s8891_s0 + $0x60] sm:$0xff]  }
  0xfd   :  { %v5694_v60 = vpop.f32.mrb[18].mxu0  ;;  %v6092_v23 = vpop.eup %6091  ;;  %6109 = vrcp.f32 %v501_v58  ;;  %v363_v27 = vadd.f32 %v4830_v63, %v362_v57  ;;  %v508_v30 = vadd.f32 1.0, %v6090_v20 }
  0xfe   :  { %v365_v0 = vpop.f32.mrb[19].mxu0  ;;  %6111 = vrcp.f32 %v504_v62  ;;  %v7475_v29 = vpop.eup %6093  ;;  %v374_v31 = vadd.f32 %v5694_v60, %v4835_v19  ;;  %v506_v35 = vadd.f32 1.0, %v6092_v23  ;;  %v4249_v39 = vmul.f32 -1.442695, %v371_v25  ;;  %v5370_v25 = vld [vmem:[%s8891_s0 + $0x78] sm:$0xff]  }
  0xff   :  { %6113 = vrcp.f32 %v502_v18  ;;  %v7482_v34 = vpop.eup %6095  ;;  %v366_v36 = vadd.f32 %v4831_v22, %v365_v0  ;;  %v4247_v44 = vmul.f32 -1.442695, %v363_v27  ;;  %v4843_v60 = vunpack.c.h.bf16 %v7473_v28 }
 0x100   :  { %6115 = vpow2.f32 %v4244_v21  ;;  %v7484_v38 = vpop.eup %6097  ;;  %v4250_v48 = vmul.f32 -1.442695, %v374_v31  ;;  %v4846_v62 = vunpack.c.l.bf16 %v5367_v52  ;;  %v4851_v19 = vunpack.c.h.bf16 %v5368_v42 }
 0x101   :  { %6117 = vrcp.f32 %v507_v24  ;;  %v4248_v50 = vmul.f32 -1.442695, %v366_v36  ;;  %v4839_v22 = vunpack.c.h.bf16 %v7480_v33  ;;  %v4847_v24 = vunpack.c.h.bf16 %v5367_v52  ;;  %v5369_v33 = vld [vmem:[%s8891_s0 + $0x70] sm:$0xff]  }
 0x102   :  { %v6100_v43 = vpop.eup %6099  ;;  %6119 = vrcp.f32 %v505_v26 }
 0x103   :  { %v5697_v32 = vpop.f32.mrb[20].mxu0  ;;  %v7491_v47 = vpop.eup %6101  ;;  %6121 = vrcp.f32 %v508_v30  ;;  %v511_v54 = vadd.f32 1.0, %v6100_v43 }
 0x104   :  { %v378_v37 = vpop.f32.mrb[21].mxu0  ;;  %v6104_v49 = vpop.eup %6103  ;;  %6123 = vrcp.f32 %v506_v35  ;;  %v387_v55 = vadd.f32 %v5697_v32, %v4842_v40 }
 0x105   :  { %v5698_v41 = vpop.f32.mrb[22].mxu0  ;;  %v6106_v53 = vpop.eup %6105  ;;  %6125 = vpow2.f32 %v4249_v39  ;;  %v379_v57 = vadd.f32 %v4838_v45, %v378_v37  ;;  %v509_v59 = vadd.f32 1.0, %v6104_v49  ;;  %v4858_v37 = vunpack.c.l.bf16 %v5370_v25 }
 0x106   :  { %v381_v46 = vpop.f32.mrb[23].mxu0  ;;  %v7496_v56 = vpop.eup %6107  ;;  %6127 = vpow2.f32 %v4247_v44  ;;  %v512_v0 = vadd.f32 1.0, %v6106_v53  ;;  %v4253_v21 = vmul.f32 -1.442695, %v387_v55  ;;  %v390_v31 = vadd.f32 %v5698_v41, %v4843_v60 }
 0x107   :  { %v7498_v58 = vpop.eup %6109  ;;  %6129 = vpow2.f32 %v4250_v48  ;;  %v4251_v27 = vmul.f32 -1.442695, %v379_v57  ;;  %v382_v40 = vadd.f32 %v4839_v22, %v381_v46  ;;  %v4854_v41 = vunpack.c.l.bf16 %v5369_v33 }
 0x108   :  { %v7501_v63 = vpop.eup %6111  ;;  %6131 = vpow2.f32 %v4248_v50  ;;  %v4254_v45 = vmul.f32 -1.442695, %v390_v31  ;;  %v4859_v53 = vunpack.c.h.bf16 %v5370_v25  ;;  %v4855_v60 = vunpack.c.h.bf16 %v5369_v33 }
 0x109   :  { %v7503_v20 = vpop.eup %6113  ;;  %6133 = vrcp.f32 %v511_v54  ;;  %v4252_v55 = vmul.f32 -1.442695, %v382_v40 }
 0x10a   :  { %v6116_v26 = vpop.eup %6115 }
 0x10b   :  { %v5701_v61 = vpop.f32.mrb[24].mxu0  ;;  %v6118_v30 = vpop.eup %6117  ;;  %v510_v50 = vadd.f32 1.0, %v6116_v26 }
 0x10c   :  { %v403_v2 = vadd.f32 %v5701_v61, %v4850_v51  ;;  %v394_v18 = vpop.f32.mrb[25].mxu0  ;;  %v6120_v35 = vpop.eup %6119 }
 0x10d   :  { %v5702_v23 = vpop.f32.mrb[26].mxu0  ;;  %v395_v32 = vadd.f32 %v4846_v62, %v394_v18  ;;  %v6122_v39 = vpop.eup %6121  ;;  %v577_v33 = vmul.f32 0.0, %v6120_v35 }
 0x10e   :  { %6135 = vtanh.f32 %v403_v2  ;;  %v397_v28 = vpop.f32.mrb[27].mxu0  ;;  %v406_v36 = vadd.f32 %v5702_v23, %v4851_v19  ;;  %v6124_v43 = vpop.eup %6123 }
 0x10f   :  { %6137 = vrcp.f32 %v509_v59  ;;  %v398_v42 = vadd.f32 %v4847_v24, %v397_v28  ;;  %v6126_v44 = vpop.eup %6125 }
 0x110   :  { %6139 = vrcp.f32 %v512_v0  ;;  %v6128_v49 = vpop.eup %6127  ;;  %v515_v46 = vadd.f32 1.0, %v6126_v44 }
 0x111   :  { %6141 = vpow2.f32 %v4253_v21  ;;  %v6130_v54 = vpop.eup %6129  ;;  %v579_v21 = vmul.f32 0.0, %v6118_v30  ;;  %v513_v22 = vadd.f32 1.0, %v6128_v49 }
 0x112   :  { %6143 = vpow2.f32 %v4251_v27  ;;  %v6132_v59 = vpop.eup %6131  ;;  %v516_v27 = vadd.f32 1.0, %v6130_v54 }
 0x113   :  { %6145 = vtanh.f32 %v395_v32  ;;  %v5705_v48 = vpop.f32.mrb[28].mxu0  ;;  %v6134_v62 = vpop.eup %6133  ;;  %v514_v32 = vadd.f32 1.0, %v6132_v59 }
 0x114   :  { %6147 = vtanh.f32 %v406_v36  ;;  %v419_v51 = vadd.f32 %v5705_v48, %v4858_v37  ;;  %v410_v52 = vpop.f32.mrb[29].mxu0 }
 0x115   :  { %6149 = vtanh.f32 %v398_v42  ;;  %v5706_v57 = vpop.f32.mrb[30].mxu0  ;;  %v411_v0 = vadd.f32 %v4854_v41, %v410_v52 }
 0x116   :  { %6151 = vtanh.f32 %v419_v51  ;;  %v413_v61 = vpop.f32.mrb[31].mxu0  ;;  %v422_v18 = vadd.f32 %v5706_v57, %v4859_v53 }
 0x117   :  { %6153 = vpow2.f32 %v4254_v45  ;;  %v414_v25 = vadd.f32 %v4855_v60, %v413_v61  ;;  %v578_v45 = vmul.f32 0.0, %v6124_v43 }
 0x118   :  { %v6136_v2 = vpop.eup %6135  ;;  %6155 = vrcp.f32 %v510_v50  ;;  %v583_v50 = vmul.f32 0.0, %v6134_v62 }
 0x119   :  { %v6138_v19 = vpop.eup %6137  ;;  %6157 = vpow2.f32 %v4252_v55  ;;  %v587_v23 = vmul.f32 %v6136_v2, %v7475_v29  ;;  %v580_v29 = vmul.f32 0.0, %v6122_v39 }
 0x11a   :  { %v6140_v24 = vpop.eup %6139  ;;  %6159 = vrcp.f32 %v515_v46  ;;  %v581_v59 = vmul.f32 0.0, %v6138_v19 }
 0x11b   :  { %v6142_v26 = vpop.eup %6141  ;;  %v7513_v28 = vadd.f32 %v587_v23, %v579_v21  ;;  %6161 = vtanh.f32 %v411_v0  ;;  %v584_v60 = vmul.f32 0.0, %v6140_v24 }
 0x11c   :  { %v6144_v31 = vpop.eup %6143  ;;  %6163 = vtanh.f32 %v422_v18  ;;  %v519_v39 = vadd.f32 1.0, %v6142_v26 }
 0x11d   :  { %v6146_v36 = vpop.eup %6145  ;;  %6165 = vrcp.f32 %v513_v22  ;;  %v517_v43 = vadd.f32 1.0, %v6144_v31 }
 0x11e   :  { %v6148_v37 = vpop.eup %6147  ;;  %v585_v30 = vmul.f32 %v6146_v36, %v7482_v34  ;;  %6167 = vtanh.f32 %v414_v25 }
 0x11f   :  { %v6150_v40 = vpop.eup %6149  ;;  %6169 = vrcp.f32 %v516_v27  ;;  %v588_v42 = vmul.f32 %v6148_v37, %v7484_v38 }
 0x120   :  { %v6152_v44 = vpop.eup %6151  ;;  %6171 = vrcp.f32 %v514_v32  ;;  %v7517_v48 = vadd.f32 %v585_v30, %v577_v33  ;;  %v586_v41 = vmul.f32 %v6150_v40, %v7491_v47 }
 0x121   :  { %v6154_v49 = vpop.eup %6153  ;;  %6173 = vtanh.f32 %v7513_v28  ;;  %v7521_v35 = vadd.f32 %v588_v42, %v580_v29  ;;  %v591_v34 = vmul.f32 %v6152_v44, %v7496_v56 }
 0x122   :  { %v6156_v51 = vpop.eup %6155  ;;  %v7524_v52 = vadd.f32 %v586_v41, %v578_v45  ;;  %6175 = vtanh.f32 %v7517_v48  ;;  %v520_v54 = vadd.f32 1.0, %v6154_v49 }
 0x123   :  { %v6158_v38 = vpop.eup %6157  ;;  %6177 = vtanh.f32 %v7521_v35  ;;  %v7528_v53 = vadd.f32 %v591_v34, %v583_v50  ;;  %v582_v21 = vmul.f32 0.0, %v6156_v51 }
 0x124   :  { %v6160_v47 = vpop.eup %6159  ;;  %6179 = vtanh.f32 %v7524_v52  ;;  %v518_v0 = vadd.f32 1.0, %v6158_v38 }
 0x125   :  { %v6162_v55 = vpop.eup %6161  ;;  %6181 = vrcp.f32 %v519_v39 }
 0x126   :  { %v6164_v57 = vpop.eup %6163  ;;  %v589_v56 = vmul.f32 %v6162_v55, %v7498_v58  ;;  %6183 = vrcp.f32 %v517_v43 }
 0x127   :  { %v6166_v46 = vpop.eup %6165  ;;  %v592_v61 = vmul.f32 %v6164_v57, %v7501_v63  ;;  %6185 = vrcp.f32 %v520_v54 }
 0x128   :  { %v6168_v62 = vpop.eup %6167  ;;  %v7533_v2 = vadd.f32 %v589_v56, %v581_v59  ;;  %6187 = vtanh.f32 %v7528_v53 }
 0x129   :  { %v6170_v18 = vpop.eup %6169  ;;  %v7536_v22 = vadd.f32 %v592_v61, %v584_v60  ;;  %v590_v19 = vmul.f32 %v6168_v62, %v7503_v20  ;;  %v5376_v60 = vld [vmem:[%s8891_s0 + $0xa8] sm:$0xff]  }
 0x12a   :  { %v6172_v23 = vpop.eup %6171  ;;  %6189 = vtanh.f32 %v7533_v2 }
 0x12b   :  { %v6174_v58 = vpop.eup %6173  ;;  %6191 = vtanh.f32 %v7536_v22  ;;  %v7541_v63 = vadd.f32 %v590_v19, %v582_v21 }
 0x12c   :  { %v6176_v24 = vpop.eup %6175  ;;  %6193 = vrcp.f32 %v518_v0  ;;  %v611_v27 = vmul.f32 %v6174_v58, %v6160_v47  ;;  %v4882_v58 = vunpack.c.l.bf16 %v5376_v60 }
 0x12d   :  { %v6178_v25 = vpop.eup %6177  ;;  %6195 = vtanh.f32 %v7541_v63  ;;  %v609_v32 = vmul.f32 %v6176_v24, %v6166_v46 }
 0x12e   :  { %v6180_v26 = vpop.eup %6179  ;;  %v612_v31 = vmul.f32 %v6178_v25, %v6170_v18  ;;  %v5375_v18 = vld [vmem:[%s8891_s0 + $0xa0] sm:$0xff]  }
 0x12f   :  { %v610_v36 = vmul.f32 %v6180_v26, %v6172_v23  ;;  %v6182_v37 = vpop.eup %6181  ;;  %v4878_v25 = vunpack.c.l.bf16 %v5375_v18 }
 0x130   :  { %v618_v20 = vpack.c.bf16 %v612_v31, %v611_v27  ;;  %v6184_v33 = vpop.eup %6183  ;;  %v4883_v27 = vunpack.c.h.bf16 %v5376_v60 }
 0x131   :  { %v617_v30 = vpack.c.bf16 %v610_v36, %v609_v32  ;;  %v6186_v40 = vpop.eup %6185  ;;  %v4879_v36 = vunpack.c.h.bf16 %v5375_v18 }
 0x132   :  { %v6188_v29 = vpop.eup %6187 }
 0x133   :  { %5707 = vmatprep.subr.bf16.mxu1 %v617_v30  ;;  %v615_v41 = vmul.f32 %v6188_v29, %v6182_v37 }
 0x134   :  { %v6190_v42 = vpop.eup %6189  ;;  %5708 = vmatpush3.bf16.msra.mxu1 %v617_v30 }
 0x135   :  { %v6192_v44 = vpop.eup %6191  ;;  %5709 = vmatprep.subr.bf16.mxu1 %v618_v20  ;;  %v613_v34 = vmul.f32 %v6190_v42, %v6184_v33  ;;  %v5378_v42 = vld [vmem:[%s8891_s0 + $0xb8] sm:$0xff]  }
 0x136   :  { %v6194_v45 = vpop.eup %6193  ;;  %v616_v49 = vmul.f32 %v6192_v44, %v6186_v40 }
 0x137   :  { %v6196_v50 = vpop.eup %6195 }
 0x138   :  { %5710 = vmatpush3.bf16.msra.mxu1 %v618_v20  ;;  %v614_v51 = vmul.f32 %v6196_v50, %v6194_v45  ;;  %v620_v39 = vpack.c.bf16 %v616_v49, %v615_v41  ;;  %v5377_v50 = vld [vmem:[%s8891_s0 + $0xb0] sm:$0xff]  }
 0x13a   :  { %v619_v38 = vpack.c.bf16 %v614_v51, %v613_v34  ;;  %v4890_v51 = vunpack.c.l.bf16 %v5378_v42 }
 0x13c   :  { %5711 = vmatprep.subr.bf16.mxu1 %v619_v38 }
 0x13d   :  { %5712 = vmatpush3.bf16.msra.mxu1 %v619_v38 }
 0x13e   :  { %5713 = vmatprep.subr.bf16.mxu1 %v620_v39 }
 0x141   :  { %5714 = vmatpush3.bf16.msra.mxu1 %v620_v39 }
 0x144   :  { %5716 = vmatmul.mubr.msk.bf16.vlgmr.msra.gmra.mrb[0].mxu1 %vm215_vm0, %v7332_v3  ;;  %v5372_v3 = vld [vmem:[%s8891_s0 + $0x88] sm:$0xff]  }
 0x145   :  { %5719 = vmatprep.mubr.msk.bf16.mxu1 %vm215_vm0, %v7339_v4  ;;  %v5371_v4 = vld [vmem:[%s8891_s0 + $0x80] sm:$0xff]  }
 0x14c   :  { %5720 = vmatmul.mubr.msk.bf16.gmra.mrb[4].mxu1 %vm215_vm0, %v7350_v5 }
 0x14d   :  { %5723 = vmatprep.mubr.msk.bf16.mxu1 %vm215_vm0, %v7355_v6  ;;  %v4866_v6 = vunpack.c.l.bf16 %v5372_v3 }
 0x154   :  { %5724 = vmatmul.mubr.msk.bf16.gmra.mrb[8].mxu1 %vm215_vm0, %v7364_v7 }
 0x155   :  { %5727 = vmatprep.mubr.msk.bf16.mxu1 %vm215_vm0, %v7369_v8  ;;  %v4862_v8 = vunpack.c.l.bf16 %v5371_v4 }
 0x15c   :  { %5728 = vmatmul.mubr.msk.bf16.gmra.mrb[12].mxu1 %vm215_vm0, %v7378_v9 }
 0x15d   :  { %5731 = vmatprep.mubr.msk.bf16.mxu1 %vm215_vm0, %v7383_v10  ;;  %v4867_v10 = vunpack.c.h.bf16 %v5372_v3 }
 0x164   :  { %5732 = vmatmul.mubr.msk.bf16.gmra.mrb[16].mxu1 %vm215_vm0, %v7392_v11 }
 0x165   :  { %5735 = vmatprep.mubr.msk.bf16.mxu1 %vm215_vm0, %v7397_v12 }
 0x16c   :  { %5736 = vmatmul.mubr.msk.bf16.gmra.mrb[20].mxu1 %vm215_vm0, %v7406_v13  ;;  %v4863_v13 = vunpack.c.h.bf16 %v5371_v4  ;;  %v4886_v4 = vunpack.c.l.bf16 %v5377_v50 }
 0x16d   :  { %5739 = vmatprep.mubr.msk.bf16.mxu1 %vm215_vm0, %v7411_v14 }
 0x174   :  { %5740 = vmatmul.mubr.msk.bf16.gmra.mrb[24].mxu1 %vm215_vm0, %v7420_v15  ;;  %v5373_v15 = vld [vmem:[%s8891_s0 + $0x90] sm:$0xff]  }
 0x175   :  { %5743 = vmatprep.mubr.msk.bf16.mxu1 %vm215_vm0, %v7425_v16  ;;  %v4870_v55 = vunpack.c.l.bf16 %v5373_v15  ;;  %v4871_v62 = vunpack.c.h.bf16 %v5373_v15 }
 0x17c   :  { %5744 = vmatmul.mubr.msk.bf16.gmra.mrb[28].mxu1 %vm215_vm0, %v7434_v17 }
 0x17d   :  { %5795 = vmatprep.mubr.msk.bf16.mxu1 %vm215_vm0, %v7327_v1  ;;  %v5374_v1 = vld [vmem:[%s8891_s0 + $0x98] sm:$0xff]  }
 0x17e   :  { %v4874_v17 = vunpack.c.l.bf16 %v5374_v1  ;;  %v4875_v56 = vunpack.c.h.bf16 %v5374_v1 }
 0x217   :  { %v5717_v5 = vpop.f32.mrb[0].mxu1 }
 0x218   :  { %v720_v7 = vpop.f32.mrb[1].mxu1  ;;  %v729_v12 = vadd.f32 %v5717_v5, %v4866_v6 }
 0x219   :  { %v5718_v9 = vpop.f32.mrb[2].mxu1  ;;  %v721_v14 = vadd.f32 %v4862_v8, %v720_v7  ;;  %v4891_v8 = vunpack.c.h.bf16 %v5378_v42 }
 0x21a   :  { %v723_v11 = vpop.f32.mrb[3].mxu1  ;;  %v732_v16 = vadd.f32 %v5718_v9, %v4867_v10  ;;  %v4305_v47 = vmul.f32 -1.442695, %v729_v12 }
 0x21b   :  { %v724_v54 = vadd.f32 %v4863_v13, %v723_v11  ;;  %v4303_v59 = vmul.f32 -1.442695, %v721_v14 }
 0x21c   :  { %v4306_v61 = vmul.f32 -1.442695, %v732_v16  ;;  %6197 = vpow2.f32 %v4305_v47 }
 0x21d   :  { %v4304_v19 = vmul.f32 -1.442695, %v724_v54  ;;  %6199 = vpow2.f32 %v4303_v59  ;;  %v4887_v54 = vunpack.c.h.bf16 %v5377_v50 }
 0x21e   :  { %6201 = vpow2.f32 %v4306_v61 }
 0x21f   :  { %v5721_v43 = vpop.f32.mrb[4].mxu1  ;;  %6203 = vpow2.f32 %v4304_v19 }
 0x220   :  { %v736_v57 = vpop.f32.mrb[5].mxu1  ;;  %v745_v21 = vadd.f32 %v5721_v43, %v4874_v17 }
 0x221   :  { %v5722_v46 = vpop.f32.mrb[6].mxu1  ;;  %v737_v23 = vadd.f32 %v4870_v55, %v736_v57 }
 0x222   :  { %v739_v0 = vpop.f32.mrb[7].mxu1  ;;  %v748_v24 = vadd.f32 %v5722_v46, %v4875_v56  ;;  %v4309_v31 = vmul.f32 -1.442695, %v745_v21  ;;  %v5380_v46 = vld [vmem:[%s8891_s0 + $0xc8] sm:$0xff]  }
 0x223   :  { %v740_v26 = vadd.f32 %v4871_v62, %v739_v0  ;;  %v4307_v37 = vmul.f32 -1.442695, %v737_v23  ;;  %v5379_v0 = vld [vmem:[%s8891_s0 + $0xc0] sm:$0xff]  }
 0x224   :  { %v4310_v30 = vmul.f32 -1.442695, %v748_v24  ;;  %6205 = vpow2.f32 %v4309_v31  ;;  %v4898_v24 = vunpack.c.l.bf16 %v5380_v46  ;;  %v4894_v31 = vunpack.c.l.bf16 %v5379_v0 }
 0x225   :  { %v4308_v44 = vmul.f32 -1.442695, %v740_v26  ;;  %6207 = vpow2.f32 %v4307_v37 }
 0x226   :  { %6209 = vpow2.f32 %v4310_v30  ;;  %v6198_v38 = vpop.eup %6197 }
 0x227   :  { %v5725_v32 = vpop.f32.mrb[8].mxu1  ;;  %6211 = vpow2.f32 %v4308_v44  ;;  %v6200_v5 = vpop.eup %6199  ;;  %v921_v12 = vadd.f32 1.0, %v6198_v38  ;;  %v7616_v38 = vld [vmem:[%s8891_s0 + $0xd0] sm:$0xff]  }
 0x228   :  { %v761_v20 = vadd.f32 %v5725_v32, %v4882_v58  ;;  %v752_v33 = vpop.f32.mrb[9].mxu1  ;;  %v6202_v9 = vpop.eup %6201  ;;  %v919_v14 = vadd.f32 1.0, %v6200_v5 }
 0x229   :  { %v753_v40 = vadd.f32 %v4878_v25, %v752_v33  ;;  %v5726_v29 = vpop.f32.mrb[10].mxu1  ;;  %v6204_v1 = vpop.eup %6203  ;;  %v922_v17 = vadd.f32 1.0, %v6202_v9 }
 0x22a   :  { %v764_v45 = vadd.f32 %v5726_v29, %v4883_v27  ;;  %v755_v41 = vpop.f32.mrb[11].mxu1  ;;  %v4313_v34 = vmul.f32 -1.442695, %v761_v20  ;;  %v920_v57 = vadd.f32 1.0, %v6204_v1  ;;  %v4899_v20 = vunpack.c.h.bf16 %v5380_v46 }
 0x22b   :  { %v756_v49 = vadd.f32 %v4879_v36, %v755_v41  ;;  %v4311_v39 = vmul.f32 -1.442695, %v753_v40  ;;  %v4895_v40 = vunpack.c.h.bf16 %v5379_v0  ;;  %v4902_v1 = vunpack.c.l.bf16 %v7616_v38 }
 0x22c   :  { %v4314_v3 = vmul.f32 -1.442695, %v764_v45  ;;  %6213 = vpow2.f32 %v4313_v34 }
 0x22d   :  { %v4312_v6 = vmul.f32 -1.442695, %v756_v49  ;;  %6215 = vpow2.f32 %v4311_v39  ;;  %v7609_v49 = vld [vmem:[%s8891_s0 + $0xd8] sm:$0xff]  }
 0x22e   :  { %6217 = vpow2.f32 %v4314_v3  ;;  %v6206_v55 = vpop.eup %6205  ;;  %v4906_v9 = vunpack.c.l.bf16 %v7609_v49 }
 0x22f   :  { %v5729_v7 = vpop.f32.mrb[12].mxu1  ;;  %6219 = vpow2.f32 %v4312_v6  ;;  %v6208_v59 = vpop.eup %6207  ;;  %v925_v21 = vadd.f32 1.0, %v6206_v55 }
 0x230   :  { %v777_v10 = vadd.f32 %v5729_v7, %v4890_v51  ;;  %v768_v11 = vpop.f32.mrb[13].mxu1  ;;  %6221 = vrcp.f32 %v921_v12  ;;  %v6210_v60 = vpop.eup %6209  ;;  %v923_v58 = vadd.f32 1.0, %v6208_v59 }
 0x231   :  { %v5730_v13 = vpop.f32.mrb[14].mxu1  ;;  %v769_v15 = vadd.f32 %v4886_v4, %v768_v11  ;;  %6223 = vrcp.f32 %v919_v14  ;;  %v6212_v18 = vpop.eup %6211  ;;  %v926_v27 = vadd.f32 1.0, %v6210_v60  ;;  %v5384_v11 = vld [vmem:[%s8891_s0 + $0xe8] sm:$0xff]  }
 0x232   :  { %v771_v16 = vpop.f32.mrb[15].mxu1  ;;  %v780_v43 = vadd.f32 %v5730_v13, %v4891_v8  ;;  %v4317_v47 = vmul.f32 -1.442695, %v777_v10  ;;  %6225 = vrcp.f32 %v922_v17  ;;  %v924_v37 = vadd.f32 1.0, %v6212_v18 }
 0x233   :  { %v4315_v56 = vmul.f32 -1.442695, %v769_v15  ;;  %v772_v19 = vadd.f32 %v4887_v54, %v771_v16  ;;  %v5383_v54 = vld [vmem:[%s8891_s0 + $0xe0] sm:$0xff]  }
 0x234   :  { %v4318_v61 = vmul.f32 -1.442695, %v780_v43  ;;  %6227 = vpow2.f32 %v4317_v47  ;;  %v4914_v47 = vunpack.c.l.bf16 %v5384_v11  ;;  %v4910_v18 = vunpack.c.l.bf16 %v5383_v54 }
 0x235   :  { %6229 = vrcp.f32 %v920_v57  ;;  %v4316_v30 = vmul.f32 -1.442695, %v772_v19 }
 0x236   :  { %v6214_v26 = vpop.eup %6213  ;;  %6231 = vpow2.f32 %v4315_v56 }
 0x237   :  { %v5733_v62 = vpop.f32.mrb[16].mxu1  ;;  %v6216_v36 = vpop.eup %6215  ;;  %6233 = vpow2.f32 %v4318_v61  ;;  %v929_v42 = vadd.f32 1.0, %v6214_v26 }
 0x238   :  { %v784_v23 = vpop.f32.mrb[17].mxu1  ;;  %v6218_v33 = vpop.eup %6217  ;;  %6235 = vrcp.f32 %v925_v21  ;;  %v793_v44 = vadd.f32 %v5733_v62, %v4898_v24  ;;  %v927_v45 = vadd.f32 1.0, %v6216_v36  ;;  %v4907_v62 = vunpack.c.h.bf16 %v7609_v49  ;;  %v5386_v36 = vld [vmem:[%s8891_s0 + $0xf8] sm:$0xff]  }
 0x239   :  { %v5734_v25 = vpop.f32.mrb[18].mxu1  ;;  %v6220_v29 = vpop.eup %6219  ;;  %6237 = vrcp.f32 %v923_v58  ;;  %v785_v41 = vadd.f32 %v4894_v31, %v784_v23  ;;  %v930_v34 = vadd.f32 1.0, %v6218_v33  ;;  %v4915_v24 = vunpack.c.h.bf16 %v5384_v11 }
 0x23a   :  { %v787_v32 = vpop.f32.mrb[19].mxu1  ;;  %6239 = vrcp.f32 %v926_v27  ;;  %v7611_v50 = vpop.eup %6221  ;;  %v796_v51 = vadd.f32 %v5734_v25, %v4899_v20  ;;  %v928_v4 = vadd.f32 1.0, %v6220_v29  ;;  %v4321_v8 = vmul.f32 -1.442695, %v793_v44 }
 0x23b   :  { %6241 = vrcp.f32 %v924_v37  ;;  %v7618_v3 = vpop.eup %6223  ;;  %v788_v5 = vadd.f32 %v4895_v40, %v787_v32  ;;  %v4319_v13 = vmul.f32 -1.442695, %v785_v41  ;;  %v4903_v27 = vunpack.c.h.bf16 %v7616_v38  ;;  %v5385_v41 = vld [vmem:[%s8891_s0 + $0xf0] sm:$0xff]  }
 0x23c   :  { %6243 = vpow2.f32 %v4316_v30  ;;  %v7620_v7 = vpop.eup %6225  ;;  %v4322_v16 = vmul.f32 -1.442695, %v796_v51  ;;  %v4911_v32 = vunpack.c.h.bf16 %v5383_v54 }
 0x23d   :  { %6245 = vrcp.f32 %v929_v42  ;;  %v4320_v43 = vmul.f32 -1.442695, %v788_v5 }
 0x23e   :  { %v6228_v12 = vpop.eup %6227  ;;  %6247 = vrcp.f32 %v927_v45  ;;  %v4922_v45 = vunpack.c.l.bf16 %v5386_v36 }
 0x23f   :  { %v5737_v39 = vpop.f32.mrb[20].mxu1  ;;  %v7627_v15 = vpop.eup %6229  ;;  %6249 = vrcp.f32 %v930_v34  ;;  %v933_v57 = vadd.f32 1.0, %v6228_v12  ;;  %v4923_v12 = vunpack.c.h.bf16 %v5386_v36 }
 0x240   :  { %v800_v6 = vpop.f32.mrb[21].mxu1  ;;  %v6232_v17 = vpop.eup %6231  ;;  %6251 = vrcp.f32 %v928_v4  ;;  %v809_v59 = vadd.f32 %v5737_v39, %v4906_v9 }
 0x241   :  { %v5738_v10 = vpop.f32.mrb[22].mxu1  ;;  %v6234_v55 = vpop.eup %6233  ;;  %6253 = vpow2.f32 %v4321_v8  ;;  %v801_v46 = vadd.f32 %v4902_v1, %v800_v6  ;;  %v931_v61 = vadd.f32 1.0, %v6232_v17  ;;  %v4918_v6 = vunpack.c.l.bf16 %v5385_v41 }
 0x242   :  { %v803_v14 = vpop.f32.mrb[23].mxu1  ;;  %v7632_v56 = vpop.eup %6235  ;;  %6255 = vpow2.f32 %v4319_v13  ;;  %v934_v19 = vadd.f32 1.0, %v6234_v55  ;;  %v4325_v26 = vmul.f32 -1.442695, %v809_v59  ;;  %v812_v40 = vadd.f32 %v5738_v10, %v4907_v62 }
 0x243   :  { %v7634_v60 = vpop.eup %6237  ;;  %6257 = vpow2.f32 %v4322_v16  ;;  %v4323_v20 = vmul.f32 -1.442695, %v801_v46  ;;  %v804_v34 = vadd.f32 %v4903_v27, %v803_v14 }
 0x244   :  { %v7637_v21 = vpop.eup %6239  ;;  %6259 = vpow2.f32 %v4320_v43  ;;  %v4326_v4 = vmul.f32 -1.442695, %v812_v40  ;;  %v4919_v43 = vunpack.c.h.bf16 %v5385_v41 }
 0x245   :  { %v7639_v25 = vpop.eup %6241  ;;  %6261 = vrcp.f32 %v933_v57  ;;  %v4324_v1 = vmul.f32 -1.442695, %v804_v34 }
 0x246   :  { %v6244_v37 = vpop.eup %6243 }
 0x247   :  { %v5741_v0 = vpop.f32.mrb[24].mxu1  ;;  %v6246_v30 = vpop.eup %6245  ;;  %v932_v9 = vadd.f32 1.0, %v6244_v37 }
 0x248   :  { %v825_v23 = vadd.f32 %v5741_v0, %v4914_v47  ;;  %v816_v58 = vpop.f32.mrb[25].mxu1  ;;  %v6248_v42 = vpop.eup %6247 }
 0x249   :  { %v5742_v31 = vpop.f32.mrb[26].mxu1  ;;  %v817_v29 = vadd.f32 %v4910_v18, %v816_v58  ;;  %v6250_v49 = vpop.eup %6249 }
 0x24a   :  { %6263 = vtanh.f32 %v825_v23  ;;  %v819_v33 = vpop.f32.mrb[27].mxu1  ;;  %v828_v44 = vadd.f32 %v5742_v31, %v4915_v24  ;;  %v6252_v39 = vpop.eup %6251  ;;  %v1002_v37 = vmul.f32 %v6250_v49, %v7521_v35 }
 0x24b   :  { %6265 = vrcp.f32 %v931_v61  ;;  %v820_v51 = vadd.f32 %v4911_v32, %v819_v33  ;;  %v6254_v38 = vpop.eup %6253  ;;  %v1001_v61 = vmul.f32 %v6246_v30, %v7513_v28  ;;  %v999_v28 = vmul.f32 %v6248_v42, %v7517_v48 }
 0x24c   :  { %6267 = vrcp.f32 %v934_v19  ;;  %v6256_v8 = vpop.eup %6255  ;;  %v937_v14 = vadd.f32 1.0, %v6254_v38  ;;  %v1000_v30 = vmul.f32 %v6252_v39, %v7524_v52 }
 0x24d   :  { %6269 = vpow2.f32 %v4325_v26  ;;  %v6258_v13 = vpop.eup %6257  ;;  %v935_v62 = vadd.f32 1.0, %v6256_v8 }
 0x24e   :  { %6271 = vpow2.f32 %v4323_v20  ;;  %v6260_v17 = vpop.eup %6259  ;;  %v938_v58 = vadd.f32 1.0, %v6258_v13 }
 0x24f   :  { %6273 = vtanh.f32 %v817_v29  ;;  %v5745_v5 = vpop.f32.mrb[28].mxu1  ;;  %v6262_v54 = vpop.eup %6261  ;;  %v936_v27 = vadd.f32 1.0, %v6260_v17 }
 0x250   :  { %6275 = vtanh.f32 %v828_v44  ;;  %v841_v10 = vadd.f32 %v5745_v5, %v4922_v45  ;;  %v832_v11 = vpop.f32.mrb[29].mxu1  ;;  %v1005_v48 = vmul.f32 %v6262_v54, %v7528_v53 }
 0x251   :  { %6277 = vtanh.f32 %v820_v51  ;;  %v5746_v16 = vpop.f32.mrb[30].mxu1  ;;  %v833_v55 = vadd.f32 %v4918_v6, %v832_v11 }
 0x252   :  { %6279 = vtanh.f32 %v841_v10  ;;  %v835_v47 = vpop.f32.mrb[31].mxu1  ;;  %v844_v59 = vadd.f32 %v5746_v16, %v4923_v12 }
 0x253   :  { %6281 = vpow2.f32 %v4326_v4  ;;  %v836_v19 = vadd.f32 %v4919_v43, %v835_v47 }
 0x254   :  { %v6264_v57 = vpop.eup %6263  ;;  %6283 = vrcp.f32 %v932_v9 }
 0x255   :  { %v6266_v46 = vpop.eup %6265  ;;  %6285 = vpow2.f32 %v4324_v1  ;;  %v1009_v0 = vmul.f32 %v6264_v57, %v7611_v50 }
 0x256   :  { %v6268_v18 = vpop.eup %6267  ;;  %6287 = vrcp.f32 %v937_v14 }
 0x257   :  { %v6270_v23 = vpop.eup %6269  ;;  %v7650_v24 = vadd.f32 %v1009_v0, %v1001_v61  ;;  %6289 = vtanh.f32 %v833_v55  ;;  %v1006_v4 = vmul.f32 %v6268_v18, %v7536_v22 }
 0x258   :  { %v6272_v26 = vpop.eup %6271  ;;  %6291 = vtanh.f32 %v844_v59  ;;  %v941_v45 = vadd.f32 1.0, %v6270_v23 }
 0x259   :  { %v6274_v31 = vpop.eup %6273  ;;  %6293 = vrcp.f32 %v935_v62  ;;  %v939_v41 = vadd.f32 1.0, %v6272_v26 }
 0x25a   :  { %v6276_v32 = vpop.eup %6275  ;;  %v1007_v36 = vmul.f32 %v6274_v31, %v7618_v3  ;;  %6295 = vtanh.f32 %v836_v19  ;;  %v7691_v31 = vld [vmem:[%s8893_s2 + $0x8] sm:$0xff]  }
 0x25b   :  { %v6278_v50 = vpop.eup %6277  ;;  %6297 = vrcp.f32 %v938_v58  ;;  %v1010_v20 = vmul.f32 %v6276_v32, %v7620_v7  ;;  %v7698_v32 = vld [vmem:[%s8893_s2 + $0x10] sm:$0xff]  }
 0x25c   :  { %v6280_v33 = vpop.eup %6279  ;;  %6299 = vrcp.f32 %v936_v27  ;;  %v7657_v40 = vadd.f32 %v1007_v36, %v999_v28  ;;  %v1008_v29 = vmul.f32 %v6278_v50, %v7627_v15  ;;  %v7705_v28 = vld [vmem:[%s8893_s2 + $0x18] sm:$0xff]   ;;  %v7712_v36 = vld [vmem:[%s8893_s2 + $0x20] sm:$0xff]   ;;  %v7719_v50 = vld [vmem:[%s8893_s2 + $0x28] sm:$0xff]  }
 0x25d   :  { %v6282_v44 = vpop.eup %6281  ;;  %6301 = vtanh.f32 %v7650_v24  ;;  %v7662_v3 = vadd.f32 %v1010_v20, %v1002_v37  ;;  %v1013_v35 = vmul.f32 %v6280_v33, %v7632_v56  ;;  %v1003_v56 = vmul.f32 %v6266_v46, %v7533_v2  ;;  %v7726_v37 = vld [vmem:[%s8893_s2 + $0x30] sm:$0xff]   ;;  %v7733_v20 = vld [vmem:[%s8893_s2 + $0x38] sm:$0xff]   ;;  %v7740_v33 = vld [vmem:[%s8893_s2 + $0x40] sm:$0xff]  }
 0x25e   :  { %v6284_v42 = vpop.eup %6283  ;;  %6303 = vtanh.f32 %v7657_v40  ;;  %v7666_v7 = vadd.f32 %v1008_v29, %v1000_v30  ;;  %v942_v53 = vadd.f32 1.0, %v6282_v44  ;;  %v7747_v30 = vld [vmem:[%s8893_s2 + $0x48] sm:$0xff]   ;;  %v7754_v29 = vld [vmem:[%s8893_s2 + $0x50] sm:$0xff]   ;;  %v7761_v44 = vld [vmem:[%s8893_s2 + $0x58] sm:$0xff]  }
 0x25f   :  { %v6286_v52 = vpop.eup %6285  ;;  %6305 = vtanh.f32 %v7662_v3  ;;  %v7669_v15 = vadd.f32 %v1013_v35, %v1005_v48  ;;  %v1004_v11 = vmul.f32 %v6284_v42, %v7541_v63  ;;  %v7768_v48 = vld [vmem:[%s8893_s2 + $0x60] sm:$0xff]   ;;  %v7775_v35 = vld [vmem:[%s8893_s2 + $0x68] sm:$0xff]   ;;  %v7782_v42 = vld [vmem:[%s8893_s2 + $0x70] sm:$0xff]  }
 0x260   :  { %v6288_v49 = vpop.eup %6287  ;;  %6307 = vtanh.f32 %v7666_v7  ;;  %v940_v8 = vadd.f32 1.0, %v6286_v52  ;;  %v7796_v52 = vld [vmem:[%s8893_s2] sm:$0xff]  }
 0x261   :  { %v6290_v34 = vpop.eup %6289  ;;  %6309 = vrcp.f32 %v941_v45  ;;  %v7789_v45 = vld [vmem:[%s8893_s2 + $0x78] sm:$0xff]  }
 0x262   :  { %v6292_v51 = vpop.eup %6291  ;;  %v1011_v39 = vmul.f32 %v6290_v34, %v7634_v60  ;;  %6311 = vrcp.f32 %v939_v41  ;;  %v5388_v41 = vld [vmem:[%s8891_s0 + $0x108] sm:$0xff]  }
 0x263   :  { %v6294_v38 = vpop.eup %6293  ;;  %v1014_v5 = vmul.f32 %v6292_v51, %v7637_v21  ;;  %6313 = vrcp.f32 %v942_v53  ;;  %v4930_v34 = vunpack.c.l.bf16 %v5388_v41 }
 0x264   :  { %v6296_v6 = vpop.eup %6295  ;;  %v7676_v9 = vadd.f32 %v1011_v39, %v1003_v56  ;;  %6315 = vtanh.f32 %v7669_v15 }
 0x265   :  { %v6298_v10 = vpop.eup %6297  ;;  %v7680_v2 = vadd.f32 %v1014_v5, %v1006_v4  ;;  %v1012_v60 = vmul.f32 %v6296_v6, %v7639_v25 }
 0x266   :  { %v6300_v12 = vpop.eup %6299  ;;  %6317 = vtanh.f32 %v7676_v9 }
 0x267   :  { %v6302_v22 = vpop.eup %6301  ;;  %6319 = vtanh.f32 %v7680_v2  ;;  %v7685_v21 = vadd.f32 %v1012_v60, %v1004_v11  ;;  %v5389_v11 = vld [vmem:[%s8891_s0 + $0x110] sm:$0xff]  }
 0x268   :  { %v6304_v13 = vpop.eup %6303  ;;  %6321 = vrcp.f32 %v940_v8  ;;  %v1033_v16 = vmul.f32 %v6302_v22, %v6288_v49  ;;  %v5387_v49 = vld [vmem:[%s8891_s0 + $0x100] sm:$0xff]   ;;  %v5390_v8 = vld [vmem:[%s8891_s0 + $0x118] sm:$0xff]  }
 0x269   :  { %v6306_v1 = vpop.eup %6305  ;;  %6323 = vtanh.f32 %v7685_v21  ;;  %v1031_v14 = vmul.f32 %v6304_v13, %v6294_v38  ;;  %v4926_v56 = vunpack.c.l.bf16 %v5387_v49  ;;  %v4931_v38 = vunpack.c.h.bf16 %v5388_v41 }
 0x26a   :  { %v6308_v63 = vpop.eup %6307  ;;  %v1034_v17 = vmul.f32 %v6306_v1, %v6298_v10  ;;  %v4927_v6 = vunpack.c.h.bf16 %v5387_v49 }
 0x26b   :  { %v1032_v43 = vmul.f32 %v6308_v63, %v6300_v12  ;;  %v6310_v47 = vpop.eup %6309  ;;  %v4938_v12 = vunpack.c.l.bf16 %v5390_v8  ;;  %v4934_v63 = vunpack.c.l.bf16 %v5389_v11 }
 0x26c   :  { %v1040_v25 = vpack.c.bf16 %v1034_v17, %v1033_v16  ;;  %v6312_v54 = vpop.eup %6311 }
 0x26d   :  { %v1039_v55 = vpack.c.bf16 %v1032_v43, %v1031_v14  ;;  %v6314_v57 = vpop.eup %6313  ;;  %v4939_v14 = vunpack.c.h.bf16 %v5390_v8  ;;  %v5393_v8 = vld [vmem:[%s8891_s0 + $0x130] sm:$0xff]  }
 0x26e   :  { %v6316_v59 = vpop.eup %6315 }
 0x26f   :  { %5747 = vmatprep.subr.bf16.mxu0 %v1039_v55  ;;  %v1037_v0 = vmul.f32 %v6316_v59, %v6310_v47  ;;  %v5392_v47 = vld [vmem:[%s8891_s0 + $0x128] sm:$0xff]  }
 0x270   :  { %v6318_v46 = vpop.eup %6317  ;;  %5748 = vmatpush3.bf16.msra.mxu0 %v1039_v55 }
 0x271   :  { %v6320_v61 = vpop.eup %6319  ;;  %5749 = vmatprep.subr.bf16.mxu0 %v1040_v25  ;;  %v1035_v23 = vmul.f32 %v6318_v46, %v6312_v54  ;;  %v4935_v54 = vunpack.c.h.bf16 %v5389_v11 }
 0x272   :  { %v6322_v62 = vpop.eup %6321  ;;  %v1038_v18 = vmul.f32 %v6320_v61, %v6314_v57  ;;  %v5391_v57 = vld [vmem:[%s8891_s0 + $0x120] sm:$0xff]  }
 0x273   :  { %v6324_v19 = vpop.eup %6323 }
 0x274   :  { %5750 = vmatpush3.bf16.msra.mxu0 %v1040_v25  ;;  %v1036_v58 = vmul.f32 %v6324_v19, %v6322_v62  ;;  %v1042_v26 = vpack.c.bf16 %v1038_v18, %v1037_v0  ;;  %v4946_v62 = vunpack.c.l.bf16 %v5392_v47  ;;  %v4942_v18 = vunpack.c.l.bf16 %v5391_v57 }
 0x276   :  { %v1041_v27 = vpack.c.bf16 %v1036_v58, %v1035_v23  ;;  %v4947_v23 = vunpack.c.h.bf16 %v5392_v47 }
 0x278   :  { %5751 = vmatprep.subr.bf16.mxu0 %v1041_v27 }
 0x279   :  { %5752 = vmatpush3.bf16.msra.mxu0 %v1041_v27  ;;  %v4943_v27 = vunpack.c.h.bf16 %v5391_v57 }
 0x27a   :  { %5753 = vmatprep.subr.bf16.mxu0 %v1042_v26 }
 0x27d   :  { %5754 = vmatpush3.bf16.msra.mxu0 %v1042_v26 }
 0x280   :  { %5756 = vmatmul.mubr.msk.bf16.vlgmr.msra.gmra.mrb[32].mxu0 %vm215_vm0, %v7691_v31 }
 0x281   :  { %5759 = vmatprep.mubr.msk.bf16.mxu0 %vm215_vm0, %v7698_v32 }
 0x288   :  { %5760 = vmatmul.mubr.msk.bf16.gmra.mrb[36].mxu0 %vm215_vm0, %v7705_v28 }
 0x289   :  { %5763 = vmatprep.mubr.msk.bf16.mxu0 %vm215_vm0, %v7712_v36 }
 0x290   :  { %5764 = vmatmul.mubr.msk.bf16.gmra.mrb[40].mxu0 %vm215_vm0, %v7719_v50 }
 0x291   :  { %5767 = vmatprep.mubr.msk.bf16.mxu0 %vm215_vm0, %v7726_v37 }
 0x298   :  { %5768 = vmatmul.mubr.msk.bf16.gmra.mrb[44].mxu0 %vm215_vm0, %v7733_v20 }
 0x299   :  { %5771 = vmatprep.mubr.msk.bf16.mxu0 %vm215_vm0, %v7740_v33 }
 0x2a0   :  { %5772 = vmatmul.mubr.msk.bf16.gmra.mrb[48].mxu0 %vm215_vm0, %v7747_v30 }
 0x2a1   :  { %5775 = vmatprep.mubr.msk.bf16.mxu0 %vm215_vm0, %v7754_v29 }
 0x2a8   :  { %5776 = vmatmul.mubr.msk.bf16.gmra.mrb[52].mxu0 %vm215_vm0, %v7761_v44 }
 0x2a9   :  { %5779 = vmatprep.mubr.msk.bf16.mxu0 %vm215_vm0, %v7768_v48 }
 0x2b0   :  { %5780 = vmatmul.mubr.msk.bf16.gmra.mrb[56].mxu0 %vm215_vm0, %v7775_v35 }
 0x2b1   :  { %5783 = vmatprep.mubr.msk.bf16.mxu0 %vm215_vm0, %v7782_v42 }
 0x2b8   :  { %5784 = vmatmul.mubr.msk.bf16.gmra.mrb[60].mxu0 %vm215_vm0, %v7789_v45 }
 0x2b9   :  { %5835 = vmatprep.mubr.msk.bf16.mxu0 %vm215_vm0, %v7796_v52 }
 0x353   :  { %v5757_v53 = vpop.f32.mrb[32].mxu0 }
 0x354   :  { %v1142_v51 = vpop.f32.mrb[33].mxu0  ;;  %v1151_v5 = vadd.f32 %v5757_v53, %v4930_v34 }
 0x355   :  { %v5758_v39 = vpop.f32.mrb[34].mxu0  ;;  %v1143_v10 = vadd.f32 %v4926_v56, %v1142_v51 }
 0x356   :  { %v1145_v4 = vpop.f32.mrb[35].mxu0  ;;  %v1154_v60 = vadd.f32 %v5758_v39, %v4931_v38  ;;  %v4377_v13 = vmul.f32 -1.442695, %v1151_v5  ;;  %v5394_v39 = vld [vmem:[%s8891_s0 + $0x138] sm:$0xff]  }
 0x357   :  { %v1146_v1 = vadd.f32 %v4927_v6, %v1145_v4  ;;  %v4375_v17 = vmul.f32 -1.442695, %v1143_v10  ;;  %v4954_v11 = vunpack.c.l.bf16 %v5394_v39 }
 0x358   :  { %v4378_v25 = vmul.f32 -1.442695, %v1154_v60  ;;  %6325 = vpow2.f32 %v4377_v13  ;;  %v4950_v13 = vunpack.c.l.bf16 %v5393_v8 }
 0x359   :  { %v4376_v46 = vmul.f32 -1.442695, %v1146_v1  ;;  %6327 = vpow2.f32 %v4375_v17  ;;  %v4955_v17 = vunpack.c.h.bf16 %v5394_v39 }
 0x35a   :  { %6329 = vpow2.f32 %v4378_v25 }
 0x35b   :  { %v5761_v22 = vpop.f32.mrb[36].mxu0  ;;  %6331 = vpow2.f32 %v4376_v46 }
 0x35c   :  { %v1158_v16 = vpop.f32.mrb[37].mxu0  ;;  %v1167_v59 = vadd.f32 %v5761_v22, %v4938_v12 }
 0x35d   :  { %v5762_v43 = vpop.f32.mrb[38].mxu0  ;;  %v1159_v61 = vadd.f32 %v4934_v63, %v1158_v16 }
 0x35e   :  { %v1161_v55 = vpop.f32.mrb[39].mxu0  ;;  %v1170_v0 = vadd.f32 %v5762_v43, %v4939_v14  ;;  %v4381_v58 = vmul.f32 -1.442695, %v1167_v59 }
 0x35f   :  { %v1162_v19 = vadd.f32 %v4935_v54, %v1161_v55  ;;  %v4379_v41 = vmul.f32 -1.442695, %v1159_v61 }
 0x360   :  { %v4382_v34 = vmul.f32 -1.442695, %v1170_v0  ;;  %6333 = vpow2.f32 %v4381_v58 }
 0x361   :  { %v4380_v38 = vmul.f32 -1.442695, %v1162_v19  ;;  %6335 = vpow2.f32 %v4379_v41 }
 0x362   :  { %6337 = vpow2.f32 %v4382_v34  ;;  %v6326_v12 = vpop.eup %6325  ;;  %v5395_v34 = vld [vmem:[%s8891_s0 + $0x140] sm:$0xff]  }
 0x363   :  { %v5765_v26 = vpop.f32.mrb[40].mxu0  ;;  %6339 = vpow2.f32 %v4380_v38  ;;  %v6328_v1 = vpop.eup %6327  ;;  %v1343_v25 = vadd.f32 1.0, %v6326_v12 }
 0x364   :  { %v1183_v49 = vadd.f32 %v5765_v26, %v4946_v62  ;;  %v1174_v53 = vpop.f32.mrb[41].mxu0  ;;  %v6330_v14 = vpop.eup %6329  ;;  %v1341_v57 = vadd.f32 1.0, %v6328_v1 }
 0x365   :  { %v1175_v51 = vadd.f32 %v4942_v18, %v1174_v53  ;;  %v5766_v56 = vpop.f32.mrb[42].mxu0  ;;  %v6332_v55 = vpop.eup %6331  ;;  %v1344_v61 = vadd.f32 1.0, %v6330_v14  ;;  %v4951_v18 = vunpack.c.h.bf16 %v5393_v8 }
 0x366   :  { %v1186_v4 = vadd.f32 %v5766_v56, %v4947_v23  ;;  %v1177_v5 = vpop.f32.mrb[43].mxu0  ;;  %v4385_v10 = vmul.f32 -1.442695, %v1183_v49  ;;  %v1342_v23 = vadd.f32 1.0, %v6332_v55 }
 0x367   :  { %v1178_v6 = vadd.f32 %v4943_v27, %v1177_v5  ;;  %v4383_v60 = vmul.f32 -1.442695, %v1175_v51  ;;  %v5396_v27 = vld [vmem:[%s8891_s0 + $0x148] sm:$0xff]  }
 0x368   :  { %v4386_v22 = vmul.f32 -1.442695, %v1186_v4  ;;  %6341 = vpow2.f32 %v4385_v10  ;;  %v4962_v5 = vunpack.c.l.bf16 %v5396_v27 }
 0x369   :  { %v4384_v63 = vmul.f32 -1.442695, %v1178_v6  ;;  %6343 = vpow2.f32 %v4383_v60 }
 0x36a   :  { %6345 = vpow2.f32 %v4386_v22  ;;  %v6334_v19 = vpop.eup %6333 }
 0x36b   :  { %v5769_v16 = vpop.f32.mrb[44].mxu0  ;;  %6347 = vpow2.f32 %v4384_v63  ;;  %v6336_v58 = vpop.eup %6335  ;;  %v1347_v56 = vadd.f32 1.0, %v6334_v19 }
 0x36c   :  { %v1199_v43 = vadd.f32 %v5769_v16, %v4954_v11  ;;  %v1190_v47 = vpop.f32.mrb[45].mxu0  ;;  %6349 = vrcp.f32 %v1343_v25  ;;  %v6338_v41 = vpop.eup %6337  ;;  %v1345_v4 = vadd.f32 1.0, %v6336_v58  ;;  %v4958_v11 = vunpack.c.l.bf16 %v5395_v34 }
 0x36d   :  { %v5770_v54 = vpop.f32.mrb[46].mxu0  ;;  %v1191_v59 = vadd.f32 %v4950_v13, %v1190_v47  ;;  %6351 = vrcp.f32 %v1341_v57  ;;  %v6340_v51 = vpop.eup %6339  ;;  %v1348_v10 = vadd.f32 1.0, %v6338_v41  ;;  %v4963_v13 = vunpack.c.h.bf16 %v5396_v27  ;;  %v5400_v41 = vld [vmem:[%s8891_s0 + $0x168] sm:$0xff]  }
 0x36e   :  { %v1193_v46 = vpop.f32.mrb[47].mxu0  ;;  %v1202_v62 = vadd.f32 %v5770_v54, %v4955_v17  ;;  %v4389_v0 = vmul.f32 -1.442695, %v1199_v43  ;;  %6353 = vrcp.f32 %v1344_v61  ;;  %v1346_v22 = vadd.f32 1.0, %v6340_v51  ;;  %v7833_v54 = vld [vmem:[%s8891_s0 + $0x158] sm:$0xff]   ;;  %v7840_v61 = vld [vmem:[%s8891_s0 + $0x150] sm:$0xff]  }
 0x36f   :  { %v4387_v26 = vmul.f32 -1.442695, %v1191_v59  ;;  %v1194_v39 = vadd.f32 %v4951_v18, %v1193_v46  ;;  %v4959_v16 = vunpack.c.h.bf16 %v5395_v34  ;;  %v4966_v34 = vunpack.c.l.bf16 %v7840_v61 }
 0x370   :  { %v4390_v49 = vmul.f32 -1.442695, %v1202_v62  ;;  %6355 = vpow2.f32 %v4389_v0 }
 0x371   :  { %6357 = vrcp.f32 %v1342_v23  ;;  %v4388_v63 = vmul.f32 -1.442695, %v1194_v39 }
 0x372   :  { %v6342_v8 = vpop.eup %6341  ;;  %6359 = vpow2.f32 %v4387_v26  ;;  %v4970_v26 = vunpack.c.l.bf16 %v7833_v54 }
 0x373   :  { %v5773_v53 = vpop.f32.mrb[48].mxu0  ;;  %v6344_v12 = vpop.eup %6343  ;;  %6361 = vpow2.f32 %v4390_v49  ;;  %v1351_v14 = vadd.f32 1.0, %v6342_v8 }
 0x374   :  { %v1206_v38 = vpop.f32.mrb[49].mxu0  ;;  %v6346_v1 = vpop.eup %6345  ;;  %6363 = vrcp.f32 %v1347_v56  ;;  %v1215_v43 = vadd.f32 %v5773_v53, %v4962_v5  ;;  %v1349_v47 = vadd.f32 1.0, %v6344_v12  ;;  %v4978_v5 = vunpack.c.l.bf16 %v5400_v41 }
 0x375   :  { %v5774_v6 = vpop.f32.mrb[50].mxu0  ;;  %v6348_v17 = vpop.eup %6347  ;;  %6365 = vrcp.f32 %v1345_v4  ;;  %v1207_v25 = vadd.f32 %v4958_v11, %v1206_v38  ;;  %v1352_v57 = vadd.f32 1.0, %v6346_v1  ;;  %v4971_v1 = vunpack.c.h.bf16 %v7833_v54  ;;  %v5402_v54 = vld [vmem:[%s8891_s0 + $0x178] sm:$0xff]  }
 0x376   :  { %v1209_v60 = vpop.f32.mrb[51].mxu0  ;;  %6367 = vrcp.f32 %v1348_v10  ;;  %v7835_v55 = vpop.eup %6349  ;;  %v1218_v59 = vadd.f32 %v5774_v6, %v4963_v13  ;;  %v1350_v0 = vadd.f32 1.0, %v6348_v17  ;;  %v4393_v58 = vmul.f32 -1.442695, %v1215_v43  ;;  %v5399_v6 = vld [vmem:[%s8891_s0 + $0x160] sm:$0xff]  }
 0x377   :  { %6369 = vrcp.f32 %v1346_v22  ;;  %v7842_v62 = vpop.eup %6351  ;;  %v1210_v18 = vadd.f32 %v4959_v16, %v1209_v60  ;;  %v4391_v53 = vmul.f32 -1.442695, %v1207_v25  ;;  %v4974_v16 = vunpack.c.l.bf16 %v5399_v6 }
 0x378   :  { %6371 = vpow2.f32 %v4388_v63  ;;  %v7844_v23 = vpop.eup %6353  ;;  %v4394_v39 = vmul.f32 -1.442695, %v1218_v59  ;;  %v4979_v25 = vunpack.c.h.bf16 %v5400_v41 }
 0x379   :  { %6373 = vrcp.f32 %v1351_v14  ;;  %v4392_v4 = vmul.f32 -1.442695, %v1210_v18  ;;  %v4975_v18 = vunpack.c.h.bf16 %v5399_v6 }
 0x37a   :  { %v6356_v49 = vpop.eup %6355  ;;  %6375 = vrcp.f32 %v1349_v47 }
 0x37b   :  { %v5777_v46 = vpop.f32.mrb[52].mxu0  ;;  %v7851_v56 = vpop.eup %6357  ;;  %6377 = vrcp.f32 %v1352_v57  ;;  %v1355_v10 = vadd.f32 1.0, %v6356_v49 }
 0x37c   :  { %v1222_v19 = vpop.f32.mrb[53].mxu0  ;;  %v6360_v38 = vpop.eup %6359  ;;  %6379 = vrcp.f32 %v1350_v0  ;;  %v1231_v11 = vadd.f32 %v5777_v46, %v4970_v26  ;;  %v4967_v46 = vunpack.c.h.bf16 %v7840_v61  ;;  %v5401_v61 = vld [vmem:[%s8891_s0 + $0x170] sm:$0xff]  }
 0x37d   :  { %v5778_v27 = vpop.f32.mrb[54].mxu0  ;;  %v6362_v8 = vpop.eup %6361  ;;  %6381 = vpow2.f32 %v4393_v58  ;;  %v1223_v12 = vadd.f32 %v4966_v34, %v1222_v19  ;;  %v1353_v13 = vadd.f32 1.0, %v6360_v38  ;;  %v4986_v38 = vunpack.c.l.bf16 %v5402_v54 }
 0x37e   :  { %v1225_v51 = vpop.f32.mrb[55].mxu0  ;;  %v7856_v60 = vpop.eup %6363  ;;  %6383 = vpow2.f32 %v4391_v53  ;;  %v1356_v14 = vadd.f32 1.0, %v6362_v8  ;;  %v4397_v59 = vmul.f32 -1.442695, %v1231_v11  ;;  %v1234_v53 = vadd.f32 %v5778_v27, %v4971_v1 }
 0x37f   :  { %v7858_v22 = vpop.eup %6365  ;;  %6385 = vpow2.f32 %v4394_v39  ;;  %v4395_v58 = vmul.f32 -1.442695, %v1223_v12  ;;  %v4982_v27 = vunpack.c.l.bf16 %v5401_v61 }
 0x380   :  { %v7861_v17 = vpop.eup %6367  ;;  %6387 = vpow2.f32 %v4392_v4  ;;  %v4398_v11 = vmul.f32 -1.442695, %v1234_v53 }
 0x381   :  { %v7863_v57 = vpop.eup %6369  ;;  %6389 = vrcp.f32 %v1355_v10 }
 0x382   :  { %v6372_v19 = vpop.eup %6371 }
 0x383   :  { %v5781_v63 = vpop.f32.mrb[56].mxu0  ;;  %v6374_v49 = vpop.eup %6373  ;;  %v1354_v1 = vadd.f32 1.0, %v6372_v19 }
 0x384   :  { %v1247_v43 = vadd.f32 %v5781_v63, %v4978_v5  ;;  %v1238_v47 = vpop.f32.mrb[57].mxu0  ;;  %v6376_v34 = vpop.eup %6375  ;;  %v1226_v5 = vadd.f32 %v4967_v46, %v1225_v51  ;;  %v4983_v46 = vunpack.c.h.bf16 %v5401_v61 }
 0x385   :  { %v5782_v0 = vpop.f32.mrb[58].mxu0  ;;  %v1239_v41 = vadd.f32 %v4974_v16, %v1238_v47  ;;  %v6378_v4 = vpop.eup %6377 }
 0x386   :  { %6391 = vtanh.f32 %v1247_v43  ;;  %v1241_v26 = vpop.f32.mrb[59].mxu0  ;;  %v1250_v39 = vadd.f32 %v5782_v0, %v4979_v25  ;;  %v6380_v8 = vpop.eup %6379  ;;  %v4396_v47 = vmul.f32 -1.442695, %v1226_v5 }
 0x387   :  { %6393 = vrcp.f32 %v1353_v13  ;;  %v1242_v6 = vadd.f32 %v4975_v18, %v1241_v26  ;;  %v6382_v10 = vpop.eup %6381 }
 0x388   :  { %6395 = vrcp.f32 %v1356_v14  ;;  %v6384_v13 = vpop.eup %6383  ;;  %v4987_v14 = vunpack.c.h.bf16 %v5402_v54  ;;  %v1359_v51 = vadd.f32 1.0, %v6382_v10 }
 0x389   :  { %6397 = vpow2.f32 %v4397_v59  ;;  %v6386_v43 = vpop.eup %6385 }
 0x38a   :  { %6399 = vpow2.f32 %v4395_v58  ;;  %v6388_v59 = vpop.eup %6387  ;;  %v1360_v10 = vadd.f32 1.0, %v6386_v43 }
 0x38b   :  { %6401 = vtanh.f32 %v1239_v41  ;;  %v5785_v12 = vpop.f32.mrb[60].mxu0  ;;  %v6390_v18 = vpop.eup %6389  ;;  %v1423_v41 = vmul.f32 %v6374_v49, %v7650_v24  ;;  %v1421_v24 = vmul.f32 %v6376_v34, %v7657_v40 }
 0x38c   :  { %6403 = vtanh.f32 %v1250_v39  ;;  %v1263_v63 = vadd.f32 %v5785_v12, %v4986_v38  ;;  %v1254_v16 = vpop.f32.mrb[61].mxu0  ;;  %v1357_v39 = vadd.f32 1.0, %v6384_v13  ;;  %v1358_v12 = vadd.f32 1.0, %v6388_v59 }
 0x38d   :  { %6405 = vtanh.f32 %v1242_v6  ;;  %v5786_v25 = vpop.f32.mrb[62].mxu0  ;;  %v1255_v58 = vadd.f32 %v4982_v27, %v1254_v16  ;;  %v1424_v13 = vmul.f32 %v6378_v4, %v7662_v3  ;;  %v1427_v40 = vmul.f32 %v6390_v18, %v7669_v15 }
 0x38e   :  { %6407 = vtanh.f32 %v1263_v63  ;;  %v1257_v0 = vpop.f32.mrb[63].mxu0  ;;  %v1266_v53 = vadd.f32 %v5786_v25, %v4987_v14  ;;  %v1422_v14 = vmul.f32 %v6380_v8, %v7666_v7 }
 0x38f   :  { %6409 = vpow2.f32 %v4398_v11  ;;  %v1258_v5 = vadd.f32 %v4983_v46, %v1257_v0 }
 0x390   :  { %v6392_v26 = vpop.eup %6391  ;;  %6411 = vrcp.f32 %v1354_v1 }
 0x391   :  { %v6394_v19 = vpop.eup %6393  ;;  %6413 = vpow2.f32 %v4396_v47  ;;  %v1431_v54 = vmul.f32 %v6392_v26, %v7835_v55 }
 0x392   :  { %v6396_v38 = vpop.eup %6395  ;;  %6415 = vrcp.f32 %v1359_v51 }
 0x393   :  { %v6398_v6 = vpop.eup %6397  ;;  %v7874_v61 = vadd.f32 %v1431_v54, %v1423_v41  ;;  %6417 = vtanh.f32 %v1255_v58  ;;  %v1428_v58 = vmul.f32 %v6396_v38, %v7680_v2 }
 0x394   :  { %v6400_v11 = vpop.eup %6399  ;;  %6419 = vtanh.f32 %v1266_v53  ;;  %v1363_v4 = vadd.f32 1.0, %v6398_v6 }
 0x395   :  { %v6402_v27 = vpop.eup %6401  ;;  %6421 = vrcp.f32 %v1357_v39  ;;  %v1361_v8 = vadd.f32 1.0, %v6400_v11 }
 0x396   :  { %v6404_v1 = vpop.eup %6403  ;;  %v1429_v49 = vmul.f32 %v6402_v27, %v7842_v62  ;;  %6423 = vtanh.f32 %v1258_v5 }
 0x397   :  { %v6406_v55 = vpop.eup %6405  ;;  %6425 = vrcp.f32 %v1360_v10  ;;  %v1432_v63 = vmul.f32 %v6404_v1, %v7844_v23 }
 0x398   :  { %v6408_v16 = vpop.eup %6407  ;;  %6427 = vrcp.f32 %v1358_v12  ;;  %v7881_v43 = vadd.f32 %v1429_v49, %v1421_v24  ;;  %v1430_v47 = vmul.f32 %v6406_v55, %v7851_v56 }
 0x399   :  { %v6410_v25 = vpop.eup %6409  ;;  %6429 = vtanh.f32 %v7874_v61  ;;  %v7886_v62 = vadd.f32 %v1432_v63, %v1424_v13  ;;  %v1435_v3 = vmul.f32 %v6408_v16, %v7856_v60  ;;  %v1425_v60 = vmul.f32 %v6394_v19, %v7676_v9 }
 0x39a   :  { %v6412_v34 = vpop.eup %6411  ;;  %6431 = vtanh.f32 %v7881_v43  ;;  %v7890_v23 = vadd.f32 %v1430_v47, %v1422_v14  ;;  %v1364_v15 = vadd.f32 1.0, %v6410_v25 }
 0x39b   :  { %v6414_v7 = vpop.eup %6413  ;;  %6433 = vtanh.f32 %v7886_v62  ;;  %v7893_v56 = vadd.f32 %v1435_v3, %v1427_v40  ;;  %v1426_v5 = vmul.f32 %v6412_v34, %v7685_v21 }
 0x39c   :  { %v6416_v59 = vpop.eup %6415  ;;  %6435 = vtanh.f32 %v7890_v23  ;;  %v1362_v41 = vadd.f32 1.0, %v6414_v7 }
 0x39d   :  { %v6418_v51 = vpop.eup %6417  ;;  %6437 = vrcp.f32 %v1363_v4 }
 0x39e   :  { %v6420_v46 = vpop.eup %6419  ;;  %v1433_v0 = vmul.f32 %v6418_v51, %v7858_v22  ;;  %6439 = vrcp.f32 %v1361_v8 }
 0x39f   :  { %v6422_v18 = vpop.eup %6421  ;;  %v1436_v26 = vmul.f32 %v6420_v46, %v7861_v17  ;;  %6441 = vrcp.f32 %v1364_v15 }
 0x3a0   :  { %v6424_v53 = vpop.eup %6423  ;;  %v7900_v39 = vadd.f32 %v1433_v0, %v1425_v60  ;;  %6443 = vtanh.f32 %v7893_v56 }
 0x3a1   :  { %v6426_v54 = vpop.eup %6425  ;;  %v7904_v9 = vadd.f32 %v1436_v26, %v1428_v58  ;;  %v1434_v22 = vmul.f32 %v6424_v53, %v7863_v57  ;;  %v5408_v58 = vld [vmem:[%s8891_s0 + $0x1a8] sm:$0xff]  }
 0x3a2   :  { %v6428_v19 = vpop.eup %6427  ;;  %6445 = vtanh.f32 %v7900_v39 }
 0x3a3   :  { %v6430_v2 = vpop.eup %6429  ;;  %6447 = vtanh.f32 %v7904_v9  ;;  %v7909_v17 = vadd.f32 %v1434_v22, %v1426_v5 }
 0x3a4   :  { %v6432_v38 = vpop.eup %6431  ;;  %6449 = vrcp.f32 %v1362_v41  ;;  %v1455_v10 = vmul.f32 %v6430_v2, %v6416_v59  ;;  %v5010_v2 = vunpack.c.l.bf16 %v5408_v58 }
 0x3a5   :  { %v6434_v6 = vpop.eup %6433  ;;  %6451 = vtanh.f32 %v7909_v17  ;;  %v1453_v12 = vmul.f32 %v6432_v38, %v6422_v18 }
 0x3a6   :  { %v6436_v21 = vpop.eup %6435  ;;  %v1456_v11 = vmul.f32 %v6434_v6, %v6426_v54  ;;  %v5407_v54 = vld [vmem:[%s8891_s0 + $0x1a0] sm:$0xff]  }
 0x3a7   :  { %v1454_v27 = vmul.f32 %v6436_v21, %v6428_v19  ;;  %v6438_v1 = vpop.eup %6437  ;;  %v5006_v6 = vunpack.c.l.bf16 %v5407_v54 }
 0x3a8   :  { %v1462_v57 = vpack.c.bf16 %v1456_v11, %v1455_v10  ;;  %v6440_v24 = vpop.eup %6439  ;;  %v5011_v10 = vunpack.c.h.bf16 %v5408_v58 }
 0x3a9   :  { %v1461_v49 = vpack.c.bf16 %v1454_v27, %v1453_v12  ;;  %v6442_v55 = vpop.eup %6441  ;;  %v5007_v27 = vunpack.c.h.bf16 %v5407_v54 }
 0x3aa   :  { %v6444_v13 = vpop.eup %6443 }
 0x3ab   :  { %5787 = vmatprep.subr.bf16.mxu1 %v1461_v49  ;;  %v1459_v47 = vmul.f32 %v6444_v13, %v6438_v1 }
 0x3ac   :  { %v6446_v63 = vpop.eup %6445  ;;  %5788 = vmatpush3.bf16.msra.mxu1 %v1461_v49 }
 0x3ad   :  { %v6448_v16 = vpop.eup %6447  ;;  %5789 = vmatprep.subr.bf16.mxu1 %v1462_v57  ;;  %v1457_v3 = vmul.f32 %v6446_v63, %v6440_v24  ;;  %v5410_v63 = vld [vmem:[%s8891_s0 + $0x1b8] sm:$0xff]  }
 0x3ae   :  { %v6450_v14 = vpop.eup %6449  ;;  %v1460_v25 = vmul.f32 %v6448_v16, %v6442_v55 }
 0x3af   :  { %v6452_v40 = vpop.eup %6451 }
 0x3b0   :  { %5790 = vmatpush3.bf16.msra.mxu1 %v1462_v57  ;;  %v1458_v34 = vmul.f32 %v6452_v40, %v6450_v14  ;;  %v1464_v4 = vpack.c.bf16 %v1460_v25, %v1459_v47  ;;  %v5409_v40 = vld [vmem:[%s8891_s0 + $0x1b0] sm:$0xff]  }
 0x3b2   :  { %v1463_v7 = vpack.c.bf16 %v1458_v34, %v1457_v3  ;;  %v5018_v34 = vunpack.c.l.bf16 %v5410_v63 }
 0x3b4   :  { %5791 = vmatprep.subr.bf16.mxu1 %v1463_v7 }
 0x3b5   :  { %5792 = vmatpush3.bf16.msra.mxu1 %v1463_v7 }
 0x3b6   :  { %5793 = vmatprep.subr.bf16.mxu1 %v1464_v4 }
 0x3b9   :  { %5794 = vmatpush3.bf16.msra.mxu1 %v1464_v4 }
 0x3bc   :  { %5796 = vmatmul.mubr.msk.bf16.vlgmr.msra.gmra.mrb[32].mxu1 %vm215_vm0, %v7691_v31  ;;  %v5404_v31 = vld [vmem:[%s8891_s0 + $0x188] sm:$0xff]  }
 0x3bd   :  { %5799 = vmatprep.mubr.msk.bf16.mxu1 %vm215_vm0, %v7698_v32  ;;  %v5403_v32 = vld [vmem:[%s8891_s0 + $0x180] sm:$0xff]  }
 0x3c4   :  { %5800 = vmatmul.mubr.msk.bf16.gmra.mrb[36].mxu1 %vm215_vm0, %v7705_v28 }
 0x3c5   :  { %5803 = vmatprep.mubr.msk.bf16.mxu1 %vm215_vm0, %v7712_v36  ;;  %v4994_v36 = vunpack.c.l.bf16 %v5404_v31 }
 0x3cc   :  { %5804 = vmatmul.mubr.msk.bf16.gmra.mrb[40].mxu1 %vm215_vm0, %v7719_v50 }
 0x3cd   :  { %5807 = vmatprep.mubr.msk.bf16.mxu1 %vm215_vm0, %v7726_v37  ;;  %v4990_v37 = vunpack.c.l.bf16 %v5403_v32 }
 0x3d4   :  { %5808 = vmatmul.mubr.msk.bf16.gmra.mrb[44].mxu1 %vm215_vm0, %v7733_v20 }
 0x3d5   :  { %5811 = vmatprep.mubr.msk.bf16.mxu1 %vm215_vm0, %v7740_v33  ;;  %v4995_v33 = vunpack.c.h.bf16 %v5404_v31 }
 0x3dc   :  { %5812 = vmatmul.mubr.msk.bf16.gmra.mrb[48].mxu1 %vm215_vm0, %v7747_v30 }
 0x3dd   :  { %5815 = vmatprep.mubr.msk.bf16.mxu1 %vm215_vm0, %v7754_v29 }
 0x3e4   :  { %5816 = vmatmul.mubr.msk.bf16.gmra.mrb[52].mxu1 %vm215_vm0, %v7761_v44  ;;  %v4991_v44 = vunpack.c.h.bf16 %v5403_v32  ;;  %v5014_v32 = vunpack.c.l.bf16 %v5409_v40 }
 0x3e5   :  { %5819 = vmatprep.mubr.msk.bf16.mxu1 %vm215_vm0, %v7768_v48  ;;  %v5406_v48 = vld [vmem:[%s8891_s0 + $0x198] sm:$0xff]  }
 0x3e6   :  { %v5003_v0 = vunpack.c.h.bf16 %v5406_v48 }
 0x3ec   :  { %5820 = vmatmul.mubr.msk.bf16.gmra.mrb[56].mxu1 %vm215_vm0, %v7775_v35 }
 0x3ed   :  { %5823 = vmatprep.mubr.msk.bf16.mxu1 %vm215_vm0, %v7782_v42  ;;  %v5405_v42 = vld [vmem:[%s8891_s0 + $0x190] sm:$0xff]  }
 0x3ee   :  { %v4998_v51 = vunpack.c.l.bf16 %v5405_v42  ;;  %v4999_v53 = vunpack.c.h.bf16 %v5405_v42 }
 0x3f4   :  { %5824 = vmatmul.mubr.msk.bf16.gmra.mrb[60].mxu1 %vm215_vm0, %v7789_v45 }
 0x3f5   :  { %5875 = vmatprep.mubr.msk.bf16.mxu1 %vm215_vm0, %v7796_v52  ;;  %v5002_v52 = vunpack.c.l.bf16 %v5406_v48 }
 0x48f   :  { %v5797_v28 = vpop.f32.mrb[32].mxu1 }
 0x490   :  { %v1564_v50 = vpop.f32.mrb[33].mxu1  ;;  %v1573_v29 = vadd.f32 %v5797_v28, %v4994_v36 }
 0x491   :  { %v5798_v20 = vpop.f32.mrb[34].mxu1  ;;  %v1565_v35 = vadd.f32 %v4990_v37, %v1564_v50  ;;  %v5019_v37 = vunpack.c.h.bf16 %v5410_v63 }
 0x492   :  { %v1567_v30 = vpop.f32.mrb[35].mxu1  ;;  %v1576_v45 = vadd.f32 %v5798_v20, %v4995_v33  ;;  %v4449_v59 = vmul.f32 -1.442695, %v1573_v29 }
 0x493   :  { %v1568_v15 = vadd.f32 %v4991_v44, %v1567_v30  ;;  %v4447_v60 = vmul.f32 -1.442695, %v1565_v35 }
 0x494   :  { %v4450_v26 = vmul.f32 -1.442695, %v1576_v45  ;;  %6453 = vpow2.f32 %v4449_v59 }
 0x495   :  { %v4448_v22 = vmul.f32 -1.442695, %v1568_v15  ;;  %6455 = vpow2.f32 %v4447_v60  ;;  %v5015_v15 = vunpack.c.h.bf16 %v5409_v40 }
 0x496   :  { %6457 = vpow2.f32 %v4450_v26 }
 0x497   :  { %v5801_v8 = vpop.f32.mrb[36].mxu1  ;;  %6459 = vpow2.f32 %v4448_v22 }
 0x498   :  { %v1580_v46 = vpop.f32.mrb[37].mxu1  ;;  %v1589_v5 = vadd.f32 %v5801_v8, %v5002_v52 }
 0x499   :  { %v5802_v18 = vpop.f32.mrb[38].mxu1  ;;  %v1581_v19 = vadd.f32 %v4998_v51, %v1580_v46 }
 0x49a   :  { %v1583_v41 = vpop.f32.mrb[39].mxu1  ;;  %v1592_v38 = vadd.f32 %v5802_v18, %v5003_v0  ;;  %v4453_v11 = vmul.f32 -1.442695, %v1589_v5  ;;  %v5412_v18 = vld [vmem:[%s8891_s0 + $0x1c8] sm:$0xff]  }
 0x49b   :  { %v1584_v21 = vadd.f32 %v4999_v53, %v1583_v41  ;;  %v4451_v1 = vmul.f32 -1.442695, %v1581_v19  ;;  %v5411_v41 = vld [vmem:[%s8891_s0 + $0x1c0] sm:$0xff]  }
 0x49c   :  { %v4454_v49 = vmul.f32 -1.442695, %v1592_v38  ;;  %6461 = vpow2.f32 %v4453_v11  ;;  %v5026_v38 = vunpack.c.l.bf16 %v5412_v18  ;;  %v5022_v11 = vunpack.c.l.bf16 %v5411_v41 }
 0x49d   :  { %v4452_v16 = vmul.f32 -1.442695, %v1584_v21  ;;  %6463 = vpow2.f32 %v4451_v1 }
 0x49e   :  { %6465 = vpow2.f32 %v4454_v49  ;;  %v6454_v7 = vpop.eup %6453 }
 0x49f   :  { %v5805_v12 = vpop.f32.mrb[40].mxu1  ;;  %6467 = vpow2.f32 %v4452_v16  ;;  %v6456_v28 = vpop.eup %6455  ;;  %v1765_v29 = vadd.f32 1.0, %v6454_v7  ;;  %v7984_v7 = vld [vmem:[%s8891_s0 + $0x1d0] sm:$0xff]  }
 0x4a0   :  { %v1605_v57 = vadd.f32 %v5805_v12, %v5010_v2  ;;  %v1596_v24 = vpop.f32.mrb[41].mxu1  ;;  %v6458_v20 = vpop.eup %6457  ;;  %v1763_v35 = vadd.f32 1.0, %v6456_v28 }
 0x4a1   :  { %v1597_v55 = vadd.f32 %v5006_v6, %v1596_v24  ;;  %v5806_v13 = vpop.f32.mrb[42].mxu1  ;;  %v6460_v48 = vpop.eup %6459  ;;  %v1766_v52 = vadd.f32 1.0, %v6458_v20 }
 0x4a2   :  { %v1608_v14 = vadd.f32 %v5806_v13, %v5011_v10  ;;  %v1599_v47 = vpop.f32.mrb[43].mxu1  ;;  %v4457_v3 = vmul.f32 -1.442695, %v1605_v57  ;;  %v1764_v46 = vadd.f32 1.0, %v6460_v48  ;;  %v5027_v57 = vunpack.c.h.bf16 %v5412_v18 }
 0x4a3   :  { %v1600_v25 = vadd.f32 %v5007_v27, %v1599_v47  ;;  %v4455_v4 = vmul.f32 -1.442695, %v1597_v55  ;;  %v5023_v55 = vunpack.c.h.bf16 %v5411_v41  ;;  %v5030_v48 = vunpack.c.l.bf16 %v7984_v7 }
 0x4a4   :  { %v4458_v31 = vmul.f32 -1.442695, %v1608_v14  ;;  %6469 = vpow2.f32 %v4457_v3 }
 0x4a5   :  { %v4456_v36 = vmul.f32 -1.442695, %v1600_v25  ;;  %6471 = vpow2.f32 %v4455_v4  ;;  %v7977_v25 = vld [vmem:[%s8891_s0 + $0x1d8] sm:$0xff]  }
 0x4a6   :  { %6473 = vpow2.f32 %v4458_v31  ;;  %v6462_v51 = vpop.eup %6461  ;;  %v5034_v20 = vunpack.c.l.bf16 %v7977_v25 }
 0x4a7   :  { %v5809_v50 = vpop.f32.mrb[44].mxu1  ;;  %6475 = vpow2.f32 %v4456_v36  ;;  %v6464_v60 = vpop.eup %6463  ;;  %v1769_v5 = vadd.f32 1.0, %v6462_v51 }
 0x4a8   :  { %v1621_v33 = vadd.f32 %v5809_v50, %v5018_v34  ;;  %v1612_v30 = vpop.f32.mrb[45].mxu1  ;;  %6477 = vrcp.f32 %v1765_v29  ;;  %v6466_v58 = vpop.eup %6465  ;;  %v1767_v2 = vadd.f32 1.0, %v6464_v60 }
 0x4a9   :  { %v5810_v44 = vpop.f32.mrb[46].mxu1  ;;  %v1613_v42 = vadd.f32 %v5014_v32, %v1612_v30  ;;  %6479 = vrcp.f32 %v1763_v35  ;;  %v6468_v54 = vpop.eup %6467  ;;  %v1770_v10 = vadd.f32 1.0, %v6466_v58  ;;  %v5416_v30 = vld [vmem:[%s8891_s0 + $0x1e8] sm:$0xff]  }
 0x4aa   :  { %v1615_v45 = vpop.f32.mrb[47].mxu1  ;;  %v1624_v8 = vadd.f32 %v5810_v44, %v5019_v37  ;;  %v4461_v59 = vmul.f32 -1.442695, %v1621_v33  ;;  %6481 = vrcp.f32 %v1766_v52  ;;  %v1768_v1 = vadd.f32 1.0, %v6468_v54 }
 0x4ab   :  { %v4459_v0 = vmul.f32 -1.442695, %v1613_v42  ;;  %v1616_v22 = vadd.f32 %v5015_v15, %v1615_v45  ;;  %v5415_v15 = vld [vmem:[%s8891_s0 + $0x1e0] sm:$0xff]  }
 0x4ac   :  { %v4462_v26 = vmul.f32 -1.442695, %v1624_v8  ;;  %6483 = vpow2.f32 %v4461_v59  ;;  %v5042_v59 = vunpack.c.l.bf16 %v5416_v30  ;;  %v5038_v54 = vunpack.c.l.bf16 %v5415_v15 }
 0x4ad   :  { %6485 = vrcp.f32 %v1764_v46  ;;  %v4460_v49 = vmul.f32 -1.442695, %v1616_v22 }
 0x4ae   :  { %v6470_v21 = vpop.eup %6469  ;;  %6487 = vpow2.f32 %v4459_v0 }
 0x4af   :  { %v5813_v53 = vpop.f32.mrb[48].mxu1  ;;  %v6472_v27 = vpop.eup %6471  ;;  %6489 = vpow2.f32 %v4462_v26  ;;  %v1773_v63 = vadd.f32 1.0, %v6470_v21 }
 0x4b0   :  { %v1628_v19 = vpop.f32.mrb[49].mxu1  ;;  %v6474_v24 = vpop.eup %6473  ;;  %6491 = vrcp.f32 %v1769_v5  ;;  %v1637_v16 = vadd.f32 %v5813_v53, %v5026_v38  ;;  %v1771_v14 = vadd.f32 1.0, %v6472_v27  ;;  %v5035_v53 = vunpack.c.h.bf16 %v7977_v25  ;;  %v5418_v27 = vld [vmem:[%s8891_s0 + $0x1f8] sm:$0xff]  }
 0x4b1   :  { %v5814_v6 = vpop.f32.mrb[50].mxu1  ;;  %v6476_v13 = vpop.eup %6475  ;;  %6493 = vrcp.f32 %v1767_v2  ;;  %v1629_v47 = vadd.f32 %v5022_v11, %v1628_v19  ;;  %v1774_v3 = vadd.f32 1.0, %v6474_v24  ;;  %v5043_v38 = vunpack.c.h.bf16 %v5416_v30 }
 0x4b2   :  { %v1631_v12 = vpop.f32.mrb[51].mxu1  ;;  %6495 = vrcp.f32 %v1770_v10  ;;  %v7979_v40 = vpop.eup %6477  ;;  %v1640_v34 = vadd.f32 %v5814_v6, %v5027_v57  ;;  %v1772_v32 = vadd.f32 1.0, %v6476_v13  ;;  %v4465_v37 = vmul.f32 -1.442695, %v1637_v16 }
 0x4b3   :  { %6497 = vrcp.f32 %v1768_v1  ;;  %v7986_v31 = vpop.eup %6479  ;;  %v1632_v28 = vadd.f32 %v5023_v55, %v1631_v12  ;;  %v4463_v44 = vmul.f32 -1.442695, %v1629_v47  ;;  %v5031_v10 = vunpack.c.h.bf16 %v7984_v7  ;;  %v5417_v47 = vld [vmem:[%s8891_s0 + $0x1f0] sm:$0xff]  }
 0x4b4   :  { %6499 = vpow2.f32 %v4460_v49  ;;  %v7988_v50 = vpop.eup %6481  ;;  %v4466_v45 = vmul.f32 -1.442695, %v1640_v34  ;;  %v5039_v12 = vunpack.c.h.bf16 %v5415_v15 }
 0x4b5   :  { %6501 = vrcp.f32 %v1773_v63  ;;  %v4464_v8 = vmul.f32 -1.442695, %v1632_v28 }
 0x4b6   :  { %v6484_v29 = vpop.eup %6483  ;;  %6503 = vrcp.f32 %v1771_v14  ;;  %v5050_v14 = vunpack.c.l.bf16 %v5418_v27 }
 0x4b7   :  { %v5817_v4 = vpop.f32.mrb[52].mxu1  ;;  %v7995_v42 = vpop.eup %6485  ;;  %6505 = vrcp.f32 %v1774_v3  ;;  %v1777_v46 = vadd.f32 1.0, %v6484_v29  ;;  %v5051_v29 = vunpack.c.h.bf16 %v5418_v27 }
 0x4b8   :  { %v1644_v36 = vpop.f32.mrb[53].mxu1  ;;  %v6488_v52 = vpop.eup %6487  ;;  %6507 = vrcp.f32 %v1772_v32  ;;  %v1653_v60 = vadd.f32 %v5817_v4, %v5034_v20 }
 0x4b9   :  { %v5818_v33 = vpop.f32.mrb[54].mxu1  ;;  %v6490_v51 = vpop.eup %6489  ;;  %6509 = vpow2.f32 %v4465_v37  ;;  %v1645_v18 = vadd.f32 %v5030_v48, %v1644_v36  ;;  %v1775_v26 = vadd.f32 1.0, %v6488_v52  ;;  %v5046_v36 = vunpack.c.l.bf16 %v5417_v47 }
 0x4ba   :  { %v1647_v35 = vpop.f32.mrb[55].mxu1  ;;  %v8000_v0 = vpop.eup %6491  ;;  %6511 = vpow2.f32 %v4463_v44  ;;  %v1778_v22 = vadd.f32 1.0, %v6490_v51  ;;  %v4469_v21 = vmul.f32 -1.442695, %v1653_v60  ;;  %v1656_v55 = vadd.f32 %v5818_v33, %v5035_v53 }
 0x4bb   :  { %v8002_v58 = vpop.eup %6493  ;;  %6513 = vpow2.f32 %v4466_v45  ;;  %v4467_v57 = vmul.f32 -1.442695, %v1645_v18  ;;  %v1648_v3 = vadd.f32 %v5031_v10, %v1647_v35 }
 0x4bc   :  { %v8005_v5 = vpop.eup %6495  ;;  %6515 = vpow2.f32 %v4464_v8  ;;  %v4470_v32 = vmul.f32 -1.442695, %v1656_v55  ;;  %v5047_v8 = vunpack.c.h.bf16 %v5417_v47 }
 0x4bd   :  { %v8007_v6 = vpop.eup %6497  ;;  %6517 = vrcp.f32 %v1777_v46  ;;  %v4468_v48 = vmul.f32 -1.442695, %v1648_v3 }
 0x4be   :  { %v6500_v1 = vpop.eup %6499 }
 0x4bf   :  { %v5821_v41 = vpop.f32.mrb[56].mxu1  ;;  %v6502_v49 = vpop.eup %6501  ;;  %v1776_v20 = vadd.f32 1.0, %v6500_v1 }
 0x4c0   :  { %v1669_v19 = vadd.f32 %v5821_v41, %v5042_v59  ;;  %v1660_v2 = vpop.f32.mrb[57].mxu1  ;;  %v6504_v63 = vpop.eup %6503 }
 0x4c1   :  { %v5822_v11 = vpop.f32.mrb[58].mxu1  ;;  %v1661_v13 = vadd.f32 %v5038_v54, %v1660_v2  ;;  %v6506_v25 = vpop.eup %6505 }
 0x4c2   :  { %6519 = vtanh.f32 %v1669_v19  ;;  %v1663_v24 = vpop.f32.mrb[59].mxu1  ;;  %v1672_v16 = vadd.f32 %v5822_v11, %v5043_v38  ;;  %v6508_v4 = vpop.eup %6507  ;;  %v1846_v1 = vmul.f32 %v6506_v25, %v7886_v62 }
 0x4c3   :  { %6521 = vrcp.f32 %v1775_v26  ;;  %v1664_v34 = vadd.f32 %v5039_v12, %v1663_v24  ;;  %v6510_v7 = vpop.eup %6509  ;;  %v1845_v26 = vmul.f32 %v6502_v49, %v7874_v61  ;;  %v1843_v61 = vmul.f32 %v6504_v63, %v7881_v43 }
 0x4c4   :  { %6523 = vrcp.f32 %v1778_v22  ;;  %v6512_v37 = vpop.eup %6511  ;;  %v1781_v35 = vadd.f32 1.0, %v6510_v7  ;;  %v1844_v49 = vmul.f32 %v6508_v4, %v7890_v23 }
 0x4c5   :  { %6525 = vpow2.f32 %v4469_v21  ;;  %v6514_v44 = vpop.eup %6513  ;;  %v1779_v53 = vadd.f32 1.0, %v6512_v37 }
 0x4c6   :  { %6527 = vpow2.f32 %v4467_v57  ;;  %v6516_v52 = vpop.eup %6515  ;;  %v1782_v2 = vadd.f32 1.0, %v6514_v44 }
 0x4c7   :  { %6529 = vtanh.f32 %v1661_v13  ;;  %v5825_v28 = vpop.f32.mrb[60].mxu1  ;;  %v6518_v15 = vpop.eup %6517  ;;  %v1780_v10 = vadd.f32 1.0, %v6516_v52 }
 0x4c8   :  { %6531 = vtanh.f32 %v1672_v16  ;;  %v1685_v33 = vadd.f32 %v5825_v28, %v5050_v14  ;;  %v1676_v30 = vpop.f32.mrb[61].mxu1  ;;  %v1849_v43 = vmul.f32 %v6518_v15, %v7893_v56 }
 0x4c9   :  { %6533 = vtanh.f32 %v1664_v34  ;;  %v5826_v45 = vpop.f32.mrb[62].mxu1  ;;  %v1677_v51 = vadd.f32 %v5046_v36, %v1676_v30 }
 0x4ca   :  { %6535 = vtanh.f32 %v1685_v33  ;;  %v1679_v59 = vpop.f32.mrb[63].mxu1  ;;  %v1688_v60 = vadd.f32 %v5826_v45, %v5051_v29 }
 0x4cb   :  { %6537 = vpow2.f32 %v4470_v32  ;;  %v1680_v22 = vadd.f32 %v5047_v8, %v1679_v59 }
 0x4cc   :  { %v6520_v46 = vpop.eup %6519  ;;  %6539 = vrcp.f32 %v1776_v20 }
 0x4cd   :  { %v6522_v18 = vpop.eup %6521  ;;  %6541 = vpow2.f32 %v4468_v48  ;;  %v1853_v41 = vmul.f32 %v6520_v46, %v7979_v40 }
 0x4ce   :  { %v6524_v54 = vpop.eup %6523  ;;  %6543 = vrcp.f32 %v1781_v35 }
 0x4cf   :  { %v6526_v19 = vpop.eup %6525  ;;  %v8018_v38 = vadd.f32 %v1853_v41, %v1845_v26  ;;  %6545 = vtanh.f32 %v1677_v51  ;;  %v1850_v32 = vmul.f32 %v6524_v54, %v7904_v9 }
 0x4d0   :  { %v6528_v21 = vpop.eup %6527  ;;  %6547 = vtanh.f32 %v1688_v60  ;;  %v1785_v14 = vadd.f32 1.0, %v6526_v19 }
 0x4d1   :  { %v6530_v11 = vpop.eup %6529  ;;  %6549 = vrcp.f32 %v1779_v53  ;;  %v1783_v47 = vadd.f32 1.0, %v6528_v21 }
 0x4d2   :  { %v6532_v12 = vpop.eup %6531  ;;  %v1851_v27 = vmul.f32 %v6530_v11, %v7986_v31  ;;  %6551 = vtanh.f32 %v1680_v22  ;;  %v8059_v11 = vld [vmem:[%s8893_s2 + $0x8] sm:$0xff]  }
 0x4d3   :  { %v6534_v40 = vpop.eup %6533  ;;  %6553 = vrcp.f32 %v1782_v2  ;;  %v1854_v57 = vmul.f32 %v6532_v12, %v7988_v50  ;;  %v8066_v12 = vld [vmem:[%s8893_s2 + $0x10] sm:$0xff]  }
 0x4d4   :  { %v6536_v24 = vpop.eup %6535  ;;  %6555 = vrcp.f32 %v1780_v10  ;;  %v8025_v55 = vadd.f32 %v1851_v27, %v1843_v61  ;;  %v1852_v13 = vmul.f32 %v6534_v40, %v7995_v42  ;;  %v8073_v61 = vld [vmem:[%s8893_s2 + $0x18] sm:$0xff]   ;;  %v8080_v27 = vld [vmem:[%s8893_s2 + $0x20] sm:$0xff]   ;;  %v8087_v40 = vld [vmem:[%s8893_s2 + $0x28] sm:$0xff]  }
 0x4d5   :  { %v6538_v16 = vpop.eup %6537  ;;  %6557 = vtanh.f32 %v8018_v38  ;;  %v8030_v31 = vadd.f32 %v1854_v57, %v1846_v1  ;;  %v1857_v62 = vmul.f32 %v6536_v24, %v8000_v0  ;;  %v1847_v0 = vmul.f32 %v6522_v18, %v7900_v39  ;;  %v8094_v1 = vld [vmem:[%s8893_s2 + $0x30] sm:$0xff]   ;;  %v8101_v57 = vld [vmem:[%s8893_s2 + $0x38] sm:$0xff]   ;;  %v8108_v24 = vld [vmem:[%s8893_s2 + $0x40] sm:$0xff]  }
 0x4d6   :  { %v6540_v63 = vpop.eup %6539  ;;  %6559 = vtanh.f32 %v8025_v55  ;;  %v8034_v50 = vadd.f32 %v1852_v13, %v1844_v49  ;;  %v1786_v56 = vadd.f32 1.0, %v6538_v16  ;;  %v8115_v49 = vld [vmem:[%s8893_s2 + $0x48] sm:$0xff]   ;;  %v8122_v13 = vld [vmem:[%s8893_s2 + $0x50] sm:$0xff]   ;;  %v8129_v16 = vld [vmem:[%s8893_s2 + $0x58] sm:$0xff]  }
 0x4d7   :  { %v6542_v23 = vpop.eup %6541  ;;  %6561 = vtanh.f32 %v8030_v31  ;;  %v8037_v42 = vadd.f32 %v1857_v62, %v1849_v43  ;;  %v1848_v30 = vmul.f32 %v6540_v63, %v7909_v17  ;;  %v8136_v43 = vld [vmem:[%s8893_s2 + $0x60] sm:$0xff]   ;;  %v8143_v62 = vld [vmem:[%s8893_s2 + $0x68] sm:$0xff]   ;;  %v8150_v63 = vld [vmem:[%s8893_s2 + $0x70] sm:$0xff]  }
 0x4d8   :  { %v6544_v25 = vpop.eup %6543  ;;  %6563 = vtanh.f32 %v8034_v50  ;;  %v1784_v37 = vadd.f32 1.0, %v6542_v23  ;;  %v8164_v23 = vld [vmem:[%s8893_s2] sm:$0xff]  }
 0x4d9   :  { %v6546_v3 = vpop.eup %6545  ;;  %6565 = vrcp.f32 %v1785_v14  ;;  %v8157_v14 = vld [vmem:[%s8893_s2 + $0x78] sm:$0xff]  }
 0x4da   :  { %v6548_v34 = vpop.eup %6547  ;;  %v1855_v4 = vmul.f32 %v6546_v3, %v8002_v58  ;;  %6567 = vrcp.f32 %v1783_v47  ;;  %v5420_v47 = vld [vmem:[%s8891_s0 + $0x208] sm:$0xff]  }
 0x4db   :  { %v6550_v7 = vpop.eup %6549  ;;  %v1858_v28 = vmul.f32 %v6548_v34, %v8005_v5  ;;  %6569 = vrcp.f32 %v1786_v56  ;;  %v5058_v3 = vunpack.c.l.bf16 %v5420_v47 }
 0x4dc   :  { %v6552_v36 = vpop.eup %6551  ;;  %v8044_v20 = vadd.f32 %v1855_v4, %v1847_v0  ;;  %6571 = vtanh.f32 %v8037_v42 }
 0x4dd   :  { %v6554_v33 = vpop.eup %6553  ;;  %v8048_v39 = vadd.f32 %v1858_v28, %v1850_v32  ;;  %v1856_v58 = vmul.f32 %v6552_v36, %v8007_v6 }
 0x4de   :  { %v6556_v29 = vpop.eup %6555  ;;  %6573 = vtanh.f32 %v8044_v20 }
 0x4df   :  { %v6558_v9 = vpop.eup %6557  ;;  %6575 = vtanh.f32 %v8048_v39  ;;  %v8053_v5 = vadd.f32 %v1856_v58, %v1848_v30  ;;  %v5421_v30 = vld [vmem:[%s8891_s0 + $0x210] sm:$0xff]  }
 0x4e0   :  { %v6560_v44 = vpop.eup %6559  ;;  %6577 = vrcp.f32 %v1784_v37  ;;  %v1877_v45 = vmul.f32 %v6558_v9, %v6544_v25  ;;  %v5419_v25 = vld [vmem:[%s8891_s0 + $0x200] sm:$0xff]   ;;  %v5422_v37 = vld [vmem:[%s8891_s0 + $0x218] sm:$0xff]  }
 0x4e1   :  { %v6562_v48 = vpop.eup %6561  ;;  %6579 = vtanh.f32 %v8053_v5  ;;  %v1875_v35 = vmul.f32 %v6560_v44, %v6550_v7  ;;  %v5054_v0 = vunpack.c.l.bf16 %v5419_v25  ;;  %v5059_v7 = vunpack.c.h.bf16 %v5420_v47 }
 0x4e2   :  { %v6564_v17 = vpop.eup %6563  ;;  %v1878_v52 = vmul.f32 %v6562_v48, %v6554_v33  ;;  %v5055_v36 = vunpack.c.h.bf16 %v5419_v25 }
 0x4e3   :  { %v1876_v8 = vmul.f32 %v6564_v17, %v6556_v29  ;;  %v6566_v59 = vpop.eup %6565  ;;  %v5066_v29 = vunpack.c.l.bf16 %v5422_v37  ;;  %v5062_v17 = vunpack.c.l.bf16 %v5421_v30 }
 0x4e4   :  { %v1884_v6 = vpack.c.bf16 %v1878_v52, %v1877_v45  ;;  %v6568_v15 = vpop.eup %6567 }
 0x4e5   :  { %v1883_v51 = vpack.c.bf16 %v1876_v8, %v1875_v35  ;;  %v6570_v46 = vpop.eup %6569  ;;  %v5067_v35 = vunpack.c.h.bf16 %v5422_v37  ;;  %v5425_v37 = vld [vmem:[%s8891_s0 + $0x230] sm:$0xff]  }
 0x4e6   :  { %v6572_v60 = vpop.eup %6571 }
 0x4e7   :  { %5827 = vmatprep.subr.bf16.mxu0 %v1883_v51  ;;  %v1881_v41 = vmul.f32 %v6572_v60, %v6566_v59  ;;  %v5424_v59 = vld [vmem:[%s8891_s0 + $0x228] sm:$0xff]  }
 0x4e8   :  { %v6574_v18 = vpop.eup %6573  ;;  %5828 = vmatpush3.bf16.msra.mxu0 %v1883_v51 }
 0x4e9   :  { %v6576_v26 = vpop.eup %6575  ;;  %5829 = vmatprep.subr.bf16.mxu0 %v1884_v6  ;;  %v1879_v19 = vmul.f32 %v6574_v18, %v6568_v15  ;;  %v5063_v15 = vunpack.c.h.bf16 %v5421_v30 }
 0x4ea   :  { %v6578_v53 = vpop.eup %6577  ;;  %v1882_v54 = vmul.f32 %v6576_v26, %v6570_v46  ;;  %v5423_v46 = vld [vmem:[%s8891_s0 + $0x220] sm:$0xff]  }
 0x4eb   :  { %v6580_v22 = vpop.eup %6579 }
 0x4ec   :  { %5830 = vmatpush3.bf16.msra.mxu0 %v1884_v6  ;;  %v1880_v2 = vmul.f32 %v6580_v22, %v6578_v53  ;;  %v1886_v21 = vpack.c.bf16 %v1882_v54, %v1881_v41  ;;  %v5074_v53 = vunpack.c.l.bf16 %v5424_v59  ;;  %v5070_v54 = vunpack.c.l.bf16 %v5423_v46 }
 0x4ee   :  { %v1885_v10 = vpack.c.bf16 %v1880_v2, %v1879_v19  ;;  %v5075_v19 = vunpack.c.h.bf16 %v5424_v59 }
 0x4f0   :  { %5831 = vmatprep.subr.bf16.mxu0 %v1885_v10 }
 0x4f1   :  { %5832 = vmatpush3.bf16.msra.mxu0 %v1885_v10  ;;  %v5071_v10 = vunpack.c.h.bf16 %v5423_v46 }
 0x4f2   :  { %5833 = vmatprep.subr.bf16.mxu0 %v1886_v21 }
 0x4f5   :  { %5834 = vmatpush3.bf16.msra.mxu0 %v1886_v21 }
 0x4f8   :  { %5836 = vmatmul.mubr.msk.bf16.vlgmr.msra.gmra.mrb[64].mxu0 %vm215_vm0, %v8059_v11 }
 0x4f9   :  { %5839 = vmatprep.mubr.msk.bf16.mxu0 %vm215_vm0, %v8066_v12 }
 0x500   :  { %5840 = vmatmul.mubr.msk.bf16.gmra.mrb[68].mxu0 %vm215_vm0, %v8073_v61 }
 0x501   :  { %5843 = vmatprep.mubr.msk.bf16.mxu0 %vm215_vm0, %v8080_v27 }
 0x508   :  { %5844 = vmatmul.mubr.msk.bf16.gmra.mrb[72].mxu0 %vm215_vm0, %v8087_v40 }
 0x509   :  { %5847 = vmatprep.mubr.msk.bf16.mxu0 %vm215_vm0, %v8094_v1 }
 0x510   :  { %5848 = vmatmul.mubr.msk.bf16.gmra.mrb[76].mxu0 %vm215_vm0, %v8101_v57 }
 0x511   :  { %5851 = vmatprep.mubr.msk.bf16.mxu0 %vm215_vm0, %v8108_v24 }
 0x518   :  { %5852 = vmatmul.mubr.msk.bf16.gmra.mrb[80].mxu0 %vm215_vm0, %v8115_v49 }
 0x519   :  { %5855 = vmatprep.mubr.msk.bf16.mxu0 %vm215_vm0, %v8122_v13 }
 0x520   :  { %5856 = vmatmul.mubr.msk.bf16.gmra.mrb[84].mxu0 %vm215_vm0, %v8129_v16 }
 0x521   :  { %5859 = vmatprep.mubr.msk.bf16.mxu0 %vm215_vm0, %v8136_v43 }
 0x528   :  { %5860 = vmatmul.mubr.msk.bf16.gmra.mrb[88].mxu0 %vm215_vm0, %v8143_v62 }
 0x529   :  { %5863 = vmatprep.mubr.msk.bf16.mxu0 %vm215_vm0, %v8150_v63 }
 0x530   :  { %5864 = vmatmul.mubr.msk.bf16.gmra.mrb[92].mxu0 %vm215_vm0, %v8157_v14 }
 0x531   :  { %5915 = vmatprep.mubr.msk.bf16.mxu0 %vm215_vm0, %v8164_v23 }
 0x5cb   :  { %v5837_v56 = vpop.f32.mrb[64].mxu0 }
 0x5cc   :  { %v1986_v34 = vpop.f32.mrb[65].mxu0  ;;  %v1995_v28 = vadd.f32 %v5837_v56, %v5058_v3 }
 0x5cd   :  { %v5838_v4 = vpop.f32.mrb[66].mxu0  ;;  %v1987_v33 = vadd.f32 %v5054_v0, %v1986_v34 }
 0x5ce   :  { %v1989_v32 = vpop.f32.mrb[67].mxu0  ;;  %v1998_v58 = vadd.f32 %v5838_v4, %v5059_v7  ;;  %v4521_v44 = vmul.f32 -1.442695, %v1995_v28  ;;  %v5426_v4 = vld [vmem:[%s8891_s0 + $0x238] sm:$0xff]  }
 0x5cf   :  { %v1990_v48 = vadd.f32 %v5055_v36, %v1989_v32  ;;  %v4519_v52 = vmul.f32 -1.442695, %v1987_v33  ;;  %v5082_v30 = vunpack.c.l.bf16 %v5426_v4 }
 0x5d0   :  { %v4522_v6 = vmul.f32 -1.442695, %v1998_v58  ;;  %6581 = vpow2.f32 %v4521_v44  ;;  %v5078_v44 = vunpack.c.l.bf16 %v5425_v37 }
 0x5d1   :  { %v4520_v18 = vmul.f32 -1.442695, %v1990_v48  ;;  %6583 = vpow2.f32 %v4519_v52  ;;  %v5083_v52 = vunpack.c.h.bf16 %v5426_v4 }
 0x5d2   :  { %6585 = vpow2.f32 %v4522_v6 }
 0x5d3   :  { %v5841_v9 = vpop.f32.mrb[68].mxu0  ;;  %6587 = vpow2.f32 %v4520_v18 }
 0x5d4   :  { %v2002_v45 = vpop.f32.mrb[69].mxu0  ;;  %v2011_v60 = vadd.f32 %v5841_v9, %v5066_v29 }
 0x5d5   :  { %v5842_v8 = vpop.f32.mrb[70].mxu0  ;;  %v2003_v26 = vadd.f32 %v5062_v17, %v2002_v45 }
 0x5d6   :  { %v2005_v51 = vpop.f32.mrb[71].mxu0  ;;  %v2014_v41 = vadd.f32 %v5842_v8, %v5067_v35  ;;  %v4525_v2 = vmul.f32 -1.442695, %v2011_v60 }
 0x5d7   :  { %v2006_v22 = vadd.f32 %v5063_v15, %v2005_v51  ;;  %v4523_v47 = vmul.f32 -1.442695, %v2003_v26 }
 0x5d8   :  { %v4526_v3 = vmul.f32 -1.442695, %v2014_v41  ;;  %6589 = vpow2.f32 %v4525_v2 }
 0x5d9   :  { %v4524_v7 = vmul.f32 -1.442695, %v2006_v22  ;;  %6591 = vpow2.f32 %v4523_v47 }
 0x5da   :  { %6593 = vpow2.f32 %v4526_v3  ;;  %v6582_v29 = vpop.eup %6581  ;;  %v5427_v3 = vld [vmem:[%s8891_s0 + $0x240] sm:$0xff]  }
 0x5db   :  { %v5845_v21 = vpop.f32.mrb[72].mxu0  ;;  %6595 = vpow2.f32 %v4524_v7  ;;  %v6584_v48 = vpop.eup %6583  ;;  %v2187_v6 = vadd.f32 1.0, %v6582_v29 }
 0x5dc   :  { %v2027_v25 = vadd.f32 %v5845_v21, %v5074_v53  ;;  %v2018_v56 = vpop.f32.mrb[73].mxu0  ;;  %v6586_v35 = vpop.eup %6585  ;;  %v2185_v46 = vadd.f32 1.0, %v6584_v48 }
 0x5dd   :  { %v2019_v34 = vadd.f32 %v5070_v54, %v2018_v56  ;;  %v5846_v0 = vpop.f32.mrb[74].mxu0  ;;  %v6588_v51 = vpop.eup %6587  ;;  %v2188_v26 = vadd.f32 1.0, %v6586_v35  ;;  %v5079_v54 = vunpack.c.h.bf16 %v5425_v37 }
 0x5de   :  { %v2030_v32 = vadd.f32 %v5846_v0, %v5075_v19  ;;  %v2021_v28 = vpop.f32.mrb[75].mxu0  ;;  %v4529_v33 = vmul.f32 -1.442695, %v2027_v25  ;;  %v2186_v19 = vadd.f32 1.0, %v6588_v51 }
 0x5df   :  { %v2022_v36 = vadd.f32 %v5071_v10, %v2021_v28  ;;  %v4527_v58 = vmul.f32 -1.442695, %v2019_v34  ;;  %v5428_v10 = vld [vmem:[%s8891_s0 + $0x248] sm:$0xff]  }
 0x5e0   :  { %v4530_v9 = vmul.f32 -1.442695, %v2030_v32  ;;  %6597 = vpow2.f32 %v4529_v33  ;;  %v5090_v28 = vunpack.c.l.bf16 %v5428_v10 }
 0x5e1   :  { %v4528_v17 = vmul.f32 -1.442695, %v2022_v36  ;;  %6599 = vpow2.f32 %v4527_v58 }
 0x5e2   :  { %6601 = vpow2.f32 %v4530_v9  ;;  %v6590_v22 = vpop.eup %6589 }
 0x5e3   :  { %v5849_v45 = vpop.f32.mrb[76].mxu0  ;;  %6603 = vpow2.f32 %v4528_v17  ;;  %v6592_v2 = vpop.eup %6591  ;;  %v2191_v0 = vadd.f32 1.0, %v6590_v22 }
 0x5e4   :  { %v2043_v8 = vadd.f32 %v5849_v45, %v5082_v30  ;;  %v2034_v59 = vpop.f32.mrb[77].mxu0  ;;  %6605 = vrcp.f32 %v2187_v6  ;;  %v6594_v47 = vpop.eup %6593  ;;  %v2189_v32 = vadd.f32 1.0, %v6592_v2  ;;  %v5086_v30 = vunpack.c.l.bf16 %v5427_v3 }
 0x5e5   :  { %v5850_v15 = vpop.f32.mrb[78].mxu0  ;;  %v2035_v60 = vadd.f32 %v5078_v44, %v2034_v59  ;;  %6607 = vrcp.f32 %v2185_v46  ;;  %v6596_v34 = vpop.eup %6595  ;;  %v2192_v33 = vadd.f32 1.0, %v6594_v47  ;;  %v5091_v44 = vunpack.c.h.bf16 %v5428_v10  ;;  %v5432_v47 = vld [vmem:[%s8891_s0 + $0x268] sm:$0xff]  }
 0x5e6   :  { %v2037_v18 = vpop.f32.mrb[79].mxu0  ;;  %v2046_v53 = vadd.f32 %v5850_v15, %v5083_v52  ;;  %v4533_v41 = vmul.f32 -1.442695, %v2043_v8  ;;  %6609 = vrcp.f32 %v2188_v26  ;;  %v2190_v9 = vadd.f32 1.0, %v6596_v34  ;;  %v8201_v15 = vld [vmem:[%s8891_s0 + $0x258] sm:$0xff]   ;;  %v8208_v26 = vld [vmem:[%s8891_s0 + $0x250] sm:$0xff]  }
 0x5e7   :  { %v4531_v21 = vmul.f32 -1.442695, %v2035_v60  ;;  %v2038_v4 = vadd.f32 %v5079_v54, %v2037_v18  ;;  %v5087_v45 = vunpack.c.h.bf16 %v5427_v3  ;;  %v5094_v3 = vunpack.c.l.bf16 %v8208_v26 }
 0x5e8   :  { %v4534_v25 = vmul.f32 -1.442695, %v2046_v53  ;;  %6611 = vpow2.f32 %v4533_v41 }
 0x5e9   :  { %6613 = vrcp.f32 %v2186_v19  ;;  %v4532_v17 = vmul.f32 -1.442695, %v2038_v4 }
 0x5ea   :  { %v6598_v37 = vpop.eup %6597  ;;  %6615 = vpow2.f32 %v4531_v21  ;;  %v5098_v21 = vunpack.c.l.bf16 %v8201_v15 }
 0x5eb   :  { %v5853_v56 = vpop.f32.mrb[80].mxu0  ;;  %v6600_v29 = vpop.eup %6599  ;;  %6617 = vpow2.f32 %v4534_v25  ;;  %v2195_v35 = vadd.f32 1.0, %v6598_v37 }
 0x5ec   :  { %v2050_v7 = vpop.f32.mrb[81].mxu0  ;;  %v6602_v48 = vpop.eup %6601  ;;  %6619 = vrcp.f32 %v2191_v0  ;;  %v2059_v8 = vadd.f32 %v5853_v56, %v5090_v28  ;;  %v2193_v59 = vadd.f32 1.0, %v6600_v29  ;;  %v5106_v28 = vunpack.c.l.bf16 %v5432_v47 }
 0x5ed   :  { %v5854_v36 = vpop.f32.mrb[82].mxu0  ;;  %v6604_v52 = vpop.eup %6603  ;;  %6621 = vrcp.f32 %v2189_v32  ;;  %v2051_v6 = vadd.f32 %v5086_v30, %v2050_v7  ;;  %v2196_v46 = vadd.f32 1.0, %v6602_v48  ;;  %v5099_v48 = vunpack.c.h.bf16 %v8201_v15  ;;  %v5434_v15 = vld [vmem:[%s8891_s0 + $0x278] sm:$0xff]  }
 0x5ee   :  { %v2053_v58 = vpop.f32.mrb[83].mxu0  ;;  %6623 = vrcp.f32 %v2192_v33  ;;  %v8203_v51 = vpop.eup %6605  ;;  %v2062_v60 = vadd.f32 %v5854_v36, %v5091_v44  ;;  %v2194_v41 = vadd.f32 1.0, %v6604_v52  ;;  %v4537_v2 = vmul.f32 -1.442695, %v2059_v8  ;;  %v5431_v36 = vld [vmem:[%s8891_s0 + $0x260] sm:$0xff]  }
 0x5ef   :  { %6625 = vrcp.f32 %v2190_v9  ;;  %v8210_v53 = vpop.eup %6607  ;;  %v2054_v54 = vadd.f32 %v5087_v45, %v2053_v58  ;;  %v4535_v56 = vmul.f32 -1.442695, %v2051_v6  ;;  %v5102_v45 = vunpack.c.l.bf16 %v5431_v36 }
 0x5f0   :  { %6627 = vpow2.f32 %v4532_v17  ;;  %v8212_v19 = vpop.eup %6609  ;;  %v4538_v4 = vmul.f32 -1.442695, %v2062_v60  ;;  %v5107_v6 = vunpack.c.h.bf16 %v5432_v47 }
 0x5f1   :  { %6629 = vrcp.f32 %v2195_v35  ;;  %v4536_v32 = vmul.f32 -1.442695, %v2054_v54  ;;  %v5103_v54 = vunpack.c.h.bf16 %v5431_v36 }
 0x5f2   :  { %v6612_v25 = vpop.eup %6611  ;;  %6631 = vrcp.f32 %v2193_v59 }
 0x5f3   :  { %v5857_v18 = vpop.f32.mrb[84].mxu0  ;;  %v8219_v0 = vpop.eup %6613  ;;  %6633 = vrcp.f32 %v2196_v46  ;;  %v2199_v33 = vadd.f32 1.0, %v6612_v25 }
 0x5f4   :  { %v2066_v22 = vpop.f32.mrb[85].mxu0  ;;  %v6616_v7 = vpop.eup %6615  ;;  %6635 = vrcp.f32 %v2194_v41  ;;  %v2075_v30 = vadd.f32 %v5857_v18, %v5098_v21  ;;  %v5095_v18 = vunpack.c.h.bf16 %v8208_v26  ;;  %v5433_v26 = vld [vmem:[%s8891_s0 + $0x270] sm:$0xff]  }
 0x5f5   :  { %v5858_v10 = vpop.f32.mrb[86].mxu0  ;;  %v6618_v37 = vpop.eup %6617  ;;  %6637 = vpow2.f32 %v4537_v2  ;;  %v2067_v29 = vadd.f32 %v5094_v3, %v2066_v22  ;;  %v2197_v44 = vadd.f32 1.0, %v6616_v7  ;;  %v5114_v7 = vunpack.c.l.bf16 %v5434_v15 }
 0x5f6   :  { %v2069_v34 = vpop.f32.mrb[87].mxu0  ;;  %v8224_v58 = vpop.eup %6619  ;;  %6639 = vpow2.f32 %v4535_v56  ;;  %v2200_v35 = vadd.f32 1.0, %v6618_v37  ;;  %v4541_v60 = vmul.f32 -1.442695, %v2075_v30  ;;  %v2078_v56 = vadd.f32 %v5858_v10, %v5099_v48 }
 0x5f7   :  { %v8226_v9 = vpop.eup %6621  ;;  %6641 = vpow2.f32 %v4538_v4  ;;  %v4539_v2 = vmul.f32 -1.442695, %v2067_v29  ;;  %v5110_v10 = vunpack.c.l.bf16 %v5433_v26 }
 0x5f8   :  { %v8229_v52 = vpop.eup %6623  ;;  %6643 = vpow2.f32 %v4536_v32  ;;  %v4542_v30 = vmul.f32 -1.442695, %v2078_v56 }
 0x5f9   :  { %v8231_v46 = vpop.eup %6625  ;;  %6645 = vrcp.f32 %v2199_v33 }
 0x5fa   :  { %v6628_v22 = vpop.eup %6627 }
 0x5fb   :  { %v5861_v17 = vpop.f32.mrb[88].mxu0  ;;  %v6630_v25 = vpop.eup %6629  ;;  %v2198_v48 = vadd.f32 1.0, %v6628_v22 }
 0x5fc   :  { %v2091_v8 = vadd.f32 %v5861_v17, %v5106_v28  ;;  %v2082_v59 = vpop.f32.mrb[89].mxu0  ;;  %v6632_v3 = vpop.eup %6631  ;;  %v2070_v28 = vadd.f32 %v5095_v18, %v2069_v34  ;;  %v5111_v18 = vunpack.c.h.bf16 %v5433_v26 }
 0x5fd   :  { %v5862_v41 = vpop.f32.mrb[90].mxu0  ;;  %v2083_v47 = vadd.f32 %v5102_v45, %v2082_v59  ;;  %v6634_v32 = vpop.eup %6633 }
 0x5fe   :  { %6647 = vtanh.f32 %v2091_v8  ;;  %v2085_v21 = vpop.f32.mrb[91].mxu0  ;;  %v2094_v4 = vadd.f32 %v5862_v41, %v5107_v6  ;;  %v6636_v37 = vpop.eup %6635  ;;  %v4540_v59 = vmul.f32 -1.442695, %v2070_v28 }
 0x5ff   :  { %6649 = vrcp.f32 %v2197_v44  ;;  %v2086_v36 = vadd.f32 %v5103_v54, %v2085_v21  ;;  %v6638_v33 = vpop.eup %6637 }
 0x600   :  { %6651 = vrcp.f32 %v2200_v35  ;;  %v6640_v44 = vpop.eup %6639  ;;  %v5115_v35 = vunpack.c.h.bf16 %v5434_v15  ;;  %v2203_v34 = vadd.f32 1.0, %v6638_v33 }
 0x601   :  { %6653 = vpow2.f32 %v4541_v60  ;;  %v6642_v8 = vpop.eup %6641 }
 0x602   :  { %6655 = vpow2.f32 %v4539_v2  ;;  %v6644_v60 = vpop.eup %6643  ;;  %v2204_v33 = vadd.f32 1.0, %v6642_v8 }
 0x603   :  { %6657 = vtanh.f32 %v2083_v47  ;;  %v5865_v29 = vpop.f32.mrb[92].mxu0  ;;  %v6646_v54 = vpop.eup %6645  ;;  %v2267_v47 = vmul.f32 %v6630_v25, %v8018_v38  ;;  %v2265_v38 = vmul.f32 %v6632_v3, %v8025_v55 }
 0x604   :  { %6659 = vtanh.f32 %v2094_v4  ;;  %v2107_v17 = vadd.f32 %v5865_v29, %v5114_v7  ;;  %v2098_v45 = vpop.f32.mrb[93].mxu0  ;;  %v2201_v4 = vadd.f32 1.0, %v6640_v44  ;;  %v2202_v29 = vadd.f32 1.0, %v6644_v60 }
 0x605   :  { %6661 = vtanh.f32 %v2086_v36  ;;  %v5866_v6 = vpop.f32.mrb[94].mxu0  ;;  %v2099_v2 = vadd.f32 %v5110_v10, %v2098_v45  ;;  %v2268_v44 = vmul.f32 %v6634_v32, %v8030_v31  ;;  %v2271_v55 = vmul.f32 %v6646_v54, %v8037_v42 }
 0x606   :  { %6663 = vtanh.f32 %v2107_v17  ;;  %v2101_v41 = vpop.f32.mrb[95].mxu0  ;;  %v2110_v56 = vadd.f32 %v5866_v6, %v5115_v35  ;;  %v2266_v35 = vmul.f32 %v6636_v37, %v8034_v50 }
 0x607   :  { %6665 = vpow2.f32 %v4542_v30  ;;  %v2102_v28 = vadd.f32 %v5111_v18, %v2101_v41 }
 0x608   :  { %v6648_v21 = vpop.eup %6647  ;;  %6667 = vrcp.f32 %v2198_v48 }
 0x609   :  { %v6650_v22 = vpop.eup %6649  ;;  %6669 = vpow2.f32 %v4540_v59  ;;  %v2275_v15 = vmul.f32 %v6648_v21, %v8203_v51 }
 0x60a   :  { %v6652_v7 = vpop.eup %6651  ;;  %6671 = vrcp.f32 %v2203_v34 }
 0x60b   :  { %v6654_v36 = vpop.eup %6653  ;;  %v8242_v26 = vadd.f32 %v2275_v15, %v2267_v47  ;;  %6673 = vtanh.f32 %v2099_v2  ;;  %v2272_v2 = vmul.f32 %v6652_v7, %v8048_v39 }
 0x60c   :  { %v6656_v30 = vpop.eup %6655  ;;  %6675 = vtanh.f32 %v2110_v56  ;;  %v2207_v32 = vadd.f32 1.0, %v6654_v36 }
 0x60d   :  { %v6658_v10 = vpop.eup %6657  ;;  %6677 = vrcp.f32 %v2201_v4  ;;  %v2205_v37 = vadd.f32 1.0, %v6656_v30 }
 0x60e   :  { %v6660_v48 = vpop.eup %6659  ;;  %v2273_v25 = vmul.f32 %v6658_v10, %v8210_v53  ;;  %6679 = vtanh.f32 %v2102_v28 }
 0x60f   :  { %v6662_v51 = vpop.eup %6661  ;;  %6681 = vrcp.f32 %v2204_v33  ;;  %v2276_v17 = vmul.f32 %v6660_v48, %v8212_v19 }
 0x610   :  { %v6664_v45 = vpop.eup %6663  ;;  %6683 = vrcp.f32 %v2202_v29  ;;  %v8249_v8 = vadd.f32 %v2273_v25, %v2265_v38  ;;  %v2274_v59 = vmul.f32 %v6662_v51, %v8219_v0 }
 0x611   :  { %v6666_v6 = vpop.eup %6665  ;;  %6685 = vtanh.f32 %v8242_v26  ;;  %v8254_v53 = vadd.f32 %v2276_v17, %v2268_v44  ;;  %v2279_v31 = vmul.f32 %v6664_v45, %v8224_v58  ;;  %v2269_v58 = vmul.f32 %v6650_v22, %v8044_v20 }
 0x612   :  { %v6668_v3 = vpop.eup %6667  ;;  %6687 = vtanh.f32 %v8249_v8  ;;  %v8258_v19 = vadd.f32 %v2274_v59, %v2266_v35  ;;  %v2208_v42 = vadd.f32 1.0, %v6666_v6 }
 0x613   :  { %v6670_v50 = vpop.eup %6669  ;;  %6689 = vtanh.f32 %v8254_v53  ;;  %v8261_v0 = vadd.f32 %v2279_v31, %v2271_v55  ;;  %v2270_v28 = vmul.f32 %v6668_v3, %v8053_v5 }
 0x614   :  { %v6672_v60 = vpop.eup %6671  ;;  %6691 = vtanh.f32 %v8258_v19  ;;  %v2206_v47 = vadd.f32 1.0, %v6670_v50 }
 0x615   :  { %v6674_v34 = vpop.eup %6673  ;;  %6693 = vrcp.f32 %v2207_v32 }
 0x616   :  { %v6676_v18 = vpop.eup %6675  ;;  %v2277_v41 = vmul.f32 %v6674_v34, %v8226_v9  ;;  %6695 = vrcp.f32 %v2205_v37 }
 0x617   :  { %v6678_v54 = vpop.eup %6677  ;;  %v2280_v21 = vmul.f32 %v6676_v18, %v8229_v52  ;;  %6697 = vrcp.f32 %v2208_v42 }
 0x618   :  { %v6680_v56 = vpop.eup %6679  ;;  %v8268_v4 = vadd.f32 %v2277_v41, %v2269_v58  ;;  %6699 = vtanh.f32 %v8261_v0 }
 0x619   :  { %v6682_v15 = vpop.eup %6681  ;;  %v8272_v20 = vadd.f32 %v2280_v21, %v2272_v2  ;;  %v2278_v9 = vmul.f32 %v6680_v56, %v8231_v46  ;;  %v5440_v2 = vld [vmem:[%s8891_s0 + $0x2a8] sm:$0xff]  }
 0x61a   :  { %v6684_v22 = vpop.eup %6683  ;;  %6701 = vtanh.f32 %v8268_v4 }
 0x61b   :  { %v6686_v39 = vpop.eup %6685  ;;  %6703 = vtanh.f32 %v8272_v20  ;;  %v8277_v52 = vadd.f32 %v2278_v9, %v2270_v28 }
 0x61c   :  { %v6688_v7 = vpop.eup %6687  ;;  %6705 = vrcp.f32 %v2206_v47  ;;  %v2299_v33 = vmul.f32 %v6686_v39, %v6672_v60  ;;  %v5138_v39 = vunpack.c.l.bf16 %v5440_v2 }
 0x61d   :  { %v6690_v36 = vpop.eup %6689  ;;  %6707 = vtanh.f32 %v8277_v52  ;;  %v2297_v29 = vmul.f32 %v6688_v7, %v6678_v54 }
 0x61e   :  { %v6692_v5 = vpop.eup %6691  ;;  %v2300_v30 = vmul.f32 %v6690_v36, %v6682_v15  ;;  %v5439_v15 = vld [vmem:[%s8891_s0 + $0x2a0] sm:$0xff]  }
 0x61f   :  { %v2298_v10 = vmul.f32 %v6692_v5, %v6684_v22  ;;  %v6694_v48 = vpop.eup %6693  ;;  %v5134_v36 = vunpack.c.l.bf16 %v5439_v15 }
 0x620   :  { %v2306_v46 = vpack.c.bf16 %v2300_v30, %v2299_v33  ;;  %v6696_v38 = vpop.eup %6695  ;;  %v5139_v33 = vunpack.c.h.bf16 %v5440_v2 }
 0x621   :  { %v2305_v25 = vpack.c.bf16 %v2298_v10, %v2297_v29  ;;  %v6698_v51 = vpop.eup %6697  ;;  %v5135_v10 = vunpack.c.h.bf16 %v5439_v15 }
 0x622   :  { %v6700_v44 = vpop.eup %6699 }
 0x623   :  { %5867 = vmatprep.subr.bf16.mxu1 %v2305_v25  ;;  %v2303_v59 = vmul.f32 %v6700_v44, %v6694_v48 }
 0x624   :  { %v6702_v17 = vpop.eup %6701  ;;  %5868 = vmatpush3.bf16.msra.mxu1 %v2305_v25 }
 0x625   :  { %v6704_v45 = vpop.eup %6703  ;;  %5869 = vmatprep.subr.bf16.mxu1 %v2306_v46  ;;  %v2301_v31 = vmul.f32 %v6702_v17, %v6696_v38  ;;  %v5442_v17 = vld [vmem:[%s8891_s0 + $0x2b8] sm:$0xff]  }
 0x626   :  { %v6706_v35 = vpop.eup %6705  ;;  %v2304_v6 = vmul.f32 %v6704_v45, %v6698_v51 }
 0x627   :  { %v6708_v55 = vpop.eup %6707 }
 0x628   :  { %5870 = vmatpush3.bf16.msra.mxu1 %v2306_v46  ;;  %v2302_v3 = vmul.f32 %v6708_v55, %v6706_v35  ;;  %v2308_v32 = vpack.c.bf16 %v2304_v6, %v2303_v59  ;;  %v5441_v55 = vld [vmem:[%s8891_s0 + $0x2b0] sm:$0xff]  }
 0x62a   :  { %v2307_v50 = vpack.c.bf16 %v2302_v3, %v2301_v31  ;;  %v5146_v3 = vunpack.c.l.bf16 %v5442_v17 }
 0x62c   :  { %5871 = vmatprep.subr.bf16.mxu1 %v2307_v50 }
 0x62d   :  { %5872 = vmatpush3.bf16.msra.mxu1 %v2307_v50 }
 0x62e   :  { %5873 = vmatprep.subr.bf16.mxu1 %v2308_v32 }
 0x631   :  { %5874 = vmatpush3.bf16.msra.mxu1 %v2308_v32 }
 0x634   :  { %5876 = vmatmul.mubr.msk.bf16.vlgmr.msra.gmra.mrb[64].mxu1 %vm215_vm0, %v8059_v11  ;;  %v5436_v11 = vld [vmem:[%s8891_s0 + $0x288] sm:$0xff]  }
 0x635   :  { %5879 = vmatprep.mubr.msk.bf16.mxu1 %vm215_vm0, %v8066_v12  ;;  %v5435_v12 = vld [vmem:[%s8891_s0 + $0x280] sm:$0xff]  }
 0x63c   :  { %5880 = vmatmul.mubr.msk.bf16.gmra.mrb[68].mxu1 %vm215_vm0, %v8073_v61 }
 0x63d   :  { %5883 = vmatprep.mubr.msk.bf16.mxu1 %vm215_vm0, %v8080_v27  ;;  %v5122_v27 = vunpack.c.l.bf16 %v5436_v11 }
 0x644   :  { %5884 = vmatmul.mubr.msk.bf16.gmra.mrb[72].mxu1 %vm215_vm0, %v8087_v40 }
 0x645   :  { %5887 = vmatprep.mubr.msk.bf16.mxu1 %vm215_vm0, %v8094_v1  ;;  %v5118_v1 = vunpack.c.l.bf16 %v5435_v12 }
 0x64c   :  { %5888 = vmatmul.mubr.msk.bf16.gmra.mrb[76].mxu1 %vm215_vm0, %v8101_v57 }
 0x64d   :  { %5891 = vmatprep.mubr.msk.bf16.mxu1 %vm215_vm0, %v8108_v24  ;;  %v5123_v24 = vunpack.c.h.bf16 %v5436_v11 }
 0x654   :  { %5892 = vmatmul.mubr.msk.bf16.gmra.mrb[80].mxu1 %vm215_vm0, %v8115_v49 }
 0x655   :  { %5895 = vmatprep.mubr.msk.bf16.mxu1 %vm215_vm0, %v8122_v13 }
 0x65c   :  { %5896 = vmatmul.mubr.msk.bf16.gmra.mrb[84].mxu1 %vm215_vm0, %v8129_v16  ;;  %v5119_v16 = vunpack.c.h.bf16 %v5435_v12  ;;  %v5142_v12 = vunpack.c.l.bf16 %v5441_v55 }
 0x65d   :  { %5899 = vmatprep.mubr.msk.bf16.mxu1 %vm215_vm0, %v8136_v43  ;;  %v5438_v43 = vld [vmem:[%s8891_s0 + $0x298] sm:$0xff]  }
 0x65e   :  { %v5131_v41 = vunpack.c.h.bf16 %v5438_v43 }
 0x664   :  { %5900 = vmatmul.mubr.msk.bf16.gmra.mrb[88].mxu1 %vm215_vm0, %v8143_v62 }
 0x665   :  { %5903 = vmatprep.mubr.msk.bf16.mxu1 %vm215_vm0, %v8150_v63  ;;  %v5437_v63 = vld [vmem:[%s8891_s0 + $0x290] sm:$0xff]  }
 0x666   :  { %v5126_v34 = vunpack.c.l.bf16 %v5437_v63  ;;  %v5127_v56 = vunpack.c.h.bf16 %v5437_v63 }
 0x66c   :  { %5904 = vmatmul.mubr.msk.bf16.gmra.mrb[92].mxu1 %vm215_vm0, %v8157_v14 }
 0x66d   :  { %5955 = vmatprep.mubr.msk.bf16.mxu1 %vm215_vm0, %v8164_v23  ;;  %v5130_v23 = vunpack.c.l.bf16 %v5438_v43 }
 0x707   :  { %v5877_v61 = vpop.f32.mrb[64].mxu1 }
 0x708   :  { %v2408_v40 = vpop.f32.mrb[65].mxu1  ;;  %v2417_v13 = vadd.f32 %v5877_v61, %v5122_v27 }
 0x709   :  { %v5878_v57 = vpop.f32.mrb[66].mxu1  ;;  %v2409_v62 = vadd.f32 %v5118_v1, %v2408_v40  ;;  %v5147_v1 = vunpack.c.h.bf16 %v5442_v17 }
 0x70a   :  { %v2411_v49 = vpop.f32.mrb[67].mxu1  ;;  %v2420_v14 = vadd.f32 %v5878_v57, %v5123_v24  ;;  %v4593_v60 = vmul.f32 -1.442695, %v2417_v13 }
 0x70b   :  { %v2412_v42 = vadd.f32 %v5119_v16, %v2411_v49  ;;  %v4591_v58 = vmul.f32 -1.442695, %v2409_v62 }
 0x70c   :  { %v4594_v21 = vmul.f32 -1.442695, %v2420_v14  ;;  %6709 = vpow2.f32 %v4593_v60 }
 0x70d   :  { %v4592_v9 = vmul.f32 -1.442695, %v2412_v42  ;;  %6711 = vpow2.f32 %v4591_v58  ;;  %v5143_v42 = vunpack.c.h.bf16 %v5441_v55 }
 0x70e   :  { %6713 = vpow2.f32 %v4594_v21 }
 0x70f   :  { %v5881_v37 = vpop.f32.mrb[68].mxu1  ;;  %6715 = vpow2.f32 %v4592_v9 }
 0x710   :  { %v2424_v18 = vpop.f32.mrb[69].mxu1  ;;  %v2433_v28 = vadd.f32 %v5881_v37, %v5130_v23 }
 0x711   :  { %v5882_v54 = vpop.f32.mrb[70].mxu1  ;;  %v2425_v22 = vadd.f32 %v5126_v34, %v2424_v18 }
 0x712   :  { %v2427_v47 = vpop.f32.mrb[71].mxu1  ;;  %v2436_v7 = vadd.f32 %v5882_v54, %v5131_v41  ;;  %v4597_v30 = vmul.f32 -1.442695, %v2433_v28  ;;  %v5444_v54 = vld [vmem:[%s8891_s0 + $0x2c8] sm:$0xff]  }
 0x713   :  { %v2428_v5 = vadd.f32 %v5127_v56, %v2427_v47  ;;  %v4595_v48 = vmul.f32 -1.442695, %v2425_v22  ;;  %v5443_v47 = vld [vmem:[%s8891_s0 + $0x2c0] sm:$0xff]  }
 0x714   :  { %v4598_v25 = vmul.f32 -1.442695, %v2436_v7  ;;  %6717 = vpow2.f32 %v4597_v30  ;;  %v5154_v7 = vunpack.c.l.bf16 %v5444_v54  ;;  %v5150_v30 = vunpack.c.l.bf16 %v5443_v47 }
 0x715   :  { %v4596_v45 = vmul.f32 -1.442695, %v2428_v5  ;;  %6719 = vpow2.f32 %v4595_v48 }
 0x716   :  { %6721 = vpow2.f32 %v4598_v25  ;;  %v6710_v50 = vpop.eup %6709 }
 0x717   :  { %v5885_v29 = vpop.f32.mrb[72].mxu1  ;;  %6723 = vpow2.f32 %v4596_v45  ;;  %v6712_v61 = vpop.eup %6711  ;;  %v2609_v13 = vadd.f32 1.0, %v6710_v50  ;;  %v8352_v50 = vld [vmem:[%s8891_s0 + $0x2d0] sm:$0xff]  }
 0x718   :  { %v2449_v46 = vadd.f32 %v5885_v29, %v5138_v39  ;;  %v2440_v38 = vpop.f32.mrb[73].mxu1  ;;  %v6714_v57 = vpop.eup %6713  ;;  %v2607_v62 = vadd.f32 1.0, %v6712_v61 }
 0x719   :  { %v2441_v51 = vadd.f32 %v5134_v36, %v2440_v38  ;;  %v5886_v44 = vpop.f32.mrb[74].mxu1  ;;  %v6716_v43 = vpop.eup %6715  ;;  %v2610_v23 = vadd.f32 1.0, %v6714_v57 }
 0x71a   :  { %v2452_v35 = vadd.f32 %v5886_v44, %v5139_v33  ;;  %v2443_v59 = vpop.f32.mrb[75].mxu1  ;;  %v4601_v31 = vmul.f32 -1.442695, %v2449_v46  ;;  %v2608_v18 = vadd.f32 1.0, %v6716_v43  ;;  %v5155_v46 = vunpack.c.h.bf16 %v5444_v54 }
 0x71b   :  { %v2444_v6 = vadd.f32 %v5135_v10, %v2443_v59  ;;  %v4599_v32 = vmul.f32 -1.442695, %v2441_v51  ;;  %v5151_v51 = vunpack.c.h.bf16 %v5443_v47  ;;  %v5158_v43 = vunpack.c.l.bf16 %v8352_v50 }
 0x71c   :  { %v4602_v11 = vmul.f32 -1.442695, %v2452_v35  ;;  %6725 = vpow2.f32 %v4601_v31 }
 0x71d   :  { %v4600_v27 = vmul.f32 -1.442695, %v2444_v6  ;;  %6727 = vpow2.f32 %v4599_v32  ;;  %v8345_v6 = vld [vmem:[%s8891_s0 + $0x2d8] sm:$0xff]  }
 0x71e   :  { %6729 = vpow2.f32 %v4602_v11  ;;  %v6718_v34 = vpop.eup %6717  ;;  %v5162_v57 = vunpack.c.l.bf16 %v8345_v6 }
 0x71f   :  { %v5889_v40 = vpop.f32.mrb[76].mxu1  ;;  %6731 = vpow2.f32 %v4600_v27  ;;  %v6720_v58 = vpop.eup %6719  ;;  %v2613_v28 = vadd.f32 1.0, %v6718_v34 }
 0x720   :  { %v2465_v24 = vadd.f32 %v5889_v40, %v5146_v3  ;;  %v2456_v49 = vpop.f32.mrb[77].mxu1  ;;  %6733 = vrcp.f32 %v2609_v13  ;;  %v6722_v2 = vpop.eup %6721  ;;  %v2611_v39 = vadd.f32 1.0, %v6720_v58 }
 0x721   :  { %v5890_v16 = vpop.f32.mrb[78].mxu1  ;;  %v2457_v63 = vadd.f32 %v5142_v12, %v2456_v49  ;;  %6735 = vrcp.f32 %v2607_v62  ;;  %v6724_v15 = vpop.eup %6723  ;;  %v2614_v33 = vadd.f32 1.0, %v6722_v2  ;;  %v5448_v49 = vld [vmem:[%s8891_s0 + $0x2e8] sm:$0xff]  }
 0x722   :  { %v2459_v14 = vpop.f32.mrb[79].mxu1  ;;  %v2468_v37 = vadd.f32 %v5890_v16, %v5147_v1  ;;  %v4605_v60 = vmul.f32 -1.442695, %v2465_v24  ;;  %6737 = vrcp.f32 %v2610_v23  ;;  %v2612_v48 = vadd.f32 1.0, %v6724_v15 }
 0x723   :  { %v4603_v41 = vmul.f32 -1.442695, %v2457_v63  ;;  %v2460_v9 = vadd.f32 %v5143_v42, %v2459_v14  ;;  %v5447_v42 = vld [vmem:[%s8891_s0 + $0x2e0] sm:$0xff]  }
 0x724   :  { %v4606_v21 = vmul.f32 -1.442695, %v2468_v37  ;;  %6739 = vpow2.f32 %v4605_v60  ;;  %v5170_v60 = vunpack.c.l.bf16 %v5448_v49  ;;  %v5166_v15 = vunpack.c.l.bf16 %v5447_v42 }
 0x725   :  { %6741 = vrcp.f32 %v2608_v18  ;;  %v4604_v25 = vmul.f32 -1.442695, %v2460_v9 }
 0x726   :  { %v6726_v5 = vpop.eup %6725  ;;  %6743 = vpow2.f32 %v4603_v41 }
 0x727   :  { %v5893_v56 = vpop.f32.mrb[80].mxu1  ;;  %v6728_v10 = vpop.eup %6727  ;;  %6745 = vpow2.f32 %v4606_v21  ;;  %v2617_v17 = vadd.f32 1.0, %v6726_v5 }
 0x728   :  { %v2472_v22 = vpop.f32.mrb[81].mxu1  ;;  %v6730_v38 = vpop.eup %6729  ;;  %6747 = vrcp.f32 %v2613_v28  ;;  %v2481_v45 = vadd.f32 %v5893_v56, %v5154_v7  ;;  %v2615_v35 = vadd.f32 1.0, %v6728_v10  ;;  %v5163_v56 = vunpack.c.h.bf16 %v8345_v6  ;;  %v5450_v10 = vld [vmem:[%s8891_s0 + $0x2f8] sm:$0xff]  }
 0x729   :  { %v5894_v36 = vpop.f32.mrb[82].mxu1  ;;  %v6732_v44 = vpop.eup %6731  ;;  %6749 = vrcp.f32 %v2611_v39  ;;  %v2473_v59 = vadd.f32 %v5150_v30, %v2472_v22  ;;  %v2618_v31 = vadd.f32 1.0, %v6730_v38  ;;  %v5171_v7 = vunpack.c.h.bf16 %v5448_v49 }
 0x72a   :  { %v2475_v29 = vpop.f32.mrb[83].mxu1  ;;  %6751 = vrcp.f32 %v2614_v33  ;;  %v8347_v55 = vpop.eup %6733  ;;  %v2484_v3 = vadd.f32 %v5894_v36, %v5155_v46  ;;  %v2616_v12 = vadd.f32 1.0, %v6732_v44  ;;  %v4609_v1 = vmul.f32 -1.442695, %v2481_v45 }
 0x72b   :  { %6753 = vrcp.f32 %v2612_v48  ;;  %v8354_v11 = vpop.eup %6735  ;;  %v2476_v61 = vadd.f32 %v5151_v51, %v2475_v29  ;;  %v4607_v16 = vmul.f32 -1.442695, %v2473_v59  ;;  %v5159_v33 = vunpack.c.h.bf16 %v8352_v50  ;;  %v5449_v59 = vld [vmem:[%s8891_s0 + $0x2f0] sm:$0xff]  }
 0x72c   :  { %6755 = vpow2.f32 %v4604_v25  ;;  %v8356_v40 = vpop.eup %6737  ;;  %v4610_v14 = vmul.f32 -1.442695, %v2484_v3  ;;  %v5167_v29 = vunpack.c.h.bf16 %v5447_v42 }
 0x72d   :  { %6757 = vrcp.f32 %v2617_v17  ;;  %v4608_v37 = vmul.f32 -1.442695, %v2476_v61 }
 0x72e   :  { %v6740_v13 = vpop.eup %6739  ;;  %6759 = vrcp.f32 %v2615_v35  ;;  %v5178_v35 = vunpack.c.l.bf16 %v5450_v10 }
 0x72f   :  { %v5897_v32 = vpop.f32.mrb[84].mxu1  ;;  %v8363_v63 = vpop.eup %6741  ;;  %6761 = vrcp.f32 %v2618_v31  ;;  %v2621_v18 = vadd.f32 1.0, %v6740_v13  ;;  %v5179_v13 = vunpack.c.h.bf16 %v5450_v10 }
 0x730   :  { %v2488_v27 = vpop.f32.mrb[85].mxu1  ;;  %v6744_v23 = vpop.eup %6743  ;;  %6763 = vrcp.f32 %v2616_v12  ;;  %v2497_v58 = vadd.f32 %v5897_v32, %v5162_v57 }
 0x731   :  { %v5898_v24 = vpop.f32.mrb[86].mxu1  ;;  %v6746_v34 = vpop.eup %6745  ;;  %6765 = vpow2.f32 %v4609_v1  ;;  %v2489_v54 = vadd.f32 %v5158_v43, %v2488_v27  ;;  %v2619_v21 = vadd.f32 1.0, %v6744_v23  ;;  %v5174_v27 = vunpack.c.l.bf16 %v5449_v59 }
 0x732   :  { %v2491_v62 = vpop.f32.mrb[87].mxu1  ;;  %v8368_v41 = vpop.eup %6747  ;;  %6767 = vpow2.f32 %v4607_v16  ;;  %v2622_v9 = vadd.f32 1.0, %v6746_v34  ;;  %v4613_v5 = vmul.f32 -1.442695, %v2497_v58  ;;  %v2500_v51 = vadd.f32 %v5898_v24, %v5163_v56 }
 0x733   :  { %v8370_v2 = vpop.eup %6749  ;;  %6769 = vpow2.f32 %v4610_v14  ;;  %v4611_v46 = vmul.f32 -1.442695, %v2489_v54  ;;  %v2492_v31 = vadd.f32 %v5159_v33, %v2491_v62 }
 0x734   :  { %v8373_v28 = vpop.eup %6751  ;;  %6771 = vpow2.f32 %v4608_v37  ;;  %v4614_v12 = vmul.f32 -1.442695, %v2500_v51  ;;  %v5175_v37 = vunpack.c.h.bf16 %v5449_v59 }
 0x735   :  { %v8375_v36 = vpop.eup %6753  ;;  %6773 = vrcp.f32 %v2621_v18  ;;  %v4612_v43 = vmul.f32 -1.442695, %v2492_v31 }
 0x736   :  { %v6756_v48 = vpop.eup %6755 }
 0x737   :  { %v5901_v47 = vpop.f32.mrb[88].mxu1  ;;  %v6758_v25 = vpop.eup %6757  ;;  %v2620_v57 = vadd.f32 1.0, %v6756_v48 }
 0x738   :  { %v2513_v22 = vadd.f32 %v5901_v47, %v5170_v60  ;;  %v2504_v39 = vpop.f32.mrb[89].mxu1  ;;  %v6760_v17 = vpop.eup %6759 }
 0x739   :  { %v5902_v30 = vpop.f32.mrb[90].mxu1  ;;  %v2505_v44 = vadd.f32 %v5166_v15, %v2504_v39  ;;  %v6762_v6 = vpop.eup %6761 }
 0x73a   :  { %6775 = vtanh.f32 %v2513_v22  ;;  %v2507_v38 = vpop.f32.mrb[91].mxu1  ;;  %v2516_v45 = vadd.f32 %v5902_v30, %v5171_v7  ;;  %v6764_v32 = vpop.eup %6763  ;;  %v2690_v48 = vmul.f32 %v6762_v6, %v8254_v53 }
 0x73b   :  { %6777 = vrcp.f32 %v2619_v21  ;;  %v2508_v3 = vadd.f32 %v5167_v29, %v2507_v38  ;;  %v6766_v50 = vpop.eup %6765  ;;  %v2689_v21 = vmul.f32 %v6758_v25, %v8242_v26  ;;  %v2687_v26 = vmul.f32 %v6760_v17, %v8249_v8 }
 0x73c   :  { %6779 = vrcp.f32 %v2622_v9  ;;  %v6768_v1 = vpop.eup %6767  ;;  %v2625_v62 = vadd.f32 1.0, %v6766_v50  ;;  %v2688_v25 = vmul.f32 %v6764_v32, %v8258_v19 }
 0x73d   :  { %6781 = vpow2.f32 %v4613_v5  ;;  %v6770_v16 = vpop.eup %6769  ;;  %v2623_v56 = vadd.f32 1.0, %v6768_v1 }
 0x73e   :  { %6783 = vpow2.f32 %v4611_v46  ;;  %v6772_v23 = vpop.eup %6771  ;;  %v2626_v39 = vadd.f32 1.0, %v6770_v16 }
 0x73f   :  { %6785 = vtanh.f32 %v2505_v44  ;;  %v5905_v61 = vpop.f32.mrb[92].mxu1  ;;  %v6774_v42 = vpop.eup %6773  ;;  %v2624_v33 = vadd.f32 1.0, %v6772_v23 }
 0x740   :  { %6787 = vtanh.f32 %v2516_v45  ;;  %v2529_v24 = vadd.f32 %v5905_v61, %v5178_v35  ;;  %v2520_v49 = vpop.f32.mrb[93].mxu1  ;;  %v2693_v8 = vmul.f32 %v6774_v42, %v8261_v0 }
 0x741   :  { %6789 = vtanh.f32 %v2508_v3  ;;  %v5906_v14 = vpop.f32.mrb[94].mxu1  ;;  %v2521_v34 = vadd.f32 %v5174_v27, %v2520_v49 }
 0x742   :  { %6791 = vtanh.f32 %v2529_v24  ;;  %v2523_v60 = vpop.f32.mrb[95].mxu1  ;;  %v2532_v58 = vadd.f32 %v5906_v14, %v5179_v13 }
 0x743   :  { %6793 = vpow2.f32 %v4614_v12  ;;  %v2524_v9 = vadd.f32 %v5175_v37, %v2523_v60 }
 0x744   :  { %v6776_v18 = vpop.eup %6775  ;;  %6795 = vrcp.f32 %v2620_v57 }
 0x745   :  { %v6778_v54 = vpop.eup %6777  ;;  %6797 = vpow2.f32 %v4612_v43  ;;  %v2697_v47 = vmul.f32 %v6776_v18, %v8347_v55 }
 0x746   :  { %v6780_v15 = vpop.eup %6779  ;;  %6799 = vrcp.f32 %v2625_v62 }
 0x747   :  { %v6782_v22 = vpop.eup %6781  ;;  %v8386_v7 = vadd.f32 %v2697_v47, %v2689_v21  ;;  %6801 = vtanh.f32 %v2521_v34  ;;  %v2694_v12 = vmul.f32 %v6780_v15, %v8272_v20 }
 0x748   :  { %v6784_v5 = vpop.eup %6783  ;;  %6803 = vtanh.f32 %v2532_v58  ;;  %v2629_v35 = vadd.f32 1.0, %v6782_v22 }
 0x749   :  { %v6786_v30 = vpop.eup %6785  ;;  %6805 = vrcp.f32 %v2623_v56  ;;  %v2627_v59 = vadd.f32 1.0, %v6784_v5 }
 0x74a   :  { %v6788_v29 = vpop.eup %6787  ;;  %v2695_v10 = vmul.f32 %v6786_v30, %v8354_v11  ;;  %6807 = vtanh.f32 %v2524_v9  ;;  %v8427_v30 = vld [vmem:[%s8893_s2 + $0x8] sm:$0xff]  }
 0x74b   :  { %v6790_v55 = vpop.eup %6789  ;;  %6809 = vrcp.f32 %v2626_v39  ;;  %v2698_v46 = vmul.f32 %v6788_v29, %v8356_v40  ;;  %v8434_v29 = vld [vmem:[%s8893_s2 + $0x10] sm:$0xff]  }
 0x74c   :  { %v6792_v38 = vpop.eup %6791  ;;  %6811 = vrcp.f32 %v2624_v33  ;;  %v8393_v51 = vadd.f32 %v2695_v10, %v2687_v26  ;;  %v2696_v44 = vmul.f32 %v6790_v55, %v8363_v63  ;;  %v8441_v26 = vld [vmem:[%s8893_s2 + $0x18] sm:$0xff]   ;;  %v8448_v10 = vld [vmem:[%s8893_s2 + $0x20] sm:$0xff]   ;;  %v8455_v55 = vld [vmem:[%s8893_s2 + $0x28] sm:$0xff]  }
 0x74d   :  { %v6794_v45 = vpop.eup %6793  ;;  %6813 = vtanh.f32 %v8386_v7  ;;  %v8398_v11 = vadd.f32 %v2698_v46, %v2690_v48  ;;  %v2701_v53 = vmul.f32 %v6792_v38, %v8368_v41  ;;  %v2691_v41 = vmul.f32 %v6778_v54, %v8268_v4  ;;  %v8462_v48 = vld [vmem:[%s8893_s2 + $0x30] sm:$0xff]   ;;  %v8469_v46 = vld [vmem:[%s8893_s2 + $0x38] sm:$0xff]   ;;  %v8476_v38 = vld [vmem:[%s8893_s2 + $0x40] sm:$0xff]  }
 0x74e   :  { %v6796_v17 = vpop.eup %6795  ;;  %6815 = vtanh.f32 %v8393_v51  ;;  %v8402_v40 = vadd.f32 %v2696_v44, %v2688_v25  ;;  %v2630_v0 = vadd.f32 1.0, %v6794_v45  ;;  %v8483_v25 = vld [vmem:[%s8893_s2 + $0x48] sm:$0xff]   ;;  %v8490_v44 = vld [vmem:[%s8893_s2 + $0x50] sm:$0xff]   ;;  %v8497_v45 = vld [vmem:[%s8893_s2 + $0x58] sm:$0xff]  }
 0x74f   :  { %v6798_v19 = vpop.eup %6797  ;;  %6817 = vtanh.f32 %v8398_v11  ;;  %v8405_v63 = vadd.f32 %v2701_v53, %v2693_v8  ;;  %v2692_v49 = vmul.f32 %v6796_v17, %v8277_v52  ;;  %v8504_v8 = vld [vmem:[%s8893_s2 + $0x60] sm:$0xff]   ;;  %v8511_v53 = vld [vmem:[%s8893_s2 + $0x68] sm:$0xff]   ;;  %v8518_v17 = vld [vmem:[%s8893_s2 + $0x70] sm:$0xff]  }
 0x750   :  { %v6800_v6 = vpop.eup %6799  ;;  %6819 = vtanh.f32 %v8402_v40  ;;  %v2628_v1 = vadd.f32 1.0, %v6798_v19  ;;  %v5452_v19 = vld [vmem:[%s8891_s0 + $0x308] sm:$0xff]  }
 0x751   :  { %v6802_v31 = vpop.eup %6801  ;;  %6821 = vrcp.f32 %v2629_v35  ;;  %v8525_v35 = vld [vmem:[%s8893_s2 + $0x78] sm:$0xff]  }
 0x752   :  { %v6804_v3 = vpop.eup %6803  ;;  %v2699_v32 = vmul.f32 %v6802_v31, %v8370_v2  ;;  %6823 = vrcp.f32 %v2627_v59  ;;  %v5451_v59 = vld [vmem:[%s8891_s0 + $0x300] sm:$0xff]  }
 0x753   :  { %v6806_v50 = vpop.eup %6805  ;;  %v2702_v61 = vmul.f32 %v6804_v3, %v8373_v28  ;;  %6825 = vrcp.f32 %v2630_v0  ;;  %v5186_v0 = vunpack.c.l.bf16 %v5452_v19  ;;  %v5182_v3 = vunpack.c.l.bf16 %v5451_v59 }
 0x754   :  { %v6808_v27 = vpop.eup %6807  ;;  %v8412_v57 = vadd.f32 %v2699_v32, %v2691_v41  ;;  %6827 = vtanh.f32 %v8405_v63  ;;  %v5187_v32 = vunpack.c.h.bf16 %v5452_v19 }
 0x755   :  { %v6810_v24 = vpop.eup %6809  ;;  %v8416_v4 = vadd.f32 %v2702_v61, %v2694_v12  ;;  %v2700_v2 = vmul.f32 %v6808_v27, %v8375_v36  ;;  %v5183_v61 = vunpack.c.h.bf16 %v5451_v59  ;;  %v5454_v27 = vld [vmem:[%s8891_s0 + $0x318] sm:$0xff]  }
 0x756   :  { %v6812_v13 = vpop.eup %6811  ;;  %6829 = vtanh.f32 %v8412_v57 }
 0x757   :  { %v6814_v20 = vpop.eup %6813  ;;  %6831 = vtanh.f32 %v8416_v4  ;;  %v8421_v28 = vadd.f32 %v2700_v2, %v2692_v49  ;;  %v5194_v2 = vunpack.c.l.bf16 %v5454_v27 }
 0x758   :  { %v6816_v16 = vpop.eup %6815  ;;  %6833 = vrcp.f32 %v2628_v1  ;;  %v2721_v14 = vmul.f32 %v6814_v20, %v6800_v6 }
 0x759   :  { %v6818_v43 = vpop.eup %6817  ;;  %6835 = vtanh.f32 %v8421_v28  ;;  %v2719_v62 = vmul.f32 %v6816_v16, %v6806_v50 }
 0x75a   :  { %v6820_v52 = vpop.eup %6819  ;;  %v2722_v23 = vmul.f32 %v6818_v43, %v6810_v24  ;;  %v5453_v24 = vld [vmem:[%s8891_s0 + $0x310] sm:$0xff]  }
 0x75b   :  { %v2720_v37 = vmul.f32 %v6820_v52, %v6812_v13  ;;  %v6822_v60 = vpop.eup %6821  ;;  %v5190_v43 = vunpack.c.l.bf16 %v5453_v24 }
 0x75c   :  { %v2728_v36 = vpack.c.bf16 %v2722_v23, %v2721_v14  ;;  %v6824_v42 = vpop.eup %6823  ;;  %v5195_v23 = vunpack.c.h.bf16 %v5454_v27 }
 0x75d   :  { %v2727_v34 = vpack.c.bf16 %v2720_v37, %v2719_v62  ;;  %v6826_v18 = vpop.eup %6825  ;;  %v5456_v37 = vld [vmem:[%s8891_s0 + $0x328] sm:$0xff]  }
 0x75e   :  { %v6828_v58 = vpop.eup %6827 }
 0x75f   :  { %5907 = vmatprep.subr.bf16.mxu0 %v2727_v34  ;;  %v2725_v47 = vmul.f32 %v6828_v58, %v6822_v60 }
 0x760   :  { %v6830_v54 = vpop.eup %6829  ;;  %5908 = vmatpush3.bf16.msra.mxu0 %v2727_v34  ;;  %v5455_v34 = vld [vmem:[%s8891_s0 + $0x320] sm:$0xff]  }
 0x761   :  { %v6832_v21 = vpop.eup %6831  ;;  %5909 = vmatprep.subr.bf16.mxu0 %v2728_v36  ;;  %v2723_v22 = vmul.f32 %v6830_v54, %v6824_v42 }
 0x762   :  { %v6834_v56 = vpop.eup %6833  ;;  %v2726_v15 = vmul.f32 %v6832_v21, %v6826_v18  ;;  %v5202_v21 = vunpack.c.l.bf16 %v5456_v37 }
 0x763   :  { %v6836_v9 = vpop.eup %6835 }
 0x764   :  { %5910 = vmatpush3.bf16.msra.mxu0 %v2728_v36  ;;  %v2724_v39 = vmul.f32 %v6836_v9, %v6834_v56  ;;  %v2730_v5 = vpack.c.bf16 %v2726_v15, %v2725_v47  ;;  %v5191_v36 = vunpack.c.h.bf16 %v5453_v24  ;;  %v5198_v47 = vunpack.c.l.bf16 %v5455_v34 }
 0x765   :  { %v5203_v9 = vunpack.c.h.bf16 %v5456_v37 }
 0x766   :  { %v2729_v33 = vpack.c.bf16 %v2724_v39, %v2723_v22 }
 0x768   :  { %5911 = vmatprep.subr.bf16.mxu0 %v2729_v33 }
 0x769   :  { %5912 = vmatpush3.bf16.msra.mxu0 %v2729_v33 }
 0x76a   :  { %5913 = vmatprep.subr.bf16.mxu0 %v2730_v5 }
 0x76d   :  { %5914 = vmatpush3.bf16.msra.mxu0 %v2730_v5  ;;  %v5199_v5 = vunpack.c.h.bf16 %v5455_v34 }
 0x770   :  { %5916 = vmatmul.mubr.msk.bf16.vlgmr.msra.gmra.mrb[96].mxu0 %vm215_vm0, %v8427_v30 }
 0x771   :  { %5919 = vmatprep.mubr.msk.bf16.mxu0 %vm215_vm0, %v8434_v29 }
 0x778   :  { %5920 = vmatmul.mubr.msk.bf16.gmra.mrb[100].mxu0 %vm215_vm0, %v8441_v26 }
 0x779   :  { %5923 = vmatprep.mubr.msk.bf16.mxu0 %vm215_vm0, %v8448_v10 }
 0x780   :  { %5924 = vmatmul.mubr.msk.bf16.gmra.mrb[104].mxu0 %vm215_vm0, %v8455_v55 }
 0x781   :  { %5927 = vmatprep.mubr.msk.bf16.mxu0 %vm215_vm0, %v8462_v48 }
 0x788   :  { %5928 = vmatmul.mubr.msk.bf16.gmra.mrb[108].mxu0 %vm215_vm0, %v8469_v46 }
 0x789   :  { %5931 = vmatprep.mubr.msk.bf16.mxu0 %vm215_vm0, %v8476_v38 }
 0x790   :  { %5932 = vmatmul.mubr.msk.bf16.gmra.mrb[112].mxu0 %vm215_vm0, %v8483_v25 }
 0x791   :  { %5935 = vmatprep.mubr.msk.bf16.mxu0 %vm215_vm0, %v8490_v44 }
 0x798   :  { %5936 = vmatmul.mubr.msk.bf16.gmra.mrb[116].mxu0 %vm215_vm0, %v8497_v45 }
 0x799   :  { %5939 = vmatprep.mubr.msk.bf16.mxu0 %vm215_vm0, %v8504_v8 }
 0x7a0   :  { %5940 = vmatmul.mubr.msk.bf16.gmra.mrb[120].mxu0 %vm215_vm0, %v8511_v53 }
 0x7a1   :  { %5943 = vmatprep.mubr.msk.bf16.mxu0 %vm215_vm0, %v8518_v17 }
 0x7a8   :  { %5944 = vmatmul.mubr.msk.bf16.gmra.mrb[124].mxu0 %vm215_vm0, %v8525_v35 }
 0x843   :  { %v5917_v6 = vpop.f32.mrb[96].mxu0 }
 0x844   :  { %v2830_v31 = vpop.f32.mrb[97].mxu0  ;;  %v2839_v12 = vadd.f32 %v5917_v6, %v5186_v0 }
 0x845   :  { %v5918_v41 = vpop.f32.mrb[98].mxu0  ;;  %v2831_v1 = vadd.f32 %v5182_v3, %v2830_v31  ;;  %v5458_v3 = vld [vmem:[%s8891_s0 + $0x338] sm:$0xff]  }
 0x846   :  { %v2833_v50 = vpop.f32.mrb[99].mxu0  ;;  %v2842_v49 = vadd.f32 %v5918_v41, %v5187_v32  ;;  %v4665_v20 = vmul.f32 -1.442695, %v2839_v12 }
 0x847   :  { %v2834_v16 = vadd.f32 %v5183_v61, %v2833_v50  ;;  %v4663_v14 = vmul.f32 -1.442695, %v2831_v1  ;;  %v5457_v61 = vld [vmem:[%s8891_s0 + $0x330] sm:$0xff]   ;;  %v5210_v1 = vunpack.c.l.bf16 %v5458_v3 }
 0x848   :  { %v4666_v60 = vmul.f32 -1.442695, %v2842_v49  ;;  %6837 = vpow2.f32 %v4665_v20 }
 0x849   :  { %v4664_v58 = vmul.f32 -1.442695, %v2834_v16  ;;  %6839 = vpow2.f32 %v4663_v14 }
 0x84a   :  { %6841 = vpow2.f32 %v4666_v60 }
 0x84b   :  { %v5921_v13 = vpop.f32.mrb[100].mxu0  ;;  %6843 = vpow2.f32 %v4664_v58 }
 0x84c   :  { %v2846_v52 = vpop.f32.mrb[101].mxu0  ;;  %v2855_v18 = vadd.f32 %v5921_v13, %v5194_v2  ;;  %v5206_v13 = vunpack.c.l.bf16 %v5457_v61 }
 0x84d   :  { %v5922_v62 = vpop.f32.mrb[102].mxu0  ;;  %v2847_v54 = vadd.f32 %v5190_v43, %v2846_v52  ;;  %v5211_v52 = vunpack.c.h.bf16 %v5458_v3 }
 0x84e   :  { %v2849_v42 = vpop.f32.mrb[103].mxu0  ;;  %v2858_v56 = vadd.f32 %v5922_v62, %v5195_v23  ;;  %v4669_v22 = vmul.f32 -1.442695, %v2855_v18 }
 0x84f   :  { %v2850_v15 = vadd.f32 %v5191_v36, %v2849_v42  ;;  %v4667_v33 = vmul.f32 -1.442695, %v2847_v54 }
 0x850   :  { %v4670_v6 = vmul.f32 -1.442695, %v2858_v56  ;;  %6845 = vpow2.f32 %v4669_v22  ;;  %v5207_v56 = vunpack.c.h.bf16 %v5457_v61 }
 0x851   :  { %v4668_v41 = vmul.f32 -1.442695, %v2850_v15  ;;  %6847 = vpow2.f32 %v4667_v33 }
 0x852   :  { %6849 = vpow2.f32 %v4670_v6  ;;  %v6838_v49 = vpop.eup %6837 }
 0x853   :  { %v5925_v39 = vpop.f32.mrb[104].mxu0  ;;  %6851 = vpow2.f32 %v4668_v41  ;;  %v6840_v20 = vpop.eup %6839  ;;  %v3031_v37 = vadd.f32 1.0, %v6838_v49 }
 0x854   :  { %v2871_v19 = vadd.f32 %v5925_v39, %v5202_v21  ;;  %v2862_v59 = vpop.f32.mrb[105].mxu0  ;;  %v6842_v14 = vpop.eup %6841  ;;  %v3029_v42 = vadd.f32 1.0, %v6840_v20  ;;  %v5460_v39 = vld [vmem:[%s8891_s0 + $0x348] sm:$0xff]  }
 0x855   :  { %v2863_v0 = vadd.f32 %v5198_v47, %v2862_v59  ;;  %v5926_v31 = vpop.f32.mrb[106].mxu0  ;;  %v6844_v36 = vpop.eup %6843  ;;  %v3032_v58 = vadd.f32 1.0, %v6842_v14  ;;  %v5459_v59 = vld [vmem:[%s8891_s0 + $0x340] sm:$0xff]  }
 0x856   :  { %v2874_v32 = vadd.f32 %v5926_v31, %v5203_v9  ;;  %v2865_v50 = vpop.f32.mrb[107].mxu0  ;;  %v4673_v27 = vmul.f32 -1.442695, %v2871_v19  ;;  %v3030_v15 = vadd.f32 1.0, %v6844_v36 }
 0x857   :  { %v2866_v12 = vadd.f32 %v5199_v5, %v2865_v50  ;;  %v4671_v24 = vmul.f32 -1.442695, %v2863_v0 }
 0x858   :  { %v4674_v2 = vmul.f32 -1.442695, %v2874_v32  ;;  %6853 = vpow2.f32 %v4673_v27  ;;  %v5218_v32 = vunpack.c.l.bf16 %v5460_v39  ;;  %v5214_v27 = vunpack.c.l.bf16 %v5459_v59 }
 0x859   :  { %v4672_v16 = vmul.f32 -1.442695, %v2866_v12  ;;  %6855 = vpow2.f32 %v4671_v24 }
 0x85a   :  { %6857 = vpow2.f32 %v4674_v2  ;;  %v6846_v47 = vpop.eup %6845  ;;  %v5219_v2 = vunpack.c.h.bf16 %v5460_v39  ;;  %v5464_v39 = vld [vmem:[%s8891_s0 + $0x368] sm:$0xff]  }
 0x85b   :  { %v5929_v43 = vpop.f32.mrb[108].mxu0  ;;  %6859 = vpow2.f32 %v4672_v16  ;;  %v6848_v9 = vpop.eup %6847  ;;  %v3035_v0 = vadd.f32 1.0, %v6846_v47  ;;  %v5215_v16 = vunpack.c.h.bf16 %v5459_v59 }
 0x85c   :  { %v2887_v23 = vadd.f32 %v5929_v43, %v5210_v1  ;;  %v2878_v62 = vpop.f32.mrb[109].mxu0  ;;  %6861 = vrcp.f32 %v3031_v37  ;;  %v6850_v5 = vpop.eup %6849  ;;  %v3033_v41 = vadd.f32 1.0, %v6848_v9  ;;  %v8562_v37 = vld [vmem:[%s8891_s0 + $0x358] sm:$0xff]  }
 0x85d   :  { %v5930_v60 = vpop.f32.mrb[110].mxu0  ;;  %v2879_v34 = vadd.f32 %v5206_v13, %v2878_v62  ;;  %6863 = vrcp.f32 %v3029_v42  ;;  %v6852_v6 = vpop.eup %6851  ;;  %v3036_v61 = vadd.f32 1.0, %v6850_v5  ;;  %v5226_v9 = vunpack.c.l.bf16 %v8562_v37 }
 0x85e   :  { %v2881_v18 = vpop.f32.mrb[111].mxu0  ;;  %v2890_v54 = vadd.f32 %v5930_v60, %v5211_v52  ;;  %v4677_v21 = vmul.f32 -1.442695, %v2887_v23  ;;  %6865 = vrcp.f32 %v3032_v58  ;;  %v3034_v49 = vadd.f32 1.0, %v6852_v6 }
 0x85f   :  { %v4675_v22 = vmul.f32 -1.442695, %v2879_v34  ;;  %v2882_v31 = vadd.f32 %v5207_v56, %v2881_v18  ;;  %v8569_v18 = vld [vmem:[%s8891_s0 + $0x350] sm:$0xff]  }
 0x860   :  { %v4678_v33 = vmul.f32 -1.442695, %v2890_v54  ;;  %6867 = vpow2.f32 %v4677_v21 }
 0x861   :  { %6869 = vrcp.f32 %v3030_v15  ;;  %v4676_v20 = vmul.f32 -1.442695, %v2882_v31 }
 0x862   :  { %v6854_v12 = vpop.eup %6853  ;;  %6871 = vpow2.f32 %v4675_v22 }
 0x863   :  { %v5933_v19 = vpop.f32.mrb[112].mxu0  ;;  %v6856_v24 = vpop.eup %6855  ;;  %6873 = vpow2.f32 %v4678_v33  ;;  %v3039_v52 = vadd.f32 1.0, %v6854_v12 }
 0x864   :  { %v2894_v3 = vpop.f32.mrb[113].mxu0  ;;  %v6858_v13 = vpop.eup %6857  ;;  %6875 = vrcp.f32 %v3035_v0  ;;  %v2903_v14 = vadd.f32 %v5933_v19, %v5218_v32  ;;  %v3037_v23 = vadd.f32 1.0, %v6856_v24  ;;  %v5222_v19 = vunpack.c.l.bf16 %v8569_v18  ;;  %v5463_v32 = vld [vmem:[%s8891_s0 + $0x360] sm:$0xff]  }
 0x865   :  { %v5934_v50 = vpop.f32.mrb[114].mxu0  ;;  %v6860_v43 = vpop.eup %6859  ;;  %6877 = vrcp.f32 %v3033_v41  ;;  %v2895_v62 = vadd.f32 %v5214_v27, %v2894_v3  ;;  %v3040_v36 = vadd.f32 1.0, %v6858_v13  ;;  %v5234_v41 = vunpack.c.l.bf16 %v5464_v39 }
 0x866   :  { %v2897_v1 = vpop.f32.mrb[115].mxu0  ;;  %6879 = vrcp.f32 %v3036_v61  ;;  %v8564_v60 = vpop.eup %6861  ;;  %v2906_v42 = vadd.f32 %v5934_v50, %v5219_v2  ;;  %v3038_v54 = vadd.f32 1.0, %v6860_v43  ;;  %v4681_v15 = vmul.f32 -1.442695, %v2903_v14 }
 0x867   :  { %6881 = vrcp.f32 %v3034_v49  ;;  %v8571_v58 = vpop.eup %6863  ;;  %v2898_v21 = vadd.f32 %v5215_v16, %v2897_v1  ;;  %v4679_v33 = vmul.f32 -1.442695, %v2895_v62  ;;  %v5227_v2 = vunpack.c.h.bf16 %v8562_v37  ;;  %v5466_v37 = vld [vmem:[%s8891_s0 + $0x378] sm:$0xff]  }
 0x868   :  { %6883 = vpow2.f32 %v4676_v20  ;;  %v8573_v47 = vpop.eup %6865  ;;  %v4682_v0 = vmul.f32 -1.442695, %v2906_v42  ;;  %v5230_v20 = vunpack.c.l.bf16 %v5463_v32  ;;  %v5223_v42 = vunpack.c.h.bf16 %v8569_v18  ;;  %v5465_v18 = vld [vmem:[%s8891_s0 + $0x370] sm:$0xff]  }
 0x869   :  { %6885 = vrcp.f32 %v3039_v52  ;;  %v4680_v3 = vmul.f32 -1.442695, %v2898_v21 }
 0x86a   :  { %v6868_v5 = vpop.eup %6867  ;;  %6887 = vrcp.f32 %v3037_v23  ;;  %v5235_v23 = vunpack.c.h.bf16 %v5464_v39 }
 0x86b   :  { %v5937_v34 = vpop.f32.mrb[116].mxu0  ;;  %v8580_v6 = vpop.eup %6869  ;;  %6889 = vrcp.f32 %v3040_v36  ;;  %v3043_v12 = vadd.f32 1.0, %v6868_v5 }
 0x86c   :  { %v2910_v56 = vpop.f32.mrb[117].mxu0  ;;  %v6872_v31 = vpop.eup %6871  ;;  %6891 = vrcp.f32 %v3038_v54  ;;  %v2919_v61 = vadd.f32 %v5937_v34, %v5226_v9  ;;  %v5231_v54 = vunpack.c.h.bf16 %v5463_v32 }
 0x86d   :  { %v5938_v22 = vpop.f32.mrb[118].mxu0  ;;  %v6874_v50 = vpop.eup %6873  ;;  %6893 = vpow2.f32 %v4681_v15  ;;  %v2911_v1 = vadd.f32 %v5222_v19, %v2910_v56  ;;  %v3041_v49 = vadd.f32 1.0, %v6872_v31 }
 0x86e   :  { %v2913_v59 = vpop.f32.mrb[119].mxu0  ;;  %v8585_v27 = vpop.eup %6875  ;;  %6895 = vpow2.f32 %v4679_v33  ;;  %v3044_v43 = vadd.f32 1.0, %v6874_v50  ;;  %v4685_v36 = vmul.f32 -1.442695, %v2919_v61  ;;  %v2922_v5 = vadd.f32 %v5938_v22, %v5227_v2 }
 0x86f   :  { %v8587_v24 = vpop.eup %6877  ;;  %6897 = vpow2.f32 %v4682_v0  ;;  %v4683_v56 = vmul.f32 -1.442695, %v2911_v1  ;;  %v5242_v0 = vunpack.c.l.bf16 %v5466_v37  ;;  %v5238_v22 = vunpack.c.l.bf16 %v5465_v18 }
 0x870   :  { %v8590_v16 = vpop.eup %6879  ;;  %6899 = vpow2.f32 %v4680_v3  ;;  %v2914_v3 = vadd.f32 %v5223_v42, %v2913_v59 }
 0x871   :  { %v8592_v62 = vpop.eup %6881  ;;  %6901 = vrcp.f32 %v3043_v12  ;;  %v4686_v12 = vmul.f32 -1.442695, %v2922_v5 }
 0x872   :  { %v6884_v21 = vpop.eup %6883 }
 0x873   :  { %v5941_v13 = vpop.f32.mrb[120].mxu0  ;;  %v6886_v9 = vpop.eup %6885 }
 0x874   :  { %v2935_v52 = vadd.f32 %v5941_v13, %v5234_v41  ;;  %v2926_v14 = vpop.f32.mrb[121].mxu0  ;;  %v6888_v33 = vpop.eup %6887  ;;  %v3111_v5 = vmul.f32 %v6886_v9, %v8386_v7 }
 0x875   :  { %v5942_v34 = vpop.f32.mrb[122].mxu0  ;;  %v2927_v39 = vadd.f32 %v5230_v20, %v2926_v14  ;;  %v6890_v31 = vpop.eup %6889  ;;  %v5243_v20 = vunpack.c.h.bf16 %v5466_v37  ;;  %v3109_v7 = vmul.f32 %v6888_v33, %v8393_v51 }
 0x876   :  { %6903 = vtanh.f32 %v2935_v52  ;;  %v2929_v15 = vpop.f32.mrb[123].mxu0  ;;  %v2938_v19 = vadd.f32 %v5942_v34, %v5235_v23  ;;  %v6892_v32 = vpop.eup %6891  ;;  %v4684_v52 = vmul.f32 -1.442695, %v2914_v3 }
 0x877   :  { %6905 = vrcp.f32 %v3041_v49  ;;  %v2930_v41 = vadd.f32 %v5231_v54, %v2929_v15  ;;  %v6894_v50 = vpop.eup %6893  ;;  %v3042_v49 = vadd.f32 1.0, %v6884_v21 }
 0x878   :  { %6907 = vrcp.f32 %v3044_v43  ;;  %v6896_v1 = vpop.eup %6895  ;;  %v3047_v59 = vadd.f32 1.0, %v6894_v50 }
 0x879   :  { %6909 = vpow2.f32 %v4685_v36  ;;  %v6898_v43 = vpop.eup %6897  ;;  %v5239_v36 = vunpack.c.h.bf16 %v5465_v18 }
 0x87a   :  { %6911 = vpow2.f32 %v4683_v56  ;;  %v6900_v23 = vpop.eup %6899 }
 0x87b   :  { %6913 = vtanh.f32 %v2927_v39  ;;  %v5945_v61 = vpop.f32.mrb[124].mxu0  ;;  %v6902_v34 = vpop.eup %6901  ;;  %v3045_v39 = vadd.f32 1.0, %v6896_v1  ;;  %v3112_v1 = vmul.f32 %v6890_v31, %v8398_v11 }
 0x87c   :  { %6915 = vtanh.f32 %v2938_v19  ;;  %v2951_v2 = vadd.f32 %v5945_v61, %v5242_v0  ;;  %v2942_v13 = vpop.f32.mrb[125].mxu0  ;;  %v3115_v51 = vmul.f32 %v6902_v34, %v8405_v63 }
 0x87d   :  { %6917 = vtanh.f32 %v2930_v41  ;;  %v5946_v14 = vpop.f32.mrb[126].mxu0  ;;  %v2943_v54 = vadd.f32 %v5238_v22, %v2942_v13  ;;  %v3048_v41 = vadd.f32 1.0, %v6898_v43  ;;  %v3110_v13 = vmul.f32 %v6892_v32, %v8402_v40 }
 0x87e   :  { %6919 = vtanh.f32 %v2951_v2  ;;  %v2945_v42 = vpop.f32.mrb[127].mxu0  ;;  %v2954_v15 = vadd.f32 %v5946_v14, %v5243_v20 }
 0x87f   :  { %6921 = vpow2.f32 %v4686_v12  ;;  %v2946_v0 = vadd.f32 %v5239_v36, %v2945_v42  ;;  %v3046_v12 = vadd.f32 1.0, %v6900_v23 }
 0x880   :  { %v6904_v56 = vpop.eup %6903  ;;  %6923 = vrcp.f32 %v3042_v49 }
 0x881   :  { %v6906_v21 = vpop.eup %6905  ;;  %6925 = vpow2.f32 %v4684_v52  ;;  %v3119_v37 = vmul.f32 %v6904_v56, %v8564_v60 }
 0x882   :  { %v6908_v19 = vpop.eup %6907  ;;  %6927 = vrcp.f32 %v3047_v59 }
 0x883   :  { %v6910_v3 = vpop.eup %6909  ;;  %v8603_v18 = vadd.f32 %v3119_v37, %v3111_v5  ;;  %6929 = vtanh.f32 %v2943_v54  ;;  %v3116_v34 = vmul.f32 %v6908_v19, %v8416_v4 }
 0x884   :  { %v6912_v50 = vpop.eup %6911  ;;  %6931 = vtanh.f32 %v2954_v15  ;;  %v3051_v31 = vadd.f32 1.0, %v6910_v3 }
 0x885   :  { %v6914_v61 = vpop.eup %6913  ;;  %6933 = vrcp.f32 %v3045_v39  ;;  %v3049_v32 = vadd.f32 1.0, %v6912_v50 }
 0x886   :  { %v6916_v22 = vpop.eup %6915  ;;  %v3117_v9 = vmul.f32 %v6914_v61, %v8571_v58  ;;  %6935 = vtanh.f32 %v2946_v0 }
 0x887   :  { %v6918_v60 = vpop.eup %6917  ;;  %6937 = vrcp.f32 %v3048_v41  ;;  %v3120_v49 = vmul.f32 %v6916_v22, %v8573_v47 }
 0x888   :  { %v6920_v2 = vpop.eup %6919  ;;  %6939 = vrcp.f32 %v3046_v12  ;;  %v8610_v20 = vadd.f32 %v3117_v9, %v3109_v7  ;;  %v3118_v43 = vmul.f32 %v6918_v60, %v8580_v6 }
 0x889   :  { %v6922_v52 = vpop.eup %6921  ;;  %6941 = vtanh.f32 %v8603_v18  ;;  %v8615_v58 = vadd.f32 %v3120_v49, %v3112_v1  ;;  %v3123_v11 = vmul.f32 %v6920_v2, %v8585_v27  ;;  %v3113_v27 = vmul.f32 %v6906_v21, %v8412_v57 }
 0x88a   :  { %v6924_v33 = vpop.eup %6923  ;;  %6943 = vtanh.f32 %v8610_v20  ;;  %v8619_v47 = vadd.f32 %v3118_v43, %v3110_v13  ;;  %v3052_v63 = vadd.f32 1.0, %v6922_v52 }
 0x88b   :  { %v6926_v40 = vpop.eup %6925  ;;  %6945 = vtanh.f32 %v8615_v58  ;;  %v8622_v6 = vadd.f32 %v3123_v11, %v3115_v51  ;;  %v3114_v37 = vmul.f32 %v6924_v33, %v8421_v28 }
 0x88c   :  { %v6928_v14 = vpop.eup %6927  ;;  %6947 = vtanh.f32 %v8619_v47  ;;  %v3050_v15 = vadd.f32 1.0, %v6926_v40  ;;  %v5486_v40 = vld [vmem:[%s8892_s1 + $0x40] sm:$0xff]  }
 0x88d   :  { %v6930_v23 = vpop.eup %6929  ;;  %6949 = vrcp.f32 %v3051_v31 }
 0x88e   :  { %v6932_v59 = vpop.eup %6931  ;;  %v3121_v36 = vmul.f32 %v6930_v23, %v8587_v24  ;;  %6951 = vrcp.f32 %v3049_v32  ;;  %v5326_v32 = vunpack.c.l.bf16 %v5486_v40  ;;  %v5490_v23 = vld [vmem:[%s8892_s1 + $0x60] sm:$0xff]  }
 0x88f   :  { %v6934_v42 = vpop.eup %6933  ;;  %v3124_v54 = vmul.f32 %v6932_v59, %v8590_v16  ;;  %6953 = vrcp.f32 %v3052_v63 }
 0x890   :  { %v6936_v56 = vpop.eup %6935  ;;  %v8629_v5 = vadd.f32 %v3121_v36, %v3113_v27  ;;  %6955 = vtanh.f32 %v8622_v6 }
 0x891   :  { %v6938_v39 = vpop.eup %6937  ;;  %v8633_v57 = vadd.f32 %v3124_v54, %v3116_v34  ;;  %v3122_v24 = vmul.f32 %v6936_v56, %v8592_v62  ;;  %v5487_v54 = vld [vmem:[%s8892_s1 + $0x48] sm:$0xff]   ;;  %v5342_v56 = vunpack.c.l.bf16 %v5490_v23 }
 0x892   :  { %v6940_v21 = vpop.eup %6939  ;;  %6957 = vtanh.f32 %v8629_v5 }
 0x893   :  { %v6942_v4 = vpop.eup %6941  ;;  %6959 = vtanh.f32 %v8633_v57  ;;  %v8638_v16 = vadd.f32 %v3122_v24, %v3114_v37  ;;  %v5343_v37 = vunpack.c.h.bf16 %v5490_v23  ;;  %v5331_v24 = vunpack.c.h.bf16 %v5487_v54 }
 0x894   :  { %v6944_v19 = vpop.eup %6943  ;;  %6961 = vrcp.f32 %v3050_v15  ;;  %v3143_v3 = vmul.f32 %v6942_v4, %v6928_v14  ;;  %v5327_v14 = vunpack.c.h.bf16 %v5486_v40  ;;  %v5330_v15 = vunpack.c.l.bf16 %v5487_v54 }
 0x895   :  { %v6946_v0 = vpop.eup %6945  ;;  %6963 = vtanh.f32 %v8638_v16  ;;  %v3141_v50 = vmul.f32 %v6944_v19, %v6934_v42  ;;  %v4767_v42 = vmul.f32 -1.442695, %v5326_v32  ;;  %v5491_v19 = vld [vmem:[%s8892_s1 + $0x68] sm:$0xff]  }
 0x896   :  { %v6948_v28 = vpop.eup %6947  ;;  %v3144_v41 = vmul.f32 %v6946_v0, %v6938_v39  ;;  %v4768_v34 = vmul.f32 -1.442695, %v5327_v14  ;;  %v5489_v14 = vld [vmem:[%s8892_s1 + $0x58] sm:$0xff]  }
 0x897   :  { %v3142_v12 = vmul.f32 %v6948_v28, %v6940_v21  ;;  %v6950_v61 = vpop.eup %6949  ;;  %v4769_v28 = vmul.f32 -1.442695, %v5330_v15 }
 0x898   :  { %v3150_v62 = vpack.c.bf16 %v3144_v41, %v3143_v3  ;;  %v6952_v22 = vpop.eup %6951  ;;  %v5488_v3 = vld [vmem:[%s8892_s1 + $0x50] sm:$0xff]  }
 0x899   :  { %v3149_v7 = vpack.c.bf16 %v3142_v12, %v3141_v50  ;;  %v6954_v9 = vpop.eup %6953  ;;  %v4770_v50 = vmul.f32 -1.442695, %v5331_v24 }
 0x89a   :  { %v6956_v60 = vpop.eup %6955 }
 0x89b   :  { %5947 = vmatprep.subr.bf16.mxu1 %v3149_v7  ;;  %v3147_v13 = vmul.f32 %v6956_v60, %v6950_v61  ;;  %v5346_v61 = vunpack.c.l.bf16 %v5491_v19 }
 0x89c   :  { %v6958_v1 = vpop.eup %6957  ;;  %5948 = vmatpush3.bf16.msra.mxu1 %v3149_v7 }
 0x89d   :  { %v6960_v49 = vpop.eup %6959  ;;  %5949 = vmatprep.subr.bf16.mxu1 %v3150_v62  ;;  %v3145_v51 = vmul.f32 %v6958_v1, %v6952_v22  ;;  %v5347_v22 = vunpack.c.h.bf16 %v5491_v19 }
 0x89e   :  { %v6962_v2 = vpop.eup %6961  ;;  %v3148_v43 = vmul.f32 %v6960_v49, %v6954_v9 }
 0x89f   :  { %v6964_v52 = vpop.eup %6963 }
 0x8a0   :  { %5950 = vmatpush3.bf16.msra.mxu1 %v3150_v62  ;;  %v3146_v11 = vmul.f32 %v6964_v52, %v6962_v2  ;;  %v3152_v33 = vpack.c.bf16 %v3148_v43, %v3147_v13  ;;  %v5334_v62 = vunpack.c.l.bf16 %v5488_v3  ;;  %v5335_v2 = vunpack.c.h.bf16 %v5488_v3 }
 0x8a2   :  { %v3151_v31 = vpack.c.bf16 %v3146_v11, %v3145_v51  ;;  %v4771_v1 = vmul.f32 -1.442695, %v5334_v62  ;;  %v5492_v51 = vld [vmem:[%s8892_s1 + $0x70] sm:$0xff]  }
 0x8a3   :  { %v5351_v32 = vunpack.c.h.bf16 %v5492_v51 }
 0x8a4   :  { %5951 = vmatprep.subr.bf16.mxu1 %v3151_v31 }
 0x8a5   :  { %5952 = vmatpush3.bf16.msra.mxu1 %v3151_v31 }
 0x8a6   :  { %5953 = vmatprep.subr.bf16.mxu1 %v3152_v33 }
 0x8a9   :  { %5954 = vmatpush3.bf16.msra.mxu1 %v3152_v33 }
 0x8ac   :  { %5956 = vmatmul.mubr.msk.bf16.vlgmr.msra.gmra.mrb[96].mxu1 %vm215_vm0, %v8427_v30  ;;  %v5309_v30 = vld [vmem:[%s8892_s1] sm:$0xff]  }
 0x8ad   :  { %5959 = vmatprep.mubr.msk.bf16.mxu1 %vm215_vm0, %v8434_v29  ;;  %v5310_v29 = vunpack.c.l.bf16 %v5309_v30 }
 0x8b4   :  { %5960 = vmatmul.mubr.msk.bf16.gmra.mrb[100].mxu1 %vm215_vm0, %v8441_v26  ;;  %v5311_v26 = vunpack.c.h.bf16 %v5309_v30 }
 0x8b5   :  { %5963 = vmatprep.mubr.msk.bf16.mxu1 %vm215_vm0, %v8448_v10  ;;  %v4759_v10 = vmul.f32 -1.442695, %v5310_v29  ;;  %v4772_v29 = vmul.f32 -1.442695, %v5335_v2 }
 0x8b7   :  { %6965 = vpow2.f32 %v4759_v10 }
 0x8bc   :  { %5964 = vmatmul.mubr.msk.bf16.gmra.mrb[104].mxu1 %vm215_vm0, %v8455_v55  ;;  %v4760_v55 = vmul.f32 -1.442695, %v5311_v26  ;;  %v5485_v26 = vld [vmem:[%s8892_s1 + $0x18] sm:$0xff]  }
 0x8bd   :  { %5967 = vmatprep.mubr.msk.bf16.mxu1 %vm215_vm0, %v8462_v48  ;;  %v5483_v48 = vld [vmem:[%s8892_s1 + $0x8] sm:$0xff]  }
 0x8be   :  { %6967 = vpow2.f32 %v4760_v55 }
 0x8c1   :  { %v6966_v63 = vpop.eup %6965 }
 0x8c2   :  { %v3643_v27 = vadd.f32 1.0, %v6966_v63 }
 0x8c4   :  { %5968 = vmatmul.mubr.msk.bf16.gmra.mrb[108].mxu1 %vm215_vm0, %v8469_v46  ;;  %v5314_v46 = vunpack.c.l.bf16 %v5483_v48 }
 0x8c5   :  { %5971 = vmatprep.mubr.msk.bf16.mxu1 %vm215_vm0, %v8476_v38  ;;  %v5315_v38 = vunpack.c.h.bf16 %v5483_v48  ;;  %v5350_v48 = vunpack.c.l.bf16 %v5492_v51 }
 0x8c8   :  { %v6968_v59 = vpop.eup %6967 }
 0x8c9   :  { %v3644_v36 = vadd.f32 1.0, %v6968_v59 }
 0x8cc   :  { %5972 = vmatmul.mubr.msk.bf16.gmra.mrb[112].mxu1 %vm215_vm0, %v8483_v25  ;;  %v4761_v25 = vmul.f32 -1.442695, %v5314_v46 }
 0x8cd   :  { %5975 = vmatprep.mubr.msk.bf16.mxu1 %vm215_vm0, %v8490_v44  ;;  %v4762_v44 = vmul.f32 -1.442695, %v5315_v38 }
 0x8ce   :  { %6969 = vpow2.f32 %v4761_v25  ;;  %v5322_v25 = vunpack.c.l.bf16 %v5485_v26 }
 0x8cf   :  { %6971 = vpow2.f32 %v4762_v44 }
 0x8d0   :  { %v4765_v59 = vmul.f32 -1.442695, %v5322_v25 }
 0x8d4   :  { %5976 = vmatmul.mubr.msk.bf16.gmra.mrb[116].mxu1 %vm215_vm0, %v8497_v45  ;;  %v5484_v45 = vld [vmem:[%s8892_s1 + $0x10] sm:$0xff]  }
 0x8d5   :  { %5979 = vmatprep.mubr.msk.bf16.mxu1 %vm215_vm0, %v8504_v8  ;;  %v5318_v8 = vunpack.c.l.bf16 %v5484_v45 }
 0x8d8   :  { %v6970_v39 = vpop.eup %6969 }
 0x8d9   :  { %v6972_v21 = vpop.eup %6971  ;;  %v3645_v4 = vadd.f32 1.0, %v6970_v39 }
 0x8da   :  { %v3646_v0 = vadd.f32 1.0, %v6972_v21 }
 0x8dc   :  { %5980 = vmatmul.mubr.msk.bf16.gmra.mrb[120].mxu1 %vm215_vm0, %v8511_v53  ;;  %v5319_v53 = vunpack.c.h.bf16 %v5484_v45 }
 0x8dd   :  { %5983 = vmatprep.mubr.msk.bf16.mxu1 %vm215_vm0, %v8518_v17  ;;  %v4763_v17 = vmul.f32 -1.442695, %v5318_v8 }
 0x8df   :  { %6973 = vpow2.f32 %v4763_v17  ;;  %v5323_v17 = vunpack.c.h.bf16 %v5485_v26 }
 0x8e4   :  { %5984 = vmatmul.mubr.msk.bf16.gmra.mrb[124].mxu1 %vm215_vm0, %v8525_v35  ;;  %v4764_v35 = vmul.f32 -1.442695, %v5319_v53 }
 0x8e6   :  { %6975 = vpow2.f32 %v4764_v35 }
 0x8e7   :  { %6977 = vrcp.f32 %v3643_v27 }
 0x8e8   :  { %6979 = vrcp.f32 %v3644_v36 }
 0x8e9   :  { %6981 = vpow2.f32 %v4767_v42  ;;  %v6974_v41 = vpop.eup %6973  ;;  %v5338_v42 = vunpack.c.l.bf16 %v5489_v14 }
 0x8ea   :  { %6983 = vpow2.f32 %v4768_v34  ;;  %v3647_v7 = vadd.f32 1.0, %v6974_v41  ;;  %v4766_v34 = vmul.f32 -1.442695, %v5323_v17 }
 0x8eb   :  { %6985 = vtanh.f32 %v5342_v56  ;;  %v5339_v56 = vunpack.c.h.bf16 %v5489_v14  ;;  %v4773_v19 = vmul.f32 -1.442695, %v5338_v42 }
 0x8ec   :  { %6987 = vtanh.f32 %v5343_v37 }
 0x8ed   :  { %6989 = vrcp.f32 %v3645_v4  ;;  %v5493_v4 = vld [vmem:[%s8892_s1 + $0x78] sm:$0xff]   ;;  %v4774_v3 = vmul.f32 -1.442695, %v5339_v56  ;;  %v6060_v56 = vld [vmem:[%s8895_s4 + $0x8] sm:$0xff]  }
 0x8ee   :  { %6991 = vrcp.f32 %v3646_v0  ;;  %v5354_v62 = vunpack.c.l.bf16 %v5493_v4 }
 0x8ef   :  { %6993 = vpow2.f32 %v4769_v28 }
 0x8f0   :  { %v6976_v12 = vpop.eup %6975  ;;  %6995 = vpow2.f32 %v4770_v50 }
 0x8f1   :  { %v3648_v9 = vadd.f32 1.0, %v6976_v12  ;;  %v6978_v60 = vpop.eup %6977  ;;  %6997 = vtanh.f32 %v5346_v61 }
 0x8f2   :  { %v6980_v49 = vpop.eup %6979  ;;  %6999 = vtanh.f32 %v5347_v22 }
 0x8f3   :  { %v6982_v13 = vpop.eup %6981  ;;  %7001 = vrcp.f32 %v3647_v7 }
 0x8f4   :  { %v6984_v43 = vpop.eup %6983  ;;  %v3691_v52 = vadd.f32 1.0, %v6982_v13  ;;  %7003 = vrcp.f32 %v3648_v9 }
 0x8f5   :  { %v6986_v11 = vpop.eup %6985  ;;  %v3692_v33 = vadd.f32 1.0, %v6984_v43  ;;  %7005 = vpow2.f32 %v4771_v1 }
 0x8f6   :  { %v6988_v31 = vpop.eup %6987  ;;  %7007 = vrcp.f32 %v3691_v52  ;;  %v3723_v30 = vmul.f32 %v6986_v11, %v6978_v60  ;;  %v5355_v60 = vunpack.c.h.bf16 %v5493_v4  ;;  %v3970_v4 = vld [vmem:[%s8896_s5 + $0x28] sm:$0xff] }
 0x8f7   :  { %v6990_v10 = vpop.eup %6989  ;;  %7009 = vrcp.f32 %v3692_v33  ;;  %v3724_v55 = vmul.f32 %v6988_v31, %v6980_v49  ;;  %v6059_v33 = vld [vmem:[%s8895_s4] sm:$0xff]  }
 0x8f8   :  { %v6992_v46 = vpop.eup %6991  ;;  %7011 = vtanh.f32 %v3723_v30  ;;  %5995 = vmatprep.mubr.msk.bf16.mxu0 %vm215_vm0, %v6059_v33 }
 0x8f9   :  { %v6994_v38 = vpop.eup %6993  ;;  %7013 = vtanh.f32 %v3724_v55 }
 0x8fa   :  { %v6996_v44 = vpop.eup %6995  ;;  %v3693_v45 = vadd.f32 1.0, %v6994_v38  ;;  %7015 = vpow2.f32 %v4772_v29 }
 0x8fb   :  { %v6998_v8 = vpop.eup %6997  ;;  %v3694_v53 = vadd.f32 1.0, %v6996_v44  ;;  %7017 = vtanh.f32 %v5350_v48 }
 0x8fc   :  { %v7000_v35 = vpop.eup %6999  ;;  %7019 = vrcp.f32 %v3693_v45  ;;  %v3725_v40 = vmul.f32 %v6998_v8, %v6990_v10 }
 0x8fd   :  { %v7002_v63 = vpop.eup %7001  ;;  %7021 = vrcp.f32 %v3694_v53  ;;  %v3726_v23 = vmul.f32 %v7000_v35, %v6992_v46 }
 0x8fe   :  { %v7004_v27 = vpop.eup %7003  ;;  %7023 = vtanh.f32 %v3725_v40 }
 0x8ff   :  { %v7006_v36 = vpop.eup %7005  ;;  %7025 = vtanh.f32 %v3726_v23 }
 0x900   :  { %v7008_v54 = vpop.eup %7007  ;;  %7027 = vtanh.f32 %v5351_v32  ;;  %v3695_v37 = vadd.f32 1.0, %v7006_v36 }
 0x901   :  { %v7010_v15 = vpop.eup %7009  ;;  %7029 = vpow2.f32 %v4765_v59 }
 0x902   :  { %v7012_v39 = vpop.eup %7011  ;;  %7031 = vpow2.f32 %v4766_v34 }
 0x903   :  { %v7014_v24 = vpop.eup %7013  ;;  %v3739_v21 = vmul.f32 %v7012_v39, %v7008_v54  ;;  %7033 = vrcp.f32 %v3695_v37  ;;  %v3965_v54 = vld [vmem:[%s8896_s5] sm:$0xff]  ;;  %v6061_v39 = vld [vmem:[%s8895_s4 + $0x10] sm:$0xff]   ;;  %v3966_v37 = vld [vmem:[%s8896_s5 + $0x8] sm:$0xff] }
 0x904   :  { %v7016_v0 = vpop.eup %7015  ;;  %v3740_v28 = vmul.f32 %v7014_v24, %v7010_v15  ;;  %7035 = vpow2.f32 %v4773_v19  ;;  %3975 = vperm.xlu0 %6041, %v3965_v54   ;;  %v3967_v15 = vld [vmem:[%s8896_s5 + $0x10] sm:$0xff]  ;;  %v3968_v24 = vld [vmem:[%s8896_s5 + $0x18] sm:$0xff] }
 0x905   :  { %v7018_v41 = vpop.eup %7017  ;;  %v3696_v7 = vadd.f32 1.0, %v7016_v0  ;;  %7037 = vpow2.f32 %v4774_v3  ;;  %3985 = vperm.xlu1 %6042, %v3967_v15   ;;  %v6062_v19 = vld [vmem:[%s8895_s4 + $0x18] sm:$0xff]   ;;  %v6063_v0 = vld [vmem:[%s8894_s3] sm:$0xff]  }
 0x906   :  { %v7020_v50 = vpop.eup %7019  ;;  %v3767_v12 = vpack.c.bf16 %v3740_v28, %v3739_v21  ;;  %v3727_v61 = vmul.f32 %v7018_v41, %v7002_v63  ;;  %v3969_v21 = vld [vmem:[%s8896_s5 + $0x20] sm:$0xff]  ;;  %v3971_v28 = vld [vmem:[%s8896_s5 + $0x30] sm:$0xff]  ;;  %v3972_v3 = vld [vmem:[%s8896_s5 + $0x38] sm:$0xff] }
 0x907   :  { %v7022_v22 = vpop.eup %7021  ;;  %v5468_v41 = vld [vmem:[%s8891_s0 + $0x388] sm:$0xff]   ;;  %v4167_v15 = vld [vmem:[#allocation2] sm:$0x1] }
 0x908   :  { %v7024_v9 = vpop.eup %7023  ;;  %5987 = vmatprep.subr.bf16.mxu0 %v3767_v12  ;;  %7039 = vtanh.f32 %v3727_v61  ;;  %3980 = vperm.xlu0 %6041, %v3966_v37   ;;  %v5250_v61 = vunpack.c.l.bf16 %v5468_v41 }
 0x909   :  { %v7026_v1 = vpop.eup %7025  ;;  %5988 = vmatpush3.bf16.msra.mxu0 %v3767_v12  ;;  %v3741_v49 = vmul.f32 %v7024_v9, %v7020_v50  ;;  %7041 = vtanh.f32 %v5354_v62  ;;  %3990 = vperm.xlu1 %6042, %v3968_v24   ;;  %v5467_v50 = vld [vmem:[%s8891_s0 + $0x380] sm:$0xff]  }
 0x90a   :  { %v7028_v2 = vpop.eup %7027  ;;  %v3742_v13 = vmul.f32 %v7026_v1, %v7022_v22  ;;  %7043 = vrcp.f32 %v3696_v7  ;;  %v4037_v12 = vld [vmem:[%s8898_s7] sm:$0xff]  ;;  %v4038_v22 = vld [vmem:[%s8898_s7 + $0x8] sm:$0xff]  ;;  %v5246_v7 = vunpack.c.l.bf16 %v5467_v50 }
 0x90b   :  { %v7030_v43 = vpop.eup %7029  ;;  %v3728_v52 = vmul.f32 %v7028_v2, %v7004_v27  ;;  %7045 = vtanh.f32 %v5355_v60  ;;  %v5251_v60 = vunpack.c.h.bf16 %v5468_v41  ;;  %v4039_v2 = vld [vmem:[%s8898_s7 + $0x10] sm:$0xff] }
 0x90c   :  { %v3768_v51 = vpack.c.bf16 %v3742_v13, %v3741_v49  ;;  %v3649_v11 = vadd.f32 1.0, %v7030_v43  ;;  %v7032_v31 = vpop.eup %7031  ;;  %3995 = vperm.xlu0 %6041, %v3969_v21   ;;  %v5470_v43 = vld [vmem:[%s8891_s0 + $0x398] sm:$0xff]  }
 0x90d   :  { %7047 = vtanh.f32 %v3728_v52  ;;  %v3650_v30 = vadd.f32 1.0, %v7032_v31  ;;  %v7034_v29 = vpop.eup %7033  ;;  %4000 = vperm.xlu1 %6042, %v3970_v4   ;;  %v4040_v52 = vld [vmem:[%s8898_s7 + $0x18] sm:$0xff]  ;;  %v5469_v31 = vld [vmem:[%s8891_s0 + $0x390] sm:$0xff]  }
 0x90e   :  { %5989 = vmatprep.subr.bf16.mxu0 %v3768_v51  ;;  %7049 = vrcp.f32 %v3649_v11  ;;  %v7036_v26 = vpop.eup %7035  ;;  %v5247_v11 = vunpack.c.h.bf16 %v5467_v50 }
 0x90f   :  { %5990 = vmatpush3.bf16.msra.mxu0 %v3768_v51  ;;  %7051 = vrcp.f32 %v3650_v30  ;;  %v7038_v10 = vpop.eup %7037  ;;  %v3697_v38 = vadd.f32 1.0, %v7036_v26  ;;  %v5258_v30 = vunpack.c.l.bf16 %v5470_v43 }
 0x910   :  { %v3698_v45 = vadd.f32 1.0, %v7038_v10  ;;  %4005 = vperm.xlu0 %6041, %v3971_v28  }
 0x911   :  { %7053 = vrcp.f32 %v3697_v38  ;;  %4010 = vperm.xlu1 %6042, %v3972_v3   ;;  %v5254_v38 = vunpack.c.l.bf16 %v5469_v31  ;;  %v5474_v3 = vld [vmem:[%s8891_s0 + $0x3b8] sm:$0xff]  }
 0x912   :  { %v7040_v55 = vpop.eup %7039  ;;  %7055 = vrcp.f32 %v3698_v45  ;;  %v5259_v45 = vunpack.c.h.bf16 %v5470_v43  ;;  %v5275_v43 = vunpack.c.h.bf16 %v5474_v3 }
 0x913   :  { %v7042_v48 = vpop.eup %7041  ;;  %v3743_v44 = vmul.f32 %v7040_v55, %v7034_v29  ;;  %v4130_v29 = vld [vmem:[%s8899_s8] sm:$0xff]  ;;  %v4131_v55 = vld [vmem:[%s8899_s8 + $0x8] sm:$0xff] }
 0x914   :  { %v7044_v46 = vpop.eup %7043  ;;  %4043 = vperm.xlu0 %6041, %v4037_v12  }
 0x915   :  { %v7046_v25 = vpop.eup %7045  ;;  %4048 = vperm.xlu1 %6042, %v4038_v22  }
 0x917   :  { %v7048_v8 = vpop.eup %7047 }
 0x918   :  { %v7050_v53 = vpop.eup %7049  ;;  %v3744_v17 = vmul.f32 %v7048_v8, %v7044_v46  ;;  %4053 = vperm.xlu0 %6041, %v4039_v2  }
 0x919   :  { %v3729_v35 = vmul.f32 %v7050_v53, %v7042_v48  ;;  %v7052_v40 = vpop.eup %7051  ;;  %4058 = vperm.xlu1 %6042, %v4040_v52   ;;  %v5472_v53 = vld [vmem:[%s8891_s0 + $0x3a8] sm:$0xff]  }
 0x91a   :  { %v3769_v32 = vpack.c.bf16 %v3744_v17, %v3743_v44  ;;  %v3730_v14 = vmul.f32 %v7052_v40, %v7046_v25 }
 0x91b   :  { %7057 = vtanh.f32 %v3729_v35  ;;  %v7054_v63 = vpop.eup %7053  ;;  %v5255_v35 = vunpack.c.h.bf16 %v5469_v31 }
 0x91c   :  { %5991 = vmatprep.subr.bf16.mxu0 %v3769_v32  ;;  %7059 = vtanh.f32 %v3730_v14  ;;  %v7056_v23 = vpop.eup %7055  ;;  %4136 = vperm.xlu0 %6041, %v4130_v29   ;;  %v4132_v14 = vld [vmem:[%s8899_s8 + $0x10] sm:$0xff] }
 0x91d   :  { %5992 = vmatpush3.bf16.msra.mxu0 %v3769_v32  ;;  %v5471_v32 = vld [vmem:[%s8891_s0 + $0x3a0] sm:$0xff]   ;;  %4141 = vperm.xlu1 %6042, %v4131_v55  }
 0x91e   :  { %v5263_v37 = vunpack.c.h.bf16 %v5471_v32 }
 0x920   :  { %4146 = vperm.xlu0 %6041, %v4132_v14  }
 0x924   :  { %4170 = vperm.xlu0 %6041, %v4167_v15  }
 0x925   :  { %v7058_v59 = vpop.eup %7057 }
 0x926   :  { %v3745_v27 = vmul.f32 %v7058_v59, %v7054_v63  ;;  %v7060_v36 = vpop.eup %7059  ;;  %v4133_v63 = vld [vmem:[%s8899_s8 + $0x18] sm:$0xff] }
 0x927   :  { %v3746_v42 = vmul.f32 %v7060_v36, %v7056_v23  ;;  %4151 = vperm.xlu1 %6042, %v4133_v63  }
 0x929   :  { %v3770_v34 = vpack.c.bf16 %v3746_v42, %v3745_v27  ;;  %v5266_v27 = vunpack.c.l.bf16 %v5472_v53  ;;  %v5262_v42 = vunpack.c.l.bf16 %v5471_v32  ;;  %v5475_v32 = vld [vmem:[%s8891_s0 + $0x3c0] sm:$0xff]  }
 0x92b   :  { %5993 = vmatprep.subr.bf16.mxu0 %v3770_v34 }
 0x92c   :  { %5994 = vmatpush3.bf16.msra.mxu0 %v3770_v34 }
 0x92f   :  { %5996 = vmatmul.mubr.msk.bf16.vlgmr.msra.gmra.mrb[128].mxu0 %vm215_vm0, %v6060_v56  ;;  %v5267_v56 = vunpack.c.h.bf16 %v5472_v53 }
 0x930   :  { %5999 = vmatprep.mubr.msk.bf16.mxu0 %vm215_vm0, %v6061_v39 }
 0x937   :  { %6000 = vmatmul.mubr.msk.bf16.gmra.mrb[132].mxu0 %vm215_vm0, %v6062_v19 }
 0x938   :  { %6011 = vmatprep.mubr.msk.bf16.mxu0 %vm215_vm0, %v6063_v0 }
 0x97f   :  { %v5957_v62 = vpop.f32.mrb[96].mxu1 }
 0x980   :  { %v3252_v9 = vpop.f32.mrb[97].mxu1  ;;  %v3261_v13 = vadd.f32 %v5957_v62, %v5250_v61  ;;  %v5473_v61 = vld [vmem:[%s8891_s0 + $0x3b0] sm:$0xff]  }
 0x981   :  { %v5958_v1 = vpop.f32.mrb[98].mxu1  ;;  %v3253_v51 = vadd.f32 %v5246_v7, %v3252_v9  ;;  %v5274_v9 = vunpack.c.l.bf16 %v5474_v3 }
 0x982   :  { %v3255_v49 = vpop.f32.mrb[99].mxu1  ;;  %v3264_v33 = vadd.f32 %v5958_v1, %v5251_v60  ;;  %v4737_v26 = vmul.f32 -1.442695, %v3261_v13 }
 0x983   :  { %v4735_v48 = vmul.f32 -1.442695, %v3253_v51  ;;  %v3256_v46 = vadd.f32 %v5247_v11, %v3255_v49  ;;  %v5270_v49 = vunpack.c.l.bf16 %v5473_v61 }
 0x984   :  { %v4738_v44 = vmul.f32 -1.442695, %v3264_v33  ;;  %7061 = vpow2.f32 %v4737_v26 }
 0x985   :  { %7063 = vpow2.f32 %v4735_v48  ;;  %v4736_v23 = vmul.f32 -1.442695, %v3256_v46 }
 0x986   :  { %7065 = vpow2.f32 %v4738_v44 }
 0x987   :  { %v5961_v10 = vpop.f32.mrb[100].mxu1  ;;  %7067 = vpow2.f32 %v4736_v23 }
 0x988   :  { %v3268_v25 = vpop.f32.mrb[101].mxu1  ;;  %v3277_v17 = vadd.f32 %v5961_v10, %v5258_v30  ;;  %v5271_v30 = vunpack.c.h.bf16 %v5473_v61  ;;  %v8808_v61 = vld [vmem:[%s8891_s0 + $0x3d8] sm:$0xff]  }
 0x989   :  { %v5962_v8 = vpop.f32.mrb[102].mxu1  ;;  %v3269_v59 = vadd.f32 %v5254_v38, %v3268_v25 }
 0x98a   :  { %v3271_v40 = vpop.f32.mrb[103].mxu1  ;;  %v3280_v36 = vadd.f32 %v5962_v8, %v5259_v45  ;;  %v4741_v34 = vmul.f32 -1.442695, %v3277_v17  ;;  %v5476_v17 = vld [vmem:[%s8891_s0 + $0x3c8] sm:$0xff]  }
 0x98b   :  { %v3272_v54 = vadd.f32 %v5255_v35, %v3271_v40  ;;  %v4739_v24 = vmul.f32 -1.442695, %v3269_v59 }
 0x98c   :  { %v4742_v19 = vmul.f32 -1.442695, %v3280_v36  ;;  %7069 = vpow2.f32 %v4741_v34  ;;  %v5282_v36 = vunpack.c.l.bf16 %v5476_v17 }
 0x98d   :  { %v4740_v41 = vmul.f32 -1.442695, %v3272_v54  ;;  %7071 = vpow2.f32 %v4739_v24  ;;  %v5283_v24 = vunpack.c.h.bf16 %v5476_v17 }
 0x98e   :  { %v7062_v60 = vpop.eup %7061  ;;  %7073 = vpow2.f32 %v4742_v19 }
 0x98f   :  { %v5965_v39 = vpop.f32.mrb[104].mxu1  ;;  %v7064_v2 = vpop.eup %7063  ;;  %7075 = vpow2.f32 %v4740_v41  ;;  %v3453_v11 = vadd.f32 1.0, %v7062_v60 }
 0x990   :  { %v3293_v21 = vadd.f32 %v5965_v39, %v5266_v27  ;;  %v3284_v4 = vpop.f32.mrb[105].mxu1  ;;  %v7066_v52 = vpop.eup %7065  ;;  %v3451_v29 = vadd.f32 1.0, %v7064_v2  ;;  %v5477_v2 = vld [vmem:[%s8891_s0 + $0x3d0] sm:$0xff]  }
 0x991   :  { %v3285_v0 = vadd.f32 %v5262_v42, %v3284_v4  ;;  %v5966_v28 = vpop.f32.mrb[106].mxu1  ;;  %v7068_v55 = vpop.eup %7067  ;;  %v3454_v48 = vadd.f32 1.0, %v7066_v52  ;;  %v5290_v52 = vunpack.c.l.bf16 %v8808_v61 }
 0x992   :  { %v3296_v50 = vadd.f32 %v5966_v28, %v5267_v56  ;;  %v3287_v12 = vpop.f32.mrb[107].mxu1  ;;  %v4745_v62 = vmul.f32 -1.442695, %v3293_v21  ;;  %v3452_v53 = vadd.f32 1.0, %v7068_v55  ;;  %v5278_v56 = vunpack.c.l.bf16 %v5475_v32 }
 0x993   :  { %v3288_v22 = vadd.f32 %v5263_v37, %v3287_v12  ;;  %v4743_v7 = vmul.f32 -1.442695, %v3285_v0  ;;  %v5279_v0 = vunpack.c.h.bf16 %v5475_v32  ;;  %v5291_v32 = vunpack.c.h.bf16 %v8808_v61 }
 0x994   :  { %v4746_v1 = vmul.f32 -1.442695, %v3296_v50  ;;  %7077 = vpow2.f32 %v4745_v62 }
 0x995   :  { %v4744_v13 = vmul.f32 -1.442695, %v3288_v22  ;;  %7079 = vpow2.f32 %v4743_v7 }
 0x996   :  { %7081 = vpow2.f32 %v4746_v1  ;;  %v7070_v44 = vpop.eup %7069 }
 0x997   :  { %v5969_v51 = vpop.f32.mrb[108].mxu1  ;;  %7083 = vpow2.f32 %v4744_v13  ;;  %v7072_v35 = vpop.eup %7071  ;;  %v3457_v63 = vadd.f32 1.0, %v7070_v44 }
 0x998   :  { %v3309_v33 = vadd.f32 %v5969_v51, %v5274_v9  ;;  %v3300_v31 = vpop.f32.mrb[109].mxu1  ;;  %7085 = vrcp.f32 %v3453_v11  ;;  %v7074_v14 = vpop.eup %7073  ;;  %v3455_v54 = vadd.f32 1.0, %v7072_v35 }
 0x999   :  { %v3301_v26 = vadd.f32 %v5270_v49, %v3300_v31  ;;  %v5970_v10 = vpop.f32.mrb[110].mxu1  ;;  %7087 = vrcp.f32 %v3451_v29  ;;  %v7076_v59 = vpop.eup %7075  ;;  %v3458_v37 = vadd.f32 1.0, %v7074_v14 }
 0x99a   :  { %v3312_v46 = vadd.f32 %v5970_v10, %v5275_v43  ;;  %v3303_v38 = vpop.f32.mrb[111].mxu1  ;;  %v4749_v25 = vmul.f32 -1.442695, %v3309_v33  ;;  %7089 = vrcp.f32 %v3454_v48  ;;  %v3456_v19 = vadd.f32 1.0, %v7076_v59 }
 0x99b   :  { %v4747_v45 = vmul.f32 -1.442695, %v3301_v26  ;;  %v3304_v8 = vadd.f32 %v5271_v30, %v3303_v38  ;;  %v5480_v30 = vld [vmem:[%s8891_s0 + $0x3e8] sm:$0xff]   ;;  %v5286_v10 = vunpack.c.l.bf16 %v5477_v2 }
 0x99c   :  { %v4750_v40 = vmul.f32 -1.442695, %v3312_v46  ;;  %7091 = vpow2.f32 %v4749_v25 }
 0x99d   :  { %7093 = vpow2.f32 %v4747_v45  ;;  %v4748_v27 = vmul.f32 -1.442695, %v3304_v8  ;;  %v5298_v45 = vunpack.c.l.bf16 %v5480_v30  ;;  %v5479_v8 = vld [vmem:[%s8891_s0 + $0x3e0] sm:$0xff]  }
 0x99e   :  { %v7078_v34 = vpop.eup %7077  ;;  %7095 = vrcp.f32 %v3452_v53 }
 0x99f   :  { %v5973_v23 = vpop.f32.mrb[112].mxu1  ;;  %v7080_v39 = vpop.eup %7079  ;;  %7097 = vpow2.f32 %v4750_v40  ;;  %v3461_v3 = vadd.f32 1.0, %v7078_v34 }
 0x9a0   :  { %v3316_v42 = vpop.f32.mrb[113].mxu1  ;;  %v7082_v4 = vpop.eup %7081  ;;  %7099 = vrcp.f32 %v3457_v63  ;;  %v3325_v41 = vadd.f32 %v5973_v23, %v5282_v36  ;;  %v3459_v50 = vadd.f32 1.0, %v7080_v39  ;;  %v5287_v23 = vunpack.c.h.bf16 %v5477_v2 }
 0x9a1   :  { %v5974_v15 = vpop.f32.mrb[114].mxu1  ;;  %v7084_v28 = vpop.eup %7083  ;;  %7101 = vpow2.f32 %v4748_v27  ;;  %v3317_v12 = vadd.f32 %v5278_v56, %v3316_v42  ;;  %v3462_v22 = vadd.f32 1.0, %v7082_v4  ;;  %v5294_v27 = vunpack.c.l.bf16 %v5479_v8 }
 0x9a2   :  { %v3319_v21 = vpop.f32.mrb[115].mxu1  ;;  %7103 = vrcp.f32 %v3455_v54  ;;  %v8810_v62 = vpop.eup %7085  ;;  %v3328_v7 = vadd.f32 %v5974_v15, %v5283_v24  ;;  %v3460_v60 = vadd.f32 1.0, %v7084_v28  ;;  %v4753_v43 = vmul.f32 -1.442695, %v3325_v41 }
 0x9a3   :  { %7105 = vrcp.f32 %v3458_v37  ;;  %v8812_v9 = vpop.eup %7087  ;;  %v3320_v1 = vadd.f32 %v5279_v0, %v3319_v21  ;;  %v4751_v33 = vmul.f32 -1.442695, %v3317_v12  ;;  %v5299_v56 = vunpack.c.h.bf16 %v5480_v30  ;;  %v5482_v21 = vld [vmem:[%s8891_s0 + $0x3f8] sm:$0xff]  }
 0x9a4   :  { %7107 = vrcp.f32 %v3456_v19  ;;  %v8817_v13 = vpop.eup %7089  ;;  %v4754_v26 = vmul.f32 -1.442695, %v3328_v7  ;;  %v5295_v24 = vunpack.c.h.bf16 %v5479_v8  ;;  %v5481_v7 = vld [vmem:[%s8891_s0 + $0x3f0] sm:$0xff]  }
 0x9a5   :  { %7109 = vrcp.f32 %v3461_v3  ;;  %v4752_v46 = vmul.f32 -1.442695, %v3320_v1 }
 0x9a6   :  { %v7092_v11 = vpop.eup %7091  ;;  %7111 = vrcp.f32 %v3459_v50 }
 0x9a7   :  { %v5977_v49 = vpop.f32.mrb[116].mxu1  ;;  %v7094_v29 = vpop.eup %7093  ;;  %7113 = vrcp.f32 %v3462_v22  ;;  %v3465_v25 = vadd.f32 1.0, %v7092_v11  ;;  %v5306_v22 = vunpack.c.l.bf16 %v5482_v21 }
 0x9a8   :  { %v3332_v51 = vpop.f32.mrb[117].mxu1  ;;  %v8823_v48 = vpop.eup %7095  ;;  %7115 = vrcp.f32 %v3460_v60  ;;  %v3341_v44 = vadd.f32 %v5977_v49, %v5290_v52  ;;  %v3463_v17 = vadd.f32 1.0, %v7094_v29  ;;  %v5307_v29 = vunpack.c.h.bf16 %v5482_v21 }
 0x9a9   :  { %v5978_v31 = vpop.f32.mrb[118].mxu1  ;;  %v7098_v38 = vpop.eup %7097  ;;  %7117 = vpow2.f32 %v4753_v43  ;;  %v3333_v40 = vadd.f32 %v5286_v10, %v3332_v51  ;;  %v5302_v51 = vunpack.c.l.bf16 %v5481_v7 }
 0x9aa   :  { %v3335_v55 = vpop.f32.mrb[119].mxu1  ;;  %v8828_v53 = vpop.eup %7099  ;;  %7119 = vpow2.f32 %v4751_v33  ;;  %v3466_v63 = vadd.f32 1.0, %v7098_v38  ;;  %v4757_v42 = vmul.f32 -1.442695, %v3341_v44  ;;  %v3344_v3 = vadd.f32 %v5978_v31, %v5291_v32 }
 0x9ab   :  { %v7102_v35 = vpop.eup %7101  ;;  %7121 = vpow2.f32 %v4754_v26  ;;  %v4755_v19 = vmul.f32 -1.442695, %v3333_v40  ;;  %v3336_v12 = vadd.f32 %v5287_v23, %v3335_v55 }
 0x9ac   :  { %v8831_v14 = vpop.eup %7103  ;;  %7123 = vpow2.f32 %v4752_v46  ;;  %v3464_v39 = vadd.f32 1.0, %v7102_v35  ;;  %v4758_v43 = vmul.f32 -1.442695, %v3344_v3 }
 0x9ad   :  { %v8833_v36 = vpop.eup %7105  ;;  %7125 = vrcp.f32 %v3465_v25  ;;  %v4756_v33 = vmul.f32 -1.442695, %v3336_v12  ;;  %v5303_v25 = vunpack.c.h.bf16 %v5481_v7 }
 0x9ae   :  { %v8835_v15 = vpop.eup %7107  ;;  %7127 = vrcp.f32 %v3463_v17 }
 0x9af   :  { %v5981_v59 = vpop.f32.mrb[120].mxu1  ;;  %v7110_v4 = vpop.eup %7109 }
 0x9b0   :  { %v3357_v34 = vadd.f32 %v5981_v59, %v5298_v45  ;;  %v3348_v54 = vpop.f32.mrb[121].mxu1  ;;  %v7112_v28 = vpop.eup %7111  ;;  %v3533_v32 = vmul.f32 %v7110_v4, %v8603_v18 }
 0x9b1   :  { %v5982_v37 = vpop.f32.mrb[122].mxu1  ;;  %v3349_v41 = vadd.f32 %v5294_v27, %v3348_v54  ;;  %v7114_v50 = vpop.eup %7113  ;;  %v3531_v21 = vmul.f32 %v7112_v28, %v8610_v20 }
 0x9b2   :  { %7129 = vtanh.f32 %v3357_v34  ;;  %v3351_v0 = vpop.f32.mrb[123].mxu1  ;;  %v3360_v61 = vadd.f32 %v5982_v37, %v5299_v56  ;;  %v7116_v60 = vpop.eup %7115  ;;  %v3534_v4 = vmul.f32 %v7114_v50, %v8615_v58 }
 0x9b3   :  { %7131 = vrcp.f32 %v3466_v63  ;;  %v3352_v1 = vadd.f32 %v5295_v24, %v3351_v0  ;;  %v7118_v49 = vpop.eup %7117  ;;  %v3532_v3 = vmul.f32 %v7116_v60, %v8619_v47 }
 0x9b4   :  { %7133 = vpow2.f32 %v4757_v42  ;;  %v7120_v2 = vpop.eup %7119  ;;  %v3469_v10 = vadd.f32 1.0, %v7118_v49 }
 0x9b5   :  { %7135 = vrcp.f32 %v3464_v39  ;;  %v7122_v11 = vpop.eup %7121  ;;  %v3467_v38 = vadd.f32 1.0, %v7120_v2 }
 0x9b6   :  { %7137 = vpow2.f32 %v4755_v19  ;;  %v7124_v26 = vpop.eup %7123  ;;  %v3470_v42 = vadd.f32 1.0, %v7122_v11 }
 0x9b7   :  { %7139 = vtanh.f32 %v3349_v41  ;;  %v5985_v52 = vpop.f32.mrb[124].mxu1  ;;  %v7126_v46 = vpop.eup %7125  ;;  %v3468_v56 = vadd.f32 1.0, %v7124_v26 }
 0x9b8   :  { %7141 = vtanh.f32 %v3360_v61  ;;  %v3373_v31 = vadd.f32 %v5985_v52, %v5306_v22  ;;  %v3364_v30 = vpop.f32.mrb[125].mxu1  ;;  %v7128_v45 = vpop.eup %7127  ;;  %v3537_v22 = vmul.f32 %v7126_v46, %v8622_v6 }
 0x9b9   :  { %7143 = vtanh.f32 %v3352_v1  ;;  %v5986_v55 = vpop.f32.mrb[126].mxu1  ;;  %v3365_v8 = vadd.f32 %v5302_v51, %v3364_v30  ;;  %v3535_v49 = vmul.f32 %v7128_v45, %v8629_v5 }
 0x9ba   :  { %7145 = vtanh.f32 %v3373_v31  ;;  %v3367_v44 = vpop.f32.mrb[127].mxu1  ;;  %v3376_v35 = vadd.f32 %v5986_v55, %v5307_v29 }
 0x9bb   :  { %7147 = vpow2.f32 %v4758_v43  ;;  %v3368_v59 = vadd.f32 %v5303_v25, %v3367_v44 }
 0x9bc   :  { %v7130_v17 = vpop.eup %7129  ;;  %7149 = vpow2.f32 %v4756_v33 }
 0x9bd   :  { %v7132_v40 = vpop.eup %7131  ;;  %7151 = vrcp.f32 %v3469_v10  ;;  %v3541_v63 = vmul.f32 %v7130_v17, %v8810_v62 }
 0x9be   :  { %v7134_v23 = vpop.eup %7133  ;;  %7153 = vrcp.f32 %v3467_v38 }
 0x9bf   :  { %v7136_v27 = vpop.eup %7135  ;;  %v3549_v34 = vadd.f32 %v3541_v63, %v3533_v32  ;;  %7155 = vtanh.f32 %v3365_v8  ;;  %v3473_v37 = vadd.f32 1.0, %v7134_v23 }
 0x9c0   :  { %v7138_v54 = vpop.eup %7137  ;;  %7157 = vtanh.f32 %v3376_v35  ;;  %v3536_v30 = vmul.f32 %v7136_v27, %v8638_v16 }
 0x9c1   :  { %v7140_v39 = vpop.eup %7139  ;;  %7159 = vtanh.f32 %v3549_v34  ;;  %v3471_v1 = vadd.f32 1.0, %v7138_v54  ;;  %v6064_v54 = vld [vmem:[%s8894_s3 + $0x8] sm:$0xff]  }
 0x9c2   :  { %v7142_v24 = vpop.eup %7141  ;;  %v3539_v18 = vmul.f32 %v7140_v39, %v8812_v9  ;;  %7161 = vtanh.f32 %v3368_v59  ;;  %v6066_v39 = vld [vmem:[%s8894_s3 + $0x18] sm:$0xff]  }
 0x9c3   :  { %v7144_v62 = vpop.eup %7143  ;;  %7163 = vrcp.f32 %v3470_v42  ;;  %v3542_v19 = vmul.f32 %v7142_v24, %v8817_v13  ;;  %v3976_v24 = vpop.permute.xlu0 %3975 }
 0x9c4   :  { %v7146_v0 = vpop.eup %7145  ;;  %7165 = vrcp.f32 %v3468_v56  ;;  %v3547_v41 = vadd.f32 %v3539_v18, %v3531_v21  ;;  %v3540_v12 = vmul.f32 %v7144_v62, %v8823_v48  ;;  %v6065_v56 = vld [vmem:[%s8894_s3 + $0x10] sm:$0xff]   ;;  %v3986_v21 = vpop.permute.xlu1 %3985 }
 0x9c5   :  { %v7148_v61 = vpop.eup %7147  ;;  %7167 = vrcp.f32 %v3473_v37  ;;  %v3550_v20 = vadd.f32 %v3542_v19, %v3534_v4  ;;  %v3545_v9 = vmul.f32 %v7146_v0, %v8828_v53  ;;  %v3538_v53 = vmul.f32 %v7132_v40, %v8633_v57  ;;  %v6067_v37 = vld [vmem:[%s8897_s6] sm:$0xff]  }
 0x9c6   :  { %v7150_v28 = vpop.eup %7149  ;;  %7169 = vtanh.f32 %v3547_v41  ;;  %v3548_v58 = vadd.f32 %v3540_v12, %v3532_v3  ;;  %v3474_v60 = vadd.f32 1.0, %v7148_v61  ;;  %6027 = vmatprep.mubr.msk.bf16.mxu1 %vm215_vm0, %v6067_v37  ;;  %v4173_v37 = vlaneseq }
 0x9c7   :  { %v7152_v50 = vpop.eup %7151  ;;  %7171 = vtanh.f32 %v3550_v20  ;;  %v3553_v13 = vadd.f32 %v3545_v9, %v3537_v22  ;;  %v3472_v51 = vadd.f32 1.0, %v7150_v28  ;;  %v3981_v18 = vpop.permute.xlu0 %3980 }
 0x9c8   :  { %v7154_v7 = vpop.eup %7153  ;;  %7173 = vtanh.f32 %v3548_v58  ;;  %v3991_v62 = vpop.permute.xlu1 %3990 }
 0x9c9   :  { %v7156_v47 = vpop.eup %7155  ;;  %7175 = vtanh.f32 %v3553_v13 }
 0x9ca   :  { %v7158_v48 = vpop.eup %7157  ;;  %v3543_v6 = vmul.f32 %v7156_v47, %v8831_v14  ;;  %7177 = vrcp.f32 %v3471_v1 }
 0x9cb   :  { %v7160_v2 = vpop.eup %7159  ;;  %v3546_v43 = vmul.f32 %v7158_v48, %v8833_v36  ;;  %7179 = vrcp.f32 %v3474_v60  ;;  %v3996_v3 = vpop.permute.xlu0 %3995 }
 0x9cc   :  { %v7162_v52 = vpop.eup %7161  ;;  %v3551_v11 = vadd.f32 %v3543_v6, %v3535_v49  ;;  %v3565_v33 = vmul.f32 %v7160_v2, %v7152_v50  ;;  %v4001_v20 = vpop.permute.xlu1 %4000 }
 0x9cd   :  { %v7164_v31 = vpop.eup %7163  ;;  %v3554_v29 = vadd.f32 %v3546_v43, %v3538_v53  ;;  %v3544_v26 = vmul.f32 %v7162_v52, %v8835_v15 }
 0x9ce   :  { %v7166_v5 = vpop.eup %7165  ;;  %7181 = vtanh.f32 %v3551_v11 }
 0x9cf   :  { %v7168_v14 = vpop.eup %7167  ;;  %7183 = vtanh.f32 %v3554_v29  ;;  %v3552_v10 = vadd.f32 %v3544_v26, %v3536_v30  ;;  %v4006_v1 = vpop.permute.xlu0 %4005 }
 0x9d0   :  { %v7170_v57 = vpop.eup %7169  ;;  %7185 = vrcp.f32 %v3472_v51  ;;  %v4011_v6 = vpop.permute.xlu1 %4010 }
 0x9d1   :  { %v7172_v36 = vpop.eup %7171  ;;  %7187 = vtanh.f32 %v3552_v10  ;;  %v3563_v55 = vmul.f32 %v7170_v57, %v7154_v7 }
 0x9d2   :  { %v7174_v46 = vpop.eup %7173  ;;  %v3566_v38 = vmul.f32 %v7172_v36, %v7164_v31 }
 0x9d3   :  { %v7176_v25 = vpop.eup %7175  ;;  %v3564_v44 = vmul.f32 %v7174_v46, %v7166_v5  ;;  %v6068_v5 = vld [vmem:[%s8897_s6 + $0x8] sm:$0xff]   ;;  %s7265_s6 = smov [#allocation3]  }
 0x9d4   :  { %v3756_v45 = vpack.c.bf16 %v3566_v38, %v3565_v33  ;;  %v3569_v16 = vmul.f32 %v7176_v25, %v7168_v14  ;;  %v7178_v17 = vpop.eup %7177  ;;  %v4044_v14 = vpop.permute.xlu0 %4043  ;;  %s4191_s12 = sshll.u32 %s7265_s6, 4  ;;  %s4192_s12 = int_to_ptr.vmem [resolvable:$true] %s4191_s12 }
 0x9d5   :  { %v3755_v8 = vpack.c.bf16 %v3564_v44, %v3563_v55  ;;  %v7180_v35 = vpop.eup %7179  ;;  %v4049_v10 = vpop.permute.xlu1 %4048  ;;  %s7240_s4 = scalar_lea.vmem %s4192_s12, 16  ;;  %s7244_s13 = scalar_lea.vmem %s4192_s12, 32 }
 0x9d6   :  { %p7241_p0 = scmp.ne.s32.totalorder %s4192_s12, %s7240_s4  ;;  %p7245_p1 = scmp.lt.s32.totalorder %s4192_s12, %s4192_s12 }
 0x9d7   :  { %6003 = vmatprep.subr.bf16.mxu0 %v3755_v8  ;;  %p7246_p2 = scmp.lt.s32.totalorder %s7244_s13, %s7240_s4 }
 0x9d8   :  { %v7182_v15 = vpop.eup %7181  ;;  %6004 = vmatpush3.bf16.msra.mxu0 %v3755_v8  ;;  %v4054_v57 = vpop.permute.xlu0 %4053 }
 0x9d9   :  { %v7184_v40 = vpop.eup %7183  ;;  %6005 = vmatprep.subr.bf16.mxu0 %v3756_v45  ;;  %v3567_v32 = vmul.f32 %v7182_v15, %v7178_v17  ;;  %v4059_v36 = vpop.permute.xlu1 %4058  ;;  %p7247_p3 = por %p7246_p2, %p7245_p1 }
 0x9da   :  { %v7186_v63 = vpop.eup %7185  ;;  %v3570_v23 = vmul.f32 %v7184_v40, %v7180_v35 }
 0x9db   :  { %v7188_v59 = vpop.eup %7187  ;;  %p7248_p4 = pnand %p7247_p3, %p7241_p0 }
 0x9dc   :  { %6006 = vmatpush3.bf16.msra.mxu0 %v3756_v45  ;;  %v3568_v27 = vmul.f32 %v7188_v59, %v7186_v63  ;;  %v3758_v42 = vpack.c.bf16 %v3570_v23, %v3569_v16  ;;  %v4137_v45 = vpop.permute.xlu0 %4136 }
 0x9dd   :  { %v4142_v15 = vpop.permute.xlu1 %4141 }
 0x9de   :  { %v3757_v34 = vpack.c.bf16 %v3568_v27, %v3567_v32 }
 0x9e0   :  { %6007 = vmatprep.subr.bf16.mxu0 %v3757_v34  ;;  %v4147_v27 = vpop.permute.xlu0 %4146 }
 0x9e1   :  { %6008 = vmatpush3.bf16.msra.mxu0 %v3757_v34 }
 0x9e2   :  { %6009 = vmatprep.subr.bf16.mxu0 %v3758_v42 }
 0x9e5   :  { %6010 = vmatpush3.bf16.msra.mxu0 %v3758_v42 }
 0x9e8   :  { %6012 = vmatmul.mubr.msk.bf16.vlgmr.msra.gmra.mrb[128].mxu0 %vm215_vm0, %v6064_v54  ;;  %v4152_v54 = vpop.permute.xlu1 %4151 }
 0x9e9   :  { %6015 = vmatprep.mubr.msk.bf16.mxu0 %vm215_vm0, %v6065_v56 }
 0x9f0   :  { %6016 = vmatmul.mubr.msk.bf16.gmra.mrb[132].mxu0 %vm215_vm0, %v6066_v39 }
 0xabb   :  { %v6013_v4 = vpop.f32.mrb[128].mxu0 }
 0xabc   :  { %v4015_v19 = vadd.f32 %v6013_v4, %v3986_v21  ;;  %v3934_v0 = vpop.f32.mrb[129].mxu0 }
 0xabd   :  { %v4013_v41 = vadd.f32 %v3976_v24, %v3934_v0  ;;  %v6014_v12 = vpop.f32.mrb[130].mxu0 }
 0xabe   :  { %v4016_v61 = vadd.f32 %v6014_v12, %v3991_v62  ;;  %v3937_v22 = vpop.f32.mrb[131].mxu0  ;;  %v4023_v28 = vmax.f32 %v4015_v19, 0.0 }
 0xabf   :  { %v4014_v9 = vadd.f32 %v3981_v18, %v3937_v22  ;;  %v4021_v50 = vmax.f32 %v4013_v41, 0.0  ;;  %v4174_v18 = vshrl.u32 %v4173_v37, 7 }
 0xac0   :  { %v4024_v58 = vmax.f32 %v4016_v61, 0.0 }
 0xac1   :  { %v4022_v13 = vmax.f32 %v4014_v9, 0.0  ;;  %v4175_v19 = vsub.s32 0, %v4174_v18 }
 0xac2   :  { %v4034_v7 = vpack.c.bf16 %v4024_v58, %v4023_v28 }
 0xac3   :  { %v4033_v47 = vpack.c.bf16 %v4022_v13, %v4021_v50  ;;  %v6017_v60 = vpop.f32.mrb[132].mxu0 }
 0xac4   :  { %v4019_v48 = vadd.f32 %v6017_v60, %v4006_v1  ;;  %v3950_v49 = vpop.f32.mrb[133].mxu0 }
 0xac5   :  { %v4017_v2 = vadd.f32 %v3996_v3, %v3950_v49  ;;  %v6018_v53 = vpop.f32.mrb[134].mxu0  ;;  %6019 = vmatprep.subr.bf16.mxu1 %v4033_v47  ;;  %v4171_v3 = vpop.permute.xlu0 %4170 }
 0xac6   :  { %v4020_v43 = vadd.f32 %v6018_v53, %v4011_v6  ;;  %v3953_v52 = vpop.f32.mrb[135].mxu0  ;;  %6020 = vmatpush3.bf16.msra.mxu1 %v4033_v47  ;;  %v4027_v11 = vmax.f32 %v4019_v48, 0.0  ;;  %v4176_v12 = vrot.slane %v4171_v3, %v4175_v19 }
 0xac7   :  { %v4018_v51 = vadd.f32 %v4001_v20, %v3953_v52  ;;  %6021 = vmatprep.subr.bf16.mxu1 %v4034_v7  ;;  %v4025_v31 = vmax.f32 %v4017_v2, 0.0 }
 0xac8   :  { %v4028_v33 = vmax.f32 %v4020_v43, 0.0 }
 0xac9   :  { %v4026_v30 = vmax.f32 %v4018_v51, 0.0 }
 0xaca   :  { %v4036_v29 = vpack.c.bf16 %v4028_v33, %v4027_v11  ;;  %6022 = vmatpush3.bf16.msra.mxu1 %v4034_v7 }
 0xacb   :  { %v4035_v26 = vpack.c.bf16 %v4026_v30, %v4025_v31 }
 0xacd   :  { %6023 = vmatprep.subr.bf16.mxu1 %v4035_v26 }
 0xace   :  { %6024 = vmatpush3.bf16.msra.mxu1 %v4035_v26 }
 0xacf   :  { %6025 = vmatprep.subr.bf16.mxu1 %v4036_v29 }
 0xad2   :  { %6026 = vmatpush3.bf16.msra.mxu1 %v4036_v29 }
 0xad5   :  { %6028 = vmatmul.mubr.msk.bf16.vlgmr.msra.gmra.mrb[128].mxu1 %vm215_vm0, %v6068_v5 }
 0xba8   :  { %v6029_v55 = vpop.f32.mrb[128].mxu1 }
 0xba9   :  { %v4111_v46 = vpop.f32.mrb[129].mxu1  ;;  %v4120_v38 = vadd.f32 %v6029_v55, %v4054_v57 }
 0xbaa   :  { %v4112_v25 = vadd.f32 %v4111_v46, %v4044_v14  ;;  %v6030_v44 = vpop.f32.mrb[130].mxu1 }
 0xbab   :  { %v4114_v16 = vpop.f32.mrb[131].mxu1  ;;  %v4123_v17 = vadd.f32 %v6030_v44, %v4059_v36  ;;  %v4128_v40 = vmax.f32 %v4120_v38, 0.0 }
 0xbac   :  { %v4126_v8 = vmax.f32 %v4112_v25, 0.0  ;;  %v4115_v35 = vadd.f32 %v4114_v16, %v4049_v10 }
 0xbad   :  { %v4129_v23 = vmax.f32 %v4123_v17, 0.0  ;;  %v4156_v42 = vmul.f32 %v4147_v27, %v4128_v40 }
 0xbae   :  { %v4127_v32 = vmax.f32 %v4115_v35, 0.0  ;;  %v4154_v63 = vmul.f32 %v4137_v45, %v4126_v8 }
 0xbaf   :  { %v4157_v56 = vmul.f32 %v4152_v54, %v4129_v23 }
 0xbb0   :  { %v4155_v59 = vmul.f32 %v4142_v15, %v4127_v32 }
 0xbb2   :  { %v4158_v34 = vadd.f32 %v4155_v59, %v4154_v63 }
 0xbb4   :  { %v4159_v39 = vadd.f32 %v4158_v34, %v4156_v42 }
 0xbb6   :  { %v4160_v24 = vadd.f32 %v4159_v39, %v4157_v56 }
 0xbb8   :  { %v4161_v21 = vrot.slane %v4160_v24, 4 }
 0xbba   :  { %v4162_v62 = vadd.f32 %v4161_v21, %v4160_v24 }
 0xbbc   :  { %v4163_v4 = vrot.slane %v4162_v62, 2 }
 0xbbe   :  { %v4164_v0 = vadd.f32 %v4163_v4, %v4162_v62 }
 0xbc0   :  { %v4165_v41 = vrot.slane %v4164_v0, 1 }
 0xbc2   :  { %v4166_v61 = vadd.f32 %v4165_v41, %v4164_v0 }
 0xbc4   :  { %v4177_v22 = vadd.f32 %v4176_v12, %v4166_v61 }
 0xbc6   :  { %v4795_v20 = vmul.f32 -1.442695, %v4177_v22 }
 0xbc8   :  { %7189 = vpow2.f32 %v4795_v20 }
 0xbd2   :  { %v7190_v9 = vpop.eup %7189 }
 0xbd3   :  { %v4181_v28 = vadd.f32 1.0, %v7190_v9 }
 0xbd5   :  { %7191 = vrcp.f32 %v4181_v28 }
 0xbdf   :  { %v7192_v58 = vpop.eup %7191 }
 0xbe0   :  { %4184 = vst [vmem:[#allocation3] sm:$0x1] %v7192_v58 }
 0xbe1   :  { %7251 = shalt.err (!%p7248_p4)
}
 0xbe2   :  { %s7252_s15 = scalar_lea.hbm %s8901_s10, 16 }
 0xbe3   :  { %p7253_p5 = scmp.ne.s32.totalorder %s8901_s10, %s7252_s15  ;;  %p7256_p6 = scmp.lt.u32.totalorder %s7252_s15, %s8901_s10 }
 0xbe5   :  { %p7258_p7 = pnand %p7256_p6, %p7253_p5 }
 0xbe7   :  { %7261 = shalt.err (!%p7258_p7)
}
 0xbe8   :  { %4194 = dma.vmem_to_hbm [thread:$0]  %s4192_s12, 16, %s8901_s10, [#allocation4]  }
 0xbe9   :  { %7262 = dma.done.wait [#allocation4], 16  }
 0xbea   :  { %7263 = vsyncadd [#allocation4], 4294967280 }
 0xbeb   :  { %4198 = vsyncpa [#allocation4], 1 }

</bundles_post_ra>
